<compile_context>
chip_gen: v7x
topology: tpu7x:2x2x1
jax: 0.10.0
libtpu: 0.0.40
codegen_flags: <defaults>
</compile_context>

<pallas_src>
import jax
import jax.numpy as jnp
from jax.experimental import pallas as pl
from jax.experimental.pallas import tpu as pltpu

# ---- static configuration (gen_space='random1') -----------------------------
NUM_SIZE = [2, 12, 3, 2, 2, 3, 2, 2, 8, 4, 2]
INFO = [[0, 1, 11], [3, 4, 11], [4, 5, 7], [7, 8, 11]]
NUM_STEPS = len(NUM_SIZE)            # 11
VOCAB = sum(NUM_SIZE)                # 42
PAD_N = 128                          # lane-dense head width (max(NUM_SIZE)=12 -> 128)

B = 2             # batch
INPUT_DIM = 64    # small stand-in for the module's input_dim
E = 32            # embedding_dim
H = 32            # hidden_dim
ONEHOT_W = 128 - H                   # one-hot lanes so [one-hot | h] is exactly 128 wide
NEG_INF = -1e30


def controller_kernel(x_ref,                 # (B, INPUT_DIM)
                      wp_ref, bp_ref,        # (INPUT_DIM, E), (1, E)
                      wih_ref,               # (E, 4H)   -- step 0 only
                      wbig_ref,              # (128, 4H) = [emb @ wih ; 0 ; whh]
                      blstm_ref,             # (1, 4H)   = b_ih + b_hh
                      wout_ref, bout_ref,    # (NUM_STEPS, H, PAD_N), (NUM_STEPS, 1, PAD_N)
                      g_ref,                 # (NUM_STEPS, B, PAD_N) Gumbel(0,1) noise
                      pol_ref, logp_ref, ent_ref):
    col_idx = jax.lax.broadcasted_iota(jnp.int32, (B, PAD_N), 1)
    ocol_idx = jax.lax.broadcasted_iota(jnp.int32, (B, ONEHOT_W), 1)

    # Per-lane constants so ONE tanh pass over the (B, 4H) gate vreg gives
    # sigmoid() on the i,f,o lanes and tanh() on the g lanes:
    #   sigmoid(x) = 0.5 * tanh(0.5 * x) + 0.5
    lane4h = jax.lax.broadcasted_iota(jnp.int32, (B, 4 * H), 1)
    is_g = (lane4h >= 2 * H) & (lane4h < 3 * H)
    half_on_ifo = jnp.where(is_g, 1.0, 0.5)   # scale for input, and output multiplier
    add_on_ifo = jnp.where(is_g, 0.0, 0.5)    # +0.5 only on sigmoid lanes

    # Loop-invariant VMEM loads (single SSA values, reused by every unrolled step).
    wbig = wbig_ref[...]
    blstm = blstm_ref[...]

    # step 0 input: inp = tanh(project(x)); h0 = c0 = 0
    inp0 = jnp.tanh(
        jnp.dot(x_ref[...], wp_ref[...], preferred_element_type=jnp.float32)
        + bp_ref[...])
    hx = jnp.zeros((B, H), jnp.float32)
    cx = jnp.zeros((B, H), jnp.float32)

    acts = []
    lp_sum = jnp.zeros((B, 1), jnp.float32)
    ent_sum = jnp.zeros((B, 1), jnp.float32)
    action = None
    for j in range(NUM_STEPS):
        # ---- one fused MXU push per step on the recurrent path ----
        if j == 0:
            gates = (jnp.dot(inp0, wih_ref[...],
                             preferred_element_type=jnp.float32)
                     + blstm)                                   # h0 = 0 -> no whh term
        else:
            # inp = embedding[sum(num_size[:j-1]) + action_{j-1}]; folded into wbig.
            offset = sum(NUM_SIZE[:j - 1])
            onehot = (ocol_idx == (action + offset)).astype(jnp.float32)  # (B, 96)
            z = jnp.concatenate([onehot, hx], axis=-1)                    # (B, 128)
            gates = (jnp.dot(z, wbig, preferred_element_type=jnp.float32)
                     + blstm)                                             # (B, 4H)

        # ---- LSTM cell: single EUP tanh push over all 4H gate lanes (order i,f,g,o) ----
        act = half_on_ifo * jnp.tanh(gates * half_on_ifo) + add_on_ifo
        i_g = act[:, 0:H]
        f_g = act[:, H:2 * H]
        g_g = act[:, 2 * H:3 * H]
        o_g = act[:, 3 * H:4 * H]
        cx = f_g * cx + i_g * g_g
        hx = o_g * jnp.tanh(cx)

        # ---- output head j (lane-dense, invalid lanes masked) ----
        n_j = NUM_SIZE[j]
        logits = (jnp.dot(hx, wout_ref[j], preferred_element_type=jnp.float32)
                  + bout_ref[j])                                          # (B, PAD_N)
        valid = col_idx < n_j
        logits = jnp.where(valid, logits, NEG_INF)

        # ---- categorical sample via Gumbel-max (feeds the recurrent chain) ----
        # TODO(synk): matches torch.multinomial in distribution, not in random stream.
        pert = jnp.where(valid, logits + g_ref[j], NEG_INF)
        mx = jnp.max(pert, axis=-1, keepdims=True)
        action = jnp.min(jnp.where(pert >= mx, col_idx, PAD_N),
                         axis=-1, keepdims=True)                          # (B, 1) int32
        action = jnp.minimum(action, n_j - 1)

        # ---- softmax stats (off the recurrent critical path) ----
        m = jnp.max(logits, axis=-1, keepdims=True)
        ex = jnp.exp(logits - m)
        z_sum = jnp.sum(ex, axis=-1, keepdims=True)
        log_probs = (logits - m) - jnp.log(z_sum)
        probs = ex / z_sum
        entropy = -jnp.sum(jnp.where(valid, probs * log_probs, 0.0),
                           axis=-1, keepdims=True)                        # (B, 1)
        sel_lp = jnp.sum(jnp.where(col_idx == action, log_probs, 0.0),
                         axis=-1, keepdims=True)                          # (B, 1)

        # ---- `info` conditional mask, accumulated on the fly ----
        # (every anchor step a with lo <= j < hi satisfies a < j)
        m_j = 1.0
        for a, lo, hi in INFO:
            if lo <= j < hi:
                m_j = m_j * (acts[a] != 0).astype(jnp.float32)            # (B, 1)
        lp_sum = lp_sum + m_j * sel_lp
        ent_sum = ent_sum + m_j * entropy

        acts.append(action)

    pol_ref[...] = jnp.concatenate(acts, axis=-1)    # (B, NUM_STEPS) int32
    logp_ref[...] = lp_sum
    ent_ref[...] = ent_sum


@jax.jit
def controller_forward(key, x, wp, bp, emb, wih, whh, blstm, wout, bout):
    # Loop-invariant weight fusion (done once, outside the kernel):
    #   rows [0, VOCAB)         : emb @ wih  (embedding row -> ih-gate space)
    #   rows [VOCAB, ONEHOT_W)  : zeros      (padding lanes of the one-hot)
    #   rows [ONEHOT_W, 128)    : whh        (hidden -> hh-gate space)
    wbig = jnp.concatenate(
        [jnp.dot(emb, wih, preferred_element_type=jnp.float32),
         jnp.zeros((ONEHOT_W - VOCAB, 4 * H), jnp.float32),
         whh], axis=0)                                        # (128, 4H)
    gumbel = jax.random.gumbel(key, (NUM_STEPS, B, PAD_N), jnp.float32)

    vmem = pl.BlockSpec(memory_space=pltpu.MemorySpace.VMEM)
    out_shapes = (
        jax.ShapeDtypeStruct((B, NUM_STEPS), jnp.int32),      # policies
        jax.ShapeDtypeStruct((B, 1), jnp.float32),            # sum log_probs
        jax.ShapeDtypeStruct((B, 1), jnp.float32),            # sum entropies
    )
    pols, logp, ent = pl.pallas_call(
        controller_kernel,
        out_shape=out_shapes,
        in_specs=[vmem] * 9,
        out_specs=(vmem, vmem, vmem),
    )(x, wp, bp, wih, wbig, blstm, wout, bout, gumbel)
    return pols, logp[:, 0], ent[:, 0]


def init_params(key):
    """uniform(-0.1, 0.1), same as the PyTorch module's init (kernel layout)."""
    ks = jax.random.split(key, 8)
    u = lambda k, shape: jax.random.uniform(k, shape, jnp.float32, -0.1, 0.1)
    wp = u(ks[0], (INPUT_DIM, E))                    # project.weight^T
    bp = u(ks[1], (1, E))                            # project.bias
    emb = u(ks[2], (VOCAB, E))                       # embedding.weight
    wih = u(ks[3], (E, 4 * H))                       # lstm.weight_ih_l0^T
    whh = u(ks[4], (H, 4 * H))                       # lstm.weight_hh_l0^T
    blstm = u(ks[5], (1, 4 * H)) + u(ks[6], (1, 4 * H))   # b_ih + b_hh
    # per-head weights, zero-padded to PAD_N lanes and stacked
    wout = jnp.zeros((NUM_STEPS, H, PAD_N), jnp.float32)
    bout = jnp.zeros((NUM_STEPS, 1, PAD_N), jnp.float32)
    hk = jax.random.split(ks[7], 2 * NUM_STEPS)
    for j, n in enumerate(NUM_SIZE):
        wout = wout.at[j, :, :n].set(u(hk[2 * j], (H, n)))
        bout = bout.at[j, 0, :n].set(u(hk[2 * j + 1], (n,)))
    return wp, bp, emb, wih, whh, blstm, wout, bout


def reference_teacher_forced(x, actions, wp, bp, emb, wih, whh, blstm, wout, bout):
    """Pure-JAX re-rollout of the module conditioned on the kernel's actions."""
    inp = jnp.tanh(x @ wp + bp)
    hx = jnp.zeros((B, H), jnp.float32)
    cx = jnp.zeros((B, H), jnp.float32)
    lps, ents = [], []
    for j in range(NUM_STEPS):
        if j > 0:
            idx = sum(NUM_SIZE[:j - 1]) + actions[:, j - 1]
            inp = emb[idx]
        gates = inp @ wih + hx @ whh + blstm                  # (B, 4H), order i,f,g,o
        i_g = jax.nn.sigmoid(gates[:, 0:H])
        f_g = jax.nn.sigmoid(gates[:, H:2 * H])
        g_g = jnp.tanh(gates[:, 2 * H:3 * H])
        o_g = jax.nn.sigmoid(gates[:, 3 * H:4 * H])
        cx = f_g * cx + i_g * g_g
        hx = o_g * jnp.tanh(cx)
        n_j = NUM_SIZE[j]
        logits = hx @ wout[j, :, :n_j] + bout[j, 0, :n_j]
        logp = jax.nn.log_softmax(logits, axis=-1)
        probs = jax.nn.softmax(logits, axis=-1)
        ents.append(-jnp.sum(probs * logp, axis=-1))
        lps.append(jnp.take_along_axis(logp, actions[:, j:j + 1], axis=-1)[:, 0])
    lp_all = jnp.stack(lps, axis=-1)                          # (B, NUM_STEPS)
    ent_all = jnp.stack(ents, axis=-1)
    mask = jnp.ones((B, NUM_STEPS), jnp.float32)
    step_pos = jnp.arange(NUM_STEPS)[None, :]
    for a, lo, hi in INFO:
        cond = actions[:, a:a + 1] == 0
        mask = jnp.where(cond & (step_pos >= lo) & (step_pos < hi), 0.0, mask)
    return jnp.sum(mask * lp_all, axis=-1), jnp.sum(mask * ent_all, axis=-1)


if __name__ == "__main__":
    key = jax.random.PRNGKey(0)
    pkey, xkey, skey = jax.random.split(key, 3)
    params = init_params(pkey)
    x = jax.random.normal(xkey, (B, INPUT_DIM), jnp.float32)

    policies, log_prob_sum, entropy_sum = controller_forward(skey, x, *params)
    jax.block_until_ready((policies, log_prob_sum, entropy_sum))

    # structural sanity checks
    assert policies.shape == (B, NUM_STEPS) and policies.dtype == jnp.int32
    assert log_prob_sum.shape == (B,) and entropy_sum.shape == (B,)
    for j, n in enumerate(NUM_SIZE):
        assert int(policies[:, j].min()) >= 0 and int(policies[:, j].max()) < n
    assert bool(jnp.all(jnp.isfinite(log_prob_sum)))
    assert bool(jnp.all(jnp.isfinite(entropy_sum)))
    assert bool(jnp.all(log_prob_sum <= 0.0))
    assert bool(jnp.all(entropy_sum >= 0.0))

    # numerical check against a pure-JAX rollout conditioned on the sampled actions
    ref_lp, ref_ent = reference_teacher_forced(x, policies, *params)
    assert bool(jnp.allclose(log_prob_sum, ref_lp, atol=5e-2, rtol=5e-2)), \
        (log_prob_sum, ref_lp)
    assert bool(jnp.allclose(entropy_sum, ref_ent, atol=5e-2, rtol=5e-2)), \
        (entropy_sum, ref_ent)

    print("KERNEL_OK")
</pallas_src>

<mosaic_0001>
module attributes {stable_mosaic.version = 11 : i64} {
  func.func @controller_kernel(%arg0: memref<2x64xf32, #tpu.memory_space<vmem>>, %arg1: memref<64x32xf32, #tpu.memory_space<vmem>>, %arg2: memref<1x32xf32, #tpu.memory_space<vmem>>, %arg3: memref<32x128xf32, #tpu.memory_space<vmem>>, %arg4: memref<128x128xf32, #tpu.memory_space<vmem>>, %arg5: memref<1x128xf32, #tpu.memory_space<vmem>>, %arg6: memref<11x32x128xf32, #tpu.memory_space<vmem>>, %arg7: memref<11x1x128xf32, #tpu.memory_space<vmem>>, %arg8: memref<11x2x128xf32, #tpu.memory_space<vmem>>, %arg9: memref<2x11xi32, #tpu.memory_space<vmem>>, %arg10: memref<2x1xf32, #tpu.memory_space<vmem>>, %arg11: memref<2x1xf32, #tpu.memory_space<vmem>>) attributes {dimension_semantics = [], scalar_prefetch = 0 : i64, scratch_operands = 0 : i64, tpu.core_type = #tpu.core_type<tc>} {
    %0 = tpu.iota {dimensions = array<i32: 1>} : vector<2x128xi32>
    %1 = tpu.iota {dimensions = array<i32: 1>} : vector<2x96xi32>
    %2 = tpu.iota {dimensions = array<i32: 1>} : vector<2x128xi32>
    %c64_i32 = arith.constant 64 : i32
    %3 = vector.broadcast %c64_i32 : i32 to vector<2x128xi32>
    %4 = arith.cmpi sge, %2, %3 : vector<2x128xi32>
    %c96_i32 = arith.constant 96 : i32
    %5 = vector.broadcast %c96_i32 : i32 to vector<2x128xi32>
    %6 = arith.cmpi slt, %2, %5 : vector<2x128xi32>
    %7 = arith.andi %4, %6 : vector<2x128xi1>
    %cst = arith.constant 1.000000e+00 : f32
    %cst_0 = arith.constant 5.000000e-01 : f32
    %8 = vector.broadcast %cst : f32 to vector<2x128xf32>
    %9 = vector.broadcast %cst_0 : f32 to vector<2x128xf32>
    %10 = arith.select %7, %8, %9 : vector<2x128xi1>, vector<2x128xf32>
    %cst_1 = arith.constant 0.000000e+00 : f32
    %cst_2 = arith.constant 5.000000e-01 : f32
    %11 = vector.broadcast %cst_1 : f32 to vector<2x128xf32>
    %12 = vector.broadcast %cst_2 : f32 to vector<2x128xf32>
    %13 = arith.select %7, %11, %12 : vector<2x128xi1>, vector<2x128xf32>
    %c0 = arith.constant 0 : index
    %c0_3 = arith.constant 0 : index
    %14 = vector.load %arg4[%c0, %c0_3] : memref<128x128xf32, #tpu.memory_space<vmem>>, vector<128x128xf32>
    %c0_4 = arith.constant 0 : index
    %c0_5 = arith.constant 0 : index
    %15 = vector.load %arg5[%c0_4, %c0_5] : memref<1x128xf32, #tpu.memory_space<vmem>>, vector<1x128xf32>
    %c0_6 = arith.constant 0 : index
    %c0_7 = arith.constant 0 : index
    %16 = vector.load %arg0[%c0_6, %c0_7] : memref<2x64xf32, #tpu.memory_space<vmem>>, vector<2x64xf32>
    %c0_8 = arith.constant 0 : index
    %c0_9 = arith.constant 0 : index
    %17 = vector.load %arg1[%c0_8, %c0_9] : memref<64x32xf32, #tpu.memory_space<vmem>>, vector<64x32xf32>
    %cst_10 = arith.constant dense<0.000000e+00> : vector<2x32xf32>
    %18 = tpu.matmul %16, %17, %cst_10 {dimension_numbers = #tpu.dot_dimension_numbers<[1], [0], [0], [1], [0, 0, 1, 1], [], []>} : vector<2x64xf32>, vector<64x32xf32>, vector<2x32xf32> -> vector<2x32xf32>
    %c0_11 = arith.constant 0 : index
    %c0_12 = arith.constant 0 : index
    %19 = vector.load %arg2[%c0_11, %c0_12] : memref<1x32xf32, #tpu.memory_space<vmem>>, vector<1x32xf32>
    %20 = vector.broadcast %19 : vector<1x32xf32> to vector<2x32xf32>
    %21 = arith.addf %18, %20 : vector<2x32xf32>
    %22 = math.tanh %21 : vector<2x32xf32>
    %cst_13 = arith.constant 0.000000e+00 : f32
    %23 = vector.broadcast %cst_13 : f32 to vector<2x32xf32>
    %cst_14 = arith.constant 0.000000e+00 : f32
    %24 = vector.broadcast %cst_14 : f32 to vector<2x1xf32>
    %cst_15 = arith.constant 0.000000e+00 : f32
    %25 = vector.broadcast %cst_15 : f32 to vector<2x1xf32>
    %c0_16 = arith.constant 0 : index
    %c0_17 = arith.constant 0 : index
    %26 = vector.load %arg3[%c0_16, %c0_17] : memref<32x128xf32, #tpu.memory_space<vmem>>, vector<32x128xf32>
    %cst_18 = arith.constant dense<0.000000e+00> : vector<2x128xf32>
    %27 = tpu.matmul %22, %26, %cst_18 {dimension_numbers = #tpu.dot_dimension_numbers<[1], [0], [0], [1], [0, 0, 1, 1], [], []>} : vector<2x32xf32>, vector<32x128xf32>, vector<2x128xf32> -> vector<2x128xf32>
    %28 = vector.broadcast %15 : vector<1x128xf32> to vector<2x128xf32>
    %29 = arith.addf %27, %28 : vector<2x128xf32>
    %30 = arith.mulf %29, %10 : vector<2x128xf32>
    %31 = math.tanh %30 : vector<2x128xf32>
    %32 = arith.mulf %10, %31 : vector<2x128xf32>
    %33 = arith.addf %32, %13 : vector<2x128xf32>
    %34 = vector.extract_strided_slice %33 {offsets = [0, 0], sizes = [2, 32], strides = [1, 1]} : vector<2x128xf32> to vector<2x32xf32>
    %35 = vector.extract_strided_slice %33 {offsets = [0, 32], sizes = [2, 32], strides = [1, 1]} : vector<2x128xf32> to vector<2x32xf32>
    %36 = vector.extract_strided_slice %33 {offsets = [0, 64], sizes = [2, 32], strides = [1, 1]} : vector<2x128xf32> to vector<2x32xf32>
    %37 = vector.extract_strided_slice %33 {offsets = [0, 96], sizes = [2, 32], strides = [1, 1]} : vector<2x128xf32> to vector<2x32xf32>
    %38 = arith.mulf %35, %23 : vector<2x32xf32>
    %39 = arith.mulf %34, %36 : vector<2x32xf32>
    %40 = arith.addf %38, %39 : vector<2x32xf32>
    %41 = math.tanh %40 : vector<2x32xf32>
    %42 = arith.mulf %37, %41 : vector<2x32xf32>
    %c0_19 = arith.constant 0 : index
    %c0_20 = arith.constant 0 : index
    %c0_21 = arith.constant 0 : index
    %43 = vector.load %arg6[%c0_19, %c0_20, %c0_21] : memref<11x32x128xf32, #tpu.memory_space<vmem>>, vector<1x32x128xf32>
    %44 = vector.shape_cast %43 : vector<1x32x128xf32> to vector<32x128xf32>
    %cst_22 = arith.constant dense<0.000000e+00> : vector<2x128xf32>
    %45 = tpu.matmul %42, %44, %cst_22 {dimension_numbers = #tpu.dot_dimension_numbers<[1], [0], [0], [1], [0, 0, 1, 1], [], []>} : vector<2x32xf32>, vector<32x128xf32>, vector<2x128xf32> -> vector<2x128xf32>
    %c0_23 = arith.constant 0 : index
    %c0_24 = arith.constant 0 : index
    %c0_25 = arith.constant 0 : index
    %46 = vector.load %arg7[%c0_23, %c0_24, %c0_25] : memref<11x1x128xf32, #tpu.memory_space<vmem>>, vector<1x1x128xf32>
    %47 = vector.shape_cast %46 : vector<1x1x128xf32> to vector<1x128xf32>
    %48 = vector.broadcast %47 : vector<1x128xf32> to vector<2x128xf32>
    %49 = arith.addf %45, %48 : vector<2x128xf32>
    %c2_i32 = arith.constant 2 : i32
    %50 = vector.broadcast %c2_i32 : i32 to vector<2x128xi32>
    %51 = arith.cmpi slt, %0, %50 : vector<2x128xi32>
    %cst_26 = arith.constant -1.000000e+30 : f32
    %52 = vector.broadcast %cst_26 : f32 to vector<2x128xf32>
    %53 = arith.select %51, %49, %52 : vector<2x128xi1>, vector<2x128xf32>
    %c0_27 = arith.constant 0 : index
    %c0_28 = arith.constant 0 : index
    %c0_29 = arith.constant 0 : index
    %54 = vector.load %arg8[%c0_27, %c0_28, %c0_29] : memref<11x2x128xf32, #tpu.memory_space<vmem>>, vector<1x2x128xf32>
    %55 = vector.shape_cast %54 : vector<1x2x128xf32> to vector<2x128xf32>
    %56 = arith.addf %53, %55 : vector<2x128xf32>
    %cst_30 = arith.constant -1.000000e+30 : f32
    %57 = vector.broadcast %cst_30 : f32 to vector<2x128xf32>
    %58 = arith.select %51, %56, %57 : vector<2x128xi1>, vector<2x128xf32>
    %cst_31 = arith.constant dense<0xFF800000> : vector<2xf32>
    %59 = vector.multi_reduction <maximumf>, %58, %cst_31 [1] : vector<2x128xf32> to vector<2xf32>
    %60 = vector.shape_cast %59 : vector<2xf32> to vector<2x1xf32>
    %61 = vector.broadcast %60 : vector<2x1xf32> to vector<2x128xf32>
    %62 = arith.cmpf oge, %58, %61 : vector<2x128xf32>
    %c128_i32 = arith.constant 128 : i32
    %63 = vector.broadcast %c128_i32 : i32 to vector<2x128xi32>
    %64 = arith.select %62, %0, %63 : vector<2x128xi1>, vector<2x128xi32>
    %cst_32 = arith.constant dense<2147483647> : vector<2xi32>
    %65 = vector.multi_reduction <minsi>, %64, %cst_32 [1] : vector<2x128xi32> to vector<2xi32>
    %66 = vector.shape_cast %65 : vector<2xi32> to vector<2x1xi32>
    %c1_i32 = arith.constant 1 : i32
    %67 = vector.broadcast %c1_i32 : i32 to vector<2x1xi32>
    %68 = arith.minsi %66, %67 : vector<2x1xi32>
    %cst_33 = arith.constant dense<0xFF800000> : vector<2xf32>
    %69 = vector.multi_reduction <maximumf>, %53, %cst_33 [1] : vector<2x128xf32> to vector<2xf32>
    %70 = vector.shape_cast %69 : vector<2xf32> to vector<2x1xf32>
    %71 = vector.broadcast %70 : vector<2x1xf32> to vector<2x128xf32>
    %72 = arith.subf %53, %71 : vector<2x128xf32>
    %73 = math.exp %72 : vector<2x128xf32>
    %cst_34 = arith.constant dense<0.000000e+00> : vector<2xf32>
    %74 = vector.multi_reduction <add>, %73, %cst_34 [1] : vector<2x128xf32> to vector<2xf32>
    %75 = vector.shape_cast %74 : vector<2xf32> to vector<2x1xf32>
    %76 = vector.broadcast %70 : vector<2x1xf32> to vector<2x128xf32>
    %77 = arith.subf %53, %76 : vector<2x128xf32>
    %78 = math.log %75 : vector<2x1xf32>
    %79 = vector.broadcast %78 : vector<2x1xf32> to vector<2x128xf32>
    %80 = arith.subf %77, %79 : vector<2x128xf32>
    %81 = vector.broadcast %75 : vector<2x1xf32> to vector<2x128xf32>
    %82 = arith.divf %73, %81 : vector<2x128xf32>
    %83 = arith.mulf %82, %80 : vector<2x128xf32>
    %cst_35 = arith.constant 0.000000e+00 : f32
    %84 = vector.broadcast %cst_35 : f32 to vector<2x128xf32>
    %85 = arith.select %51, %83, %84 : vector<2x128xi1>, vector<2x128xf32>
    %cst_36 = arith.constant dense<0.000000e+00> : vector<2xf32>
    %86 = vector.multi_reduction <add>, %85, %cst_36 [1] : vector<2x128xf32> to vector<2xf32>
    %87 = vector.shape_cast %86 : vector<2xf32> to vector<2x1xf32>
    %cst_37 = arith.constant 0.000000e+00 : f32
    %88 = vector.broadcast %cst_37 : f32 to vector<2x1xf32>
    %89 = arith.subf %88, %87 : vector<2x1xf32>
    %90 = vector.broadcast %68 : vector<2x1xi32> to vector<2x128xi32>
    %91 = arith.cmpi eq, %0, %90 : vector<2x128xi32>
    %cst_38 = arith.constant 0.000000e+00 : f32
    %92 = vector.broadcast %cst_38 : f32 to vector<2x128xf32>
    %93 = arith.select %91, %80, %92 : vector<2x128xi1>, vector<2x128xf32>
    %cst_39 = arith.constant dense<0.000000e+00> : vector<2xf32>
    %94 = vector.multi_reduction <add>, %93, %cst_39 [1] : vector<2x128xf32> to vector<2xf32>
    %95 = vector.shape_cast %94 : vector<2xf32> to vector<2x1xf32>
    %cst_40 = arith.constant 1.000000e+00 : f32
    %96 = vector.broadcast %cst_40 : f32 to vector<2x1xf32>
    %97 = arith.mulf %96, %95 : vector<2x1xf32>
    %98 = arith.addf %24, %97 : vector<2x1xf32>
    %cst_41 = arith.constant 1.000000e+00 : f32
    %99 = vector.broadcast %cst_41 : f32 to vector<2x1xf32>
    %100 = arith.mulf %99, %89 : vector<2x1xf32>
    %101 = arith.addf %25, %100 : vector<2x1xf32>
    %c0_i32 = arith.constant 0 : i32
    %102 = vector.broadcast %c0_i32 : i32 to vector<2x1xi32>
    %103 = arith.addi %68, %102 : vector<2x1xi32>
    %104 = vector.broadcast %103 : vector<2x1xi32> to vector<2x96xi32>
    %105 = arith.cmpi eq, %1, %104 : vector<2x96xi32>
    %106 = arith.extui %105 : vector<2x96xi1> to vector<2x96xi32>
    %107 = arith.sitofp %106 : vector<2x96xi32> to vector<2x96xf32>
    %108 = tpu.concatenate %107, %42 in 1 : vector<2x96xf32>, vector<2x32xf32> -> vector<2x128xf32>
    %cst_42 = arith.constant dense<0.000000e+00> : vector<2x128xf32>
    %109 = tpu.matmul %108, %14, %cst_42 {dimension_numbers = #tpu.dot_dimension_numbers<[1], [0], [0], [1], [0, 0, 1, 1], [], []>} : vector<2x128xf32>, vector<128x128xf32>, vector<2x128xf32> -> vector<2x128xf32>
    %110 = vector.broadcast %15 : vector<1x128xf32> to vector<2x128xf32>
    %111 = arith.addf %109, %110 : vector<2x128xf32>
    %112 = arith.mulf %111, %10 : vector<2x128xf32>
    %113 = math.tanh %112 : vector<2x128xf32>
    %114 = arith.mulf %10, %113 : vector<2x128xf32>
    %115 = arith.addf %114, %13 : vector<2x128xf32>
    %116 = vector.extract_strided_slice %115 {offsets = [0, 0], sizes = [2, 32], strides = [1, 1]} : vector<2x128xf32> to vector<2x32xf32>
    %117 = vector.extract_strided_slice %115 {offsets = [0, 32], sizes = [2, 32], strides = [1, 1]} : vector<2x128xf32> to vector<2x32xf32>
    %118 = vector.extract_strided_slice %115 {offsets = [0, 64], sizes = [2, 32], strides = [1, 1]} : vector<2x128xf32> to vector<2x32xf32>
    %119 = vector.extract_strided_slice %115 {offsets = [0, 96], sizes = [2, 32], strides = [1, 1]} : vector<2x128xf32> to vector<2x32xf32>
    %120 = arith.mulf %117, %40 : vector<2x32xf32>
    %121 = arith.mulf %116, %118 : vector<2x32xf32>
    %122 = arith.addf %120, %121 : vector<2x32xf32>
    %123 = math.tanh %122 : vector<2x32xf32>
    %124 = arith.mulf %119, %123 : vector<2x32xf32>
    %c1 = arith.constant 1 : index
    %c0_43 = arith.constant 0 : index
    %c0_44 = arith.constant 0 : index
    %125 = vector.load %arg6[%c1, %c0_43, %c0_44] : memref<11x32x128xf32, #tpu.memory_space<vmem>>, vector<1x32x128xf32>
    %126 = vector.shape_cast %125 : vector<1x32x128xf32> to vector<32x128xf32>
    %cst_45 = arith.constant dense<0.000000e+00> : vector<2x128xf32>
    %127 = tpu.matmul %124, %126, %cst_45 {dimension_numbers = #tpu.dot_dimension_numbers<[1], [0], [0], [1], [0, 0, 1, 1], [], []>} : vector<2x32xf32>, vector<32x128xf32>, vector<2x128xf32> -> vector<2x128xf32>
    %c1_46 = arith.constant 1 : index
    %c0_47 = arith.constant 0 : index
    %c0_48 = arith.constant 0 : index
    %128 = vector.load %arg7[%c1_46, %c0_47, %c0_48] : memref<11x1x128xf32, #tpu.memory_space<vmem>>, vector<1x1x128xf32>
    %129 = vector.shape_cast %128 : vector<1x1x128xf32> to vector<1x128xf32>
    %130 = vector.broadcast %129 : vector<1x128xf32> to vector<2x128xf32>
    %131 = arith.addf %127, %130 : vector<2x128xf32>
    %c12_i32 = arith.constant 12 : i32
    %132 = vector.broadcast %c12_i32 : i32 to vector<2x128xi32>
    %133 = arith.cmpi slt, %0, %132 : vector<2x128xi32>
    %cst_49 = arith.constant -1.000000e+30 : f32
    %134 = vector.broadcast %cst_49 : f32 to vector<2x128xf32>
    %135 = arith.select %133, %131, %134 : vector<2x128xi1>, vector<2x128xf32>
    %c1_50 = arith.constant 1 : index
    %c0_51 = arith.constant 0 : index
    %c0_52 = arith.constant 0 : index
    %136 = vector.load %arg8[%c1_50, %c0_51, %c0_52] : memref<11x2x128xf32, #tpu.memory_space<vmem>>, vector<1x2x128xf32>
    %137 = vector.shape_cast %136 : vector<1x2x128xf32> to vector<2x128xf32>
    %138 = arith.addf %135, %137 : vector<2x128xf32>
    %cst_53 = arith.constant -1.000000e+30 : f32
    %139 = vector.broadcast %cst_53 : f32 to vector<2x128xf32>
    %140 = arith.select %133, %138, %139 : vector<2x128xi1>, vector<2x128xf32>
    %cst_54 = arith.constant dense<0xFF800000> : vector<2xf32>
    %141 = vector.multi_reduction <maximumf>, %140, %cst_54 [1] : vector<2x128xf32> to vector<2xf32>
    %142 = vector.shape_cast %141 : vector<2xf32> to vector<2x1xf32>
    %143 = vector.broadcast %142 : vector<2x1xf32> to vector<2x128xf32>
    %144 = arith.cmpf oge, %140, %143 : vector<2x128xf32>
    %c128_i32_55 = arith.constant 128 : i32
    %145 = vector.broadcast %c128_i32_55 : i32 to vector<2x128xi32>
    %146 = arith.select %144, %0, %145 : vector<2x128xi1>, vector<2x128xi32>
    %cst_56 = arith.constant dense<2147483647> : vector<2xi32>
    %147 = vector.multi_reduction <minsi>, %146, %cst_56 [1] : vector<2x128xi32> to vector<2xi32>
    %148 = vector.shape_cast %147 : vector<2xi32> to vector<2x1xi32>
    %c11_i32 = arith.constant 11 : i32
    %149 = vector.broadcast %c11_i32 : i32 to vector<2x1xi32>
    %150 = arith.minsi %148, %149 : vector<2x1xi32>
    %cst_57 = arith.constant dense<0xFF800000> : vector<2xf32>
    %151 = vector.multi_reduction <maximumf>, %135, %cst_57 [1] : vector<2x128xf32> to vector<2xf32>
    %152 = vector.shape_cast %151 : vector<2xf32> to vector<2x1xf32>
    %153 = vector.broadcast %152 : vector<2x1xf32> to vector<2x128xf32>
    %154 = arith.subf %135, %153 : vector<2x128xf32>
    %155 = math.exp %154 : vector<2x128xf32>
    %cst_58 = arith.constant dense<0.000000e+00> : vector<2xf32>
    %156 = vector.multi_reduction <add>, %155, %cst_58 [1] : vector<2x128xf32> to vector<2xf32>
    %157 = vector.shape_cast %156 : vector<2xf32> to vector<2x1xf32>
    %158 = vector.broadcast %152 : vector<2x1xf32> to vector<2x128xf32>
    %159 = arith.subf %135, %158 : vector<2x128xf32>
    %160 = math.log %157 : vector<2x1xf32>
    %161 = vector.broadcast %160 : vector<2x1xf32> to vector<2x128xf32>
    %162 = arith.subf %159, %161 : vector<2x128xf32>
    %163 = vector.broadcast %157 : vector<2x1xf32> to vector<2x128xf32>
    %164 = arith.divf %155, %163 : vector<2x128xf32>
    %165 = arith.mulf %164, %162 : vector<2x128xf32>
    %cst_59 = arith.constant 0.000000e+00 : f32
    %166 = vector.broadcast %cst_59 : f32 to vector<2x128xf32>
    %167 = arith.select %133, %165, %166 : vector<2x128xi1>, vector<2x128xf32>
    %cst_60 = arith.constant dense<0.000000e+00> : vector<2xf32>
    %168 = vector.multi_reduction <add>, %167, %cst_60 [1] : vector<2x128xf32> to vector<2xf32>
    %169 = vector.shape_cast %168 : vector<2xf32> to vector<2x1xf32>
    %cst_61 = arith.constant 0.000000e+00 : f32
    %170 = vector.broadcast %cst_61 : f32 to vector<2x1xf32>
    %171 = arith.subf %170, %169 : vector<2x1xf32>
    %172 = vector.broadcast %150 : vector<2x1xi32> to vector<2x128xi32>
    %173 = arith.cmpi eq, %0, %172 : vector<2x128xi32>
    %cst_62 = arith.constant 0.000000e+00 : f32
    %174 = vector.broadcast %cst_62 : f32 to vector<2x128xf32>
    %175 = arith.select %173, %162, %174 : vector<2x128xi1>, vector<2x128xf32>
    %cst_63 = arith.constant dense<0.000000e+00> : vector<2xf32>
    %176 = vector.multi_reduction <add>, %175, %cst_63 [1] : vector<2x128xf32> to vector<2xf32>
    %177 = vector.shape_cast %176 : vector<2xf32> to vector<2x1xf32>
    %c0_i32_64 = arith.constant 0 : i32
    %178 = vector.broadcast %c0_i32_64 : i32 to vector<2x1xi32>
    %179 = arith.cmpi ne, %68, %178 : vector<2x1xi32>
    %180 = arith.extui %179 : vector<2x1xi1> to vector<2x1xi32>
    %181 = arith.sitofp %180 : vector<2x1xi32> to vector<2x1xf32>
    %cst_65 = arith.constant 1.000000e+00 : f32
    %182 = vector.broadcast %cst_65 : f32 to vector<2x1xf32>
    %183 = arith.mulf %182, %181 : vector<2x1xf32>
    %184 = arith.mulf %183, %177 : vector<2x1xf32>
    %185 = arith.addf %98, %184 : vector<2x1xf32>
    %186 = arith.mulf %183, %171 : vector<2x1xf32>
    %187 = arith.addf %101, %186 : vector<2x1xf32>
    %c2_i32_66 = arith.constant 2 : i32
    %188 = vector.broadcast %c2_i32_66 : i32 to vector<2x1xi32>
    %189 = arith.addi %150, %188 : vector<2x1xi32>
    %190 = vector.broadcast %189 : vector<2x1xi32> to vector<2x96xi32>
    %191 = arith.cmpi eq, %1, %190 : vector<2x96xi32>
    %192 = arith.extui %191 : vector<2x96xi1> to vector<2x96xi32>
    %193 = arith.sitofp %192 : vector<2x96xi32> to vector<2x96xf32>
    %194 = tpu.concatenate %193, %124 in 1 : vector<2x96xf32>, vector<2x32xf32> -> vector<2x128xf32>
    %cst_67 = arith.constant dense<0.000000e+00> : vector<2x128xf32>
    %195 = tpu.matmul %194, %14, %cst_67 {dimension_numbers = #tpu.dot_dimension_numbers<[1], [0], [0], [1], [0, 0, 1, 1], [], []>} : vector<2x128xf32>, vector<128x128xf32>, vector<2x128xf32> -> vector<2x128xf32>
    %196 = vector.broadcast %15 : vector<1x128xf32> to vector<2x128xf32>
    %197 = arith.addf %195, %196 : vector<2x128xf32>
    %198 = arith.mulf %197, %10 : vector<2x128xf32>
    %199 = math.tanh %198 : vector<2x128xf32>
    %200 = arith.mulf %10, %199 : vector<2x128xf32>
    %201 = arith.addf %200, %13 : vector<2x128xf32>
    %202 = vector.extract_strided_slice %201 {offsets = [0, 0], sizes = [2, 32], strides = [1, 1]} : vector<2x128xf32> to vector<2x32xf32>
    %203 = vector.extract_strided_slice %201 {offsets = [0, 32], sizes = [2, 32], strides = [1, 1]} : vector<2x128xf32> to vector<2x32xf32>
    %204 = vector.extract_strided_slice %201 {offsets = [0, 64], sizes = [2, 32], strides = [1, 1]} : vector<2x128xf32> to vector<2x32xf32>
    %205 = vector.extract_strided_slice %201 {offsets = [0, 96], sizes = [2, 32], strides = [1, 1]} : vector<2x128xf32> to vector<2x32xf32>
    %206 = arith.mulf %203, %122 : vector<2x32xf32>
    %207 = arith.mulf %202, %204 : vector<2x32xf32>
    %208 = arith.addf %206, %207 : vector<2x32xf32>
    %209 = math.tanh %208 : vector<2x32xf32>
    %210 = arith.mulf %205, %209 : vector<2x32xf32>
    %c2 = arith.constant 2 : index
    %c0_68 = arith.constant 0 : index
    %c0_69 = arith.constant 0 : index
    %211 = vector.load %arg6[%c2, %c0_68, %c0_69] : memref<11x32x128xf32, #tpu.memory_space<vmem>>, vector<1x32x128xf32>
    %212 = vector.shape_cast %211 : vector<1x32x128xf32> to vector<32x128xf32>
    %cst_70 = arith.constant dense<0.000000e+00> : vector<2x128xf32>
    %213 = tpu.matmul %210, %212, %cst_70 {dimension_numbers = #tpu.dot_dimension_numbers<[1], [0], [0], [1], [0, 0, 1, 1], [], []>} : vector<2x32xf32>, vector<32x128xf32>, vector<2x128xf32> -> vector<2x128xf32>
    %c2_71 = arith.constant 2 : index
    %c0_72 = arith.constant 0 : index
    %c0_73 = arith.constant 0 : index
    %214 = vector.load %arg7[%c2_71, %c0_72, %c0_73] : memref<11x1x128xf32, #tpu.memory_space<vmem>>, vector<1x1x128xf32>
    %215 = vector.shape_cast %214 : vector<1x1x128xf32> to vector<1x128xf32>
    %216 = vector.broadcast %215 : vector<1x128xf32> to vector<2x128xf32>
    %217 = arith.addf %213, %216 : vector<2x128xf32>
    %c3_i32 = arith.constant 3 : i32
    %218 = vector.broadcast %c3_i32 : i32 to vector<2x128xi32>
    %219 = arith.cmpi slt, %0, %218 : vector<2x128xi32>
    %cst_74 = arith.constant -1.000000e+30 : f32
    %220 = vector.broadcast %cst_74 : f32 to vector<2x128xf32>
    %221 = arith.select %219, %217, %220 : vector<2x128xi1>, vector<2x128xf32>
    %c2_75 = arith.constant 2 : index
    %c0_76 = arith.constant 0 : index
    %c0_77 = arith.constant 0 : index
    %222 = vector.load %arg8[%c2_75, %c0_76, %c0_77] : memref<11x2x128xf32, #tpu.memory_space<vmem>>, vector<1x2x128xf32>
    %223 = vector.shape_cast %222 : vector<1x2x128xf32> to vector<2x128xf32>
    %224 = arith.addf %221, %223 : vector<2x128xf32>
    %cst_78 = arith.constant -1.000000e+30 : f32
    %225 = vector.broadcast %cst_78 : f32 to vector<2x128xf32>
    %226 = arith.select %219, %224, %225 : vector<2x128xi1>, vector<2x128xf32>
    %cst_79 = arith.constant dense<0xFF800000> : vector<2xf32>
    %227 = vector.multi_reduction <maximumf>, %226, %cst_79 [1] : vector<2x128xf32> to vector<2xf32>
    %228 = vector.shape_cast %227 : vector<2xf32> to vector<2x1xf32>
    %229 = vector.broadcast %228 : vector<2x1xf32> to vector<2x128xf32>
    %230 = arith.cmpf oge, %226, %229 : vector<2x128xf32>
    %c128_i32_80 = arith.constant 128 : i32
    %231 = vector.broadcast %c128_i32_80 : i32 to vector<2x128xi32>
    %232 = arith.select %230, %0, %231 : vector<2x128xi1>, vector<2x128xi32>
    %cst_81 = arith.constant dense<2147483647> : vector<2xi32>
    %233 = vector.multi_reduction <minsi>, %232, %cst_81 [1] : vector<2x128xi32> to vector<2xi32>
    %234 = vector.shape_cast %233 : vector<2xi32> to vector<2x1xi32>
    %c2_i32_82 = arith.constant 2 : i32
    %235 = vector.broadcast %c2_i32_82 : i32 to vector<2x1xi32>
    %236 = arith.minsi %234, %235 : vector<2x1xi32>
    %cst_83 = arith.constant dense<0xFF800000> : vector<2xf32>
    %237 = vector.multi_reduction <maximumf>, %221, %cst_83 [1] : vector<2x128xf32> to vector<2xf32>
    %238 = vector.shape_cast %237 : vector<2xf32> to vector<2x1xf32>
    %239 = vector.broadcast %238 : vector<2x1xf32> to vector<2x128xf32>
    %240 = arith.subf %221, %239 : vector<2x128xf32>
    %241 = math.exp %240 : vector<2x128xf32>
    %cst_84 = arith.constant dense<0.000000e+00> : vector<2xf32>
    %242 = vector.multi_reduction <add>, %241, %cst_84 [1] : vector<2x128xf32> to vector<2xf32>
    %243 = vector.shape_cast %242 : vector<2xf32> to vector<2x1xf32>
    %244 = vector.broadcast %238 : vector<2x1xf32> to vector<2x128xf32>
    %245 = arith.subf %221, %244 : vector<2x128xf32>
    %246 = math.log %243 : vector<2x1xf32>
    %247 = vector.broadcast %246 : vector<2x1xf32> to vector<2x128xf32>
    %248 = arith.subf %245, %247 : vector<2x128xf32>
    %249 = vector.broadcast %243 : vector<2x1xf32> to vector<2x128xf32>
    %250 = arith.divf %241, %249 : vector<2x128xf32>
    %251 = arith.mulf %250, %248 : vector<2x128xf32>
    %cst_85 = arith.constant 0.000000e+00 : f32
    %252 = vector.broadcast %cst_85 : f32 to vector<2x128xf32>
    %253 = arith.select %219, %251, %252 : vector<2x128xi1>, vector<2x128xf32>
    %cst_86 = arith.constant dense<0.000000e+00> : vector<2xf32>
    %254 = vector.multi_reduction <add>, %253, %cst_86 [1] : vector<2x128xf32> to vector<2xf32>
    %255 = vector.shape_cast %254 : vector<2xf32> to vector<2x1xf32>
    %cst_87 = arith.constant 0.000000e+00 : f32
    %256 = vector.broadcast %cst_87 : f32 to vector<2x1xf32>
    %257 = arith.subf %256, %255 : vector<2x1xf32>
    %258 = vector.broadcast %236 : vector<2x1xi32> to vector<2x128xi32>
    %259 = arith.cmpi eq, %0, %258 : vector<2x128xi32>
    %cst_88 = arith.constant 0.000000e+00 : f32
    %260 = vector.broadcast %cst_88 : f32 to vector<2x128xf32>
    %261 = arith.select %259, %248, %260 : vector<2x128xi1>, vector<2x128xf32>
    %cst_89 = arith.constant dense<0.000000e+00> : vector<2xf32>
    %262 = vector.multi_reduction <add>, %261, %cst_89 [1] : vector<2x128xf32> to vector<2xf32>
    %263 = vector.shape_cast %262 : vector<2xf32> to vector<2x1xf32>
    %c0_i32_90 = arith.constant 0 : i32
    %264 = vector.broadcast %c0_i32_90 : i32 to vector<2x1xi32>
    %265 = arith.cmpi ne, %68, %264 : vector<2x1xi32>
    %266 = arith.extui %265 : vector<2x1xi1> to vector<2x1xi32>
    %267 = arith.sitofp %266 : vector<2x1xi32> to vector<2x1xf32>
    %cst_91 = arith.constant 1.000000e+00 : f32
    %268 = vector.broadcast %cst_91 : f32 to vector<2x1xf32>
    %269 = arith.mulf %268, %267 : vector<2x1xf32>
    %270 = arith.mulf %269, %263 : vector<2x1xf32>
    %271 = arith.addf %185, %270 : vector<2x1xf32>
    %272 = arith.mulf %269, %257 : vector<2x1xf32>
    %273 = arith.addf %187, %272 : vector<2x1xf32>
    %c14_i32 = arith.constant 14 : i32
    %274 = vector.broadcast %c14_i32 : i32 to vector<2x1xi32>
    %275 = arith.addi %236, %274 : vector<2x1xi32>
    %276 = vector.broadcast %275 : vector<2x1xi32> to vector<2x96xi32>
    %277 = arith.cmpi eq, %1, %276 : vector<2x96xi32>
    %278 = arith.extui %277 : vector<2x96xi1> to vector<2x96xi32>
    %279 = arith.sitofp %278 : vector<2x96xi32> to vector<2x96xf32>
    %280 = tpu.concatenate %279, %210 in 1 : vector<2x96xf32>, vector<2x32xf32> -> vector<2x128xf32>
    %cst_92 = arith.constant dense<0.000000e+00> : vector<2x128xf32>
    %281 = tpu.matmul %280, %14, %cst_92 {dimension_numbers = #tpu.dot_dimension_numbers<[1], [0], [0], [1], [0, 0, 1, 1], [], []>} : vector<2x128xf32>, vector<128x128xf32>, vector<2x128xf32> -> vector<2x128xf32>
    %282 = vector.broadcast %15 : vector<1x128xf32> to vector<2x128xf32>
    %283 = arith.addf %281, %282 : vector<2x128xf32>
    %284 = arith.mulf %283, %10 : vector<2x128xf32>
    %285 = math.tanh %284 : vector<2x128xf32>
    %286 = arith.mulf %10, %285 : vector<2x128xf32>
    %287 = arith.addf %286, %13 : vector<2x128xf32>
    %288 = vector.extract_strided_slice %287 {offsets = [0, 0], sizes = [2, 32], strides = [1, 1]} : vector<2x128xf32> to vector<2x32xf32>
    %289 = vector.extract_strided_slice %287 {offsets = [0, 32], sizes = [2, 32], strides = [1, 1]} : vector<2x128xf32> to vector<2x32xf32>
    %290 = vector.extract_strided_slice %287 {offsets = [0, 64], sizes = [2, 32], strides = [1, 1]} : vector<2x128xf32> to vector<2x32xf32>
    %291 = vector.extract_strided_slice %287 {offsets = [0, 96], sizes = [2, 32], strides = [1, 1]} : vector<2x128xf32> to vector<2x32xf32>
    %292 = arith.mulf %289, %208 : vector<2x32xf32>
    %293 = arith.mulf %288, %290 : vector<2x32xf32>
    %294 = arith.addf %292, %293 : vector<2x32xf32>
    %295 = math.tanh %294 : vector<2x32xf32>
    %296 = arith.mulf %291, %295 : vector<2x32xf32>
    %c3 = arith.constant 3 : index
    %c0_93 = arith.constant 0 : index
    %c0_94 = arith.constant 0 : index
    %297 = vector.load %arg6[%c3, %c0_93, %c0_94] : memref<11x32x128xf32, #tpu.memory_space<vmem>>, vector<1x32x128xf32>
    %298 = vector.shape_cast %297 : vector<1x32x128xf32> to vector<32x128xf32>
    %cst_95 = arith.constant dense<0.000000e+00> : vector<2x128xf32>
    %299 = tpu.matmul %296, %298, %cst_95 {dimension_numbers = #tpu.dot_dimension_numbers<[1], [0], [0], [1], [0, 0, 1, 1], [], []>} : vector<2x32xf32>, vector<32x128xf32>, vector<2x128xf32> -> vector<2x128xf32>
    %c3_96 = arith.constant 3 : index
    %c0_97 = arith.constant 0 : index
    %c0_98 = arith.constant 0 : index
    %300 = vector.load %arg7[%c3_96, %c0_97, %c0_98] : memref<11x1x128xf32, #tpu.memory_space<vmem>>, vector<1x1x128xf32>
    %301 = vector.shape_cast %300 : vector<1x1x128xf32> to vector<1x128xf32>
    %302 = vector.broadcast %301 : vector<1x128xf32> to vector<2x128xf32>
    %303 = arith.addf %299, %302 : vector<2x128xf32>
    %c2_i32_99 = arith.constant 2 : i32
    %304 = vector.broadcast %c2_i32_99 : i32 to vector<2x128xi32>
    %305 = arith.cmpi slt, %0, %304 : vector<2x128xi32>
    %cst_100 = arith.constant -1.000000e+30 : f32
    %306 = vector.broadcast %cst_100 : f32 to vector<2x128xf32>
    %307 = arith.select %305, %303, %306 : vector<2x128xi1>, vector<2x128xf32>
    %c3_101 = arith.constant 3 : index
    %c0_102 = arith.constant 0 : index
    %c0_103 = arith.constant 0 : index
    %308 = vector.load %arg8[%c3_101, %c0_102, %c0_103] : memref<11x2x128xf32, #tpu.memory_space<vmem>>, vector<1x2x128xf32>
    %309 = vector.shape_cast %308 : vector<1x2x128xf32> to vector<2x128xf32>
    %310 = arith.addf %307, %309 : vector<2x128xf32>
    %cst_104 = arith.constant -1.000000e+30 : f32
    %311 = vector.broadcast %cst_104 : f32 to vector<2x128xf32>
    %312 = arith.select %305, %310, %311 : vector<2x128xi1>, vector<2x128xf32>
    %cst_105 = arith.constant dense<0xFF800000> : vector<2xf32>
    %313 = vector.multi_reduction <maximumf>, %312, %cst_105 [1] : vector<2x128xf32> to vector<2xf32>
    %314 = vector.shape_cast %313 : vector<2xf32> to vector<2x1xf32>
    %315 = vector.broadcast %314 : vector<2x1xf32> to vector<2x128xf32>
    %316 = arith.cmpf oge, %312, %315 : vector<2x128xf32>
    %c128_i32_106 = arith.constant 128 : i32
    %317 = vector.broadcast %c128_i32_106 : i32 to vector<2x128xi32>
    %318 = arith.select %316, %0, %317 : vector<2x128xi1>, vector<2x128xi32>
    %cst_107 = arith.constant dense<2147483647> : vector<2xi32>
    %319 = vector.multi_reduction <minsi>, %318, %cst_107 [1] : vector<2x128xi32> to vector<2xi32>
    %320 = vector.shape_cast %319 : vector<2xi32> to vector<2x1xi32>
    %c1_i32_108 = arith.constant 1 : i32
    %321 = vector.broadcast %c1_i32_108 : i32 to vector<2x1xi32>
    %322 = arith.minsi %320, %321 : vector<2x1xi32>
    %cst_109 = arith.constant dense<0xFF800000> : vector<2xf32>
    %323 = vector.multi_reduction <maximumf>, %307, %cst_109 [1] : vector<2x128xf32> to vector<2xf32>
    %324 = vector.shape_cast %323 : vector<2xf32> to vector<2x1xf32>
    %325 = vector.broadcast %324 : vector<2x1xf32> to vector<2x128xf32>
    %326 = arith.subf %307, %325 : vector<2x128xf32>
    %327 = math.exp %326 : vector<2x128xf32>
    %cst_110 = arith.constant dense<0.000000e+00> : vector<2xf32>
    %328 = vector.multi_reduction <add>, %327, %cst_110 [1] : vector<2x128xf32> to vector<2xf32>
    %329 = vector.shape_cast %328 : vector<2xf32> to vector<2x1xf32>
    %330 = vector.broadcast %324 : vector<2x1xf32> to vector<2x128xf32>
    %331 = arith.subf %307, %330 : vector<2x128xf32>
    %332 = math.log %329 : vector<2x1xf32>
    %333 = vector.broadcast %332 : vector<2x1xf32> to vector<2x128xf32>
    %334 = arith.subf %331, %333 : vector<2x128xf32>
    %335 = vector.broadcast %329 : vector<2x1xf32> to vector<2x128xf32>
    %336 = arith.divf %327, %335 : vector<2x128xf32>
    %337 = arith.mulf %336, %334 : vector<2x128xf32>
    %cst_111 = arith.constant 0.000000e+00 : f32
    %338 = vector.broadcast %cst_111 : f32 to vector<2x128xf32>
    %339 = arith.select %305, %337, %338 : vector<2x128xi1>, vector<2x128xf32>
    %cst_112 = arith.constant dense<0.000000e+00> : vector<2xf32>
    %340 = vector.multi_reduction <add>, %339, %cst_112 [1] : vector<2x128xf32> to vector<2xf32>
    %341 = vector.shape_cast %340 : vector<2xf32> to vector<2x1xf32>
    %cst_113 = arith.constant 0.000000e+00 : f32
    %342 = vector.broadcast %cst_113 : f32 to vector<2x1xf32>
    %343 = arith.subf %342, %341 : vector<2x1xf32>
    %344 = vector.broadcast %322 : vector<2x1xi32> to vector<2x128xi32>
    %345 = arith.cmpi eq, %0, %344 : vector<2x128xi32>
    %cst_114 = arith.constant 0.000000e+00 : f32
    %346 = vector.broadcast %cst_114 : f32 to vector<2x128xf32>
    %347 = arith.select %345, %334, %346 : vector<2x128xi1>, vector<2x128xf32>
    %cst_115 = arith.constant dense<0.000000e+00> : vector<2xf32>
    %348 = vector.multi_reduction <add>, %347, %cst_115 [1] : vector<2x128xf32> to vector<2xf32>
    %349 = vector.shape_cast %348 : vector<2xf32> to vector<2x1xf32>
    %c0_i32_116 = arith.constant 0 : i32
    %350 = vector.broadcast %c0_i32_116 : i32 to vector<2x1xi32>
    %351 = arith.cmpi ne, %68, %350 : vector<2x1xi32>
    %352 = arith.extui %351 : vector<2x1xi1> to vector<2x1xi32>
    %353 = arith.sitofp %352 : vector<2x1xi32> to vector<2x1xf32>
    %cst_117 = arith.constant 1.000000e+00 : f32
    %354 = vector.broadcast %cst_117 : f32 to vector<2x1xf32>
    %355 = arith.mulf %354, %353 : vector<2x1xf32>
    %356 = arith.mulf %355, %349 : vector<2x1xf32>
    %357 = arith.addf %271, %356 : vector<2x1xf32>
    %358 = arith.mulf %355, %343 : vector<2x1xf32>
    %359 = arith.addf %273, %358 : vector<2x1xf32>
    %c17_i32 = arith.constant 17 : i32
    %360 = vector.broadcast %c17_i32 : i32 to vector<2x1xi32>
    %361 = arith.addi %322, %360 : vector<2x1xi32>
    %362 = vector.broadcast %361 : vector<2x1xi32> to vector<2x96xi32>
    %363 = arith.cmpi eq, %1, %362 : vector<2x96xi32>
    %364 = arith.extui %363 : vector<2x96xi1> to vector<2x96xi32>
    %365 = arith.sitofp %364 : vector<2x96xi32> to vector<2x96xf32>
    %366 = tpu.concatenate %365, %296 in 1 : vector<2x96xf32>, vector<2x32xf32> -> vector<2x128xf32>
    %cst_118 = arith.constant dense<0.000000e+00> : vector<2x128xf32>
    %367 = tpu.matmul %366, %14, %cst_118 {dimension_numbers = #tpu.dot_dimension_numbers<[1], [0], [0], [1], [0, 0, 1, 1], [], []>} : vector<2x128xf32>, vector<128x128xf32>, vector<2x128xf32> -> vector<2x128xf32>
    %368 = vector.broadcast %15 : vector<1x128xf32> to vector<2x128xf32>
    %369 = arith.addf %367, %368 : vector<2x128xf32>
    %370 = arith.mulf %369, %10 : vector<2x128xf32>
    %371 = math.tanh %370 : vector<2x128xf32>
    %372 = arith.mulf %10, %371 : vector<2x128xf32>
    %373 = arith.addf %372, %13 : vector<2x128xf32>
    %374 = vector.extract_strided_slice %373 {offsets = [0, 0], sizes = [2, 32], strides = [1, 1]} : vector<2x128xf32> to vector<2x32xf32>
    %375 = vector.extract_strided_slice %373 {offsets = [0, 32], sizes = [2, 32], strides = [1, 1]} : vector<2x128xf32> to vector<2x32xf32>
    %376 = vector.extract_strided_slice %373 {offsets = [0, 64], sizes = [2, 32], strides = [1, 1]} : vector<2x128xf32> to vector<2x32xf32>
    %377 = vector.extract_strided_slice %373 {offsets = [0, 96], sizes = [2, 32], strides = [1, 1]} : vector<2x128xf32> to vector<2x32xf32>
    %378 = arith.mulf %375, %294 : vector<2x32xf32>
    %379 = arith.mulf %374, %376 : vector<2x32xf32>
    %380 = arith.addf %378, %379 : vector<2x32xf32>
    %381 = math.tanh %380 : vector<2x32xf32>
    %382 = arith.mulf %377, %381 : vector<2x32xf32>
    %c4 = arith.constant 4 : index
    %c0_119 = arith.constant 0 : index
    %c0_120 = arith.constant 0 : index
    %383 = vector.load %arg6[%c4, %c0_119, %c0_120] : memref<11x32x128xf32, #tpu.memory_space<vmem>>, vector<1x32x128xf32>
    %384 = vector.shape_cast %383 : vector<1x32x128xf32> to vector<32x128xf32>
    %cst_121 = arith.constant dense<0.000000e+00> : vector<2x128xf32>
    %385 = tpu.matmul %382, %384, %cst_121 {dimension_numbers = #tpu.dot_dimension_numbers<[1], [0], [0], [1], [0, 0, 1, 1], [], []>} : vector<2x32xf32>, vector<32x128xf32>, vector<2x128xf32> -> vector<2x128xf32>
    %c4_122 = arith.constant 4 : index
    %c0_123 = arith.constant 0 : index
    %c0_124 = arith.constant 0 : index
    %386 = vector.load %arg7[%c4_122, %c0_123, %c0_124] : memref<11x1x128xf32, #tpu.memory_space<vmem>>, vector<1x1x128xf32>
    %387 = vector.shape_cast %386 : vector<1x1x128xf32> to vector<1x128xf32>
    %388 = vector.broadcast %387 : vector<1x128xf32> to vector<2x128xf32>
    %389 = arith.addf %385, %388 : vector<2x128xf32>
    %c2_i32_125 = arith.constant 2 : i32
    %390 = vector.broadcast %c2_i32_125 : i32 to vector<2x128xi32>
    %391 = arith.cmpi slt, %0, %390 : vector<2x128xi32>
    %cst_126 = arith.constant -1.000000e+30 : f32
    %392 = vector.broadcast %cst_126 : f32 to vector<2x128xf32>
    %393 = arith.select %391, %389, %392 : vector<2x128xi1>, vector<2x128xf32>
    %c4_127 = arith.constant 4 : index
    %c0_128 = arith.constant 0 : index
    %c0_129 = arith.constant 0 : index
    %394 = vector.load %arg8[%c4_127, %c0_128, %c0_129] : memref<11x2x128xf32, #tpu.memory_space<vmem>>, vector<1x2x128xf32>
    %395 = vector.shape_cast %394 : vector<1x2x128xf32> to vector<2x128xf32>
    %396 = arith.addf %393, %395 : vector<2x128xf32>
    %cst_130 = arith.constant -1.000000e+30 : f32
    %397 = vector.broadcast %cst_130 : f32 to vector<2x128xf32>
    %398 = arith.select %391, %396, %397 : vector<2x128xi1>, vector<2x128xf32>
    %cst_131 = arith.constant dense<0xFF800000> : vector<2xf32>
    %399 = vector.multi_reduction <maximumf>, %398, %cst_131 [1] : vector<2x128xf32> to vector<2xf32>
    %400 = vector.shape_cast %399 : vector<2xf32> to vector<2x1xf32>
    %401 = vector.broadcast %400 : vector<2x1xf32> to vector<2x128xf32>
    %402 = arith.cmpf oge, %398, %401 : vector<2x128xf32>
    %c128_i32_132 = arith.constant 128 : i32
    %403 = vector.broadcast %c128_i32_132 : i32 to vector<2x128xi32>
    %404 = arith.select %402, %0, %403 : vector<2x128xi1>, vector<2x128xi32>
    %cst_133 = arith.constant dense<2147483647> : vector<2xi32>
    %405 = vector.multi_reduction <minsi>, %404, %cst_133 [1] : vector<2x128xi32> to vector<2xi32>
    %406 = vector.shape_cast %405 : vector<2xi32> to vector<2x1xi32>
    %c1_i32_134 = arith.constant 1 : i32
    %407 = vector.broadcast %c1_i32_134 : i32 to vector<2x1xi32>
    %408 = arith.minsi %406, %407 : vector<2x1xi32>
    %cst_135 = arith.constant dense<0xFF800000> : vector<2xf32>
    %409 = vector.multi_reduction <maximumf>, %393, %cst_135 [1] : vector<2x128xf32> to vector<2xf32>
    %410 = vector.shape_cast %409 : vector<2xf32> to vector<2x1xf32>
    %411 = vector.broadcast %410 : vector<2x1xf32> to vector<2x128xf32>
    %412 = arith.subf %393, %411 : vector<2x128xf32>
    %413 = math.exp %412 : vector<2x128xf32>
    %cst_136 = arith.constant dense<0.000000e+00> : vector<2xf32>
    %414 = vector.multi_reduction <add>, %413, %cst_136 [1] : vector<2x128xf32> to vector<2xf32>
    %415 = vector.shape_cast %414 : vector<2xf32> to vector<2x1xf32>
    %416 = vector.broadcast %410 : vector<2x1xf32> to vector<2x128xf32>
    %417 = arith.subf %393, %416 : vector<2x128xf32>
    %418 = math.log %415 : vector<2x1xf32>
    %419 = vector.broadcast %418 : vector<2x1xf32> to vector<2x128xf32>
    %420 = arith.subf %417, %419 : vector<2x128xf32>
    %421 = vector.broadcast %415 : vector<2x1xf32> to vector<2x128xf32>
    %422 = arith.divf %413, %421 : vector<2x128xf32>
    %423 = arith.mulf %422, %420 : vector<2x128xf32>
    %cst_137 = arith.constant 0.000000e+00 : f32
    %424 = vector.broadcast %cst_137 : f32 to vector<2x128xf32>
    %425 = arith.select %391, %423, %424 : vector<2x128xi1>, vector<2x128xf32>
    %cst_138 = arith.constant dense<0.000000e+00> : vector<2xf32>
    %426 = vector.multi_reduction <add>, %425, %cst_138 [1] : vector<2x128xf32> to vector<2xf32>
    %427 = vector.shape_cast %426 : vector<2xf32> to vector<2x1xf32>
    %cst_139 = arith.constant 0.000000e+00 : f32
    %428 = vector.broadcast %cst_139 : f32 to vector<2x1xf32>
    %429 = arith.subf %428, %427 : vector<2x1xf32>
    %430 = vector.broadcast %408 : vector<2x1xi32> to vector<2x128xi32>
    %431 = arith.cmpi eq, %0, %430 : vector<2x128xi32>
    %cst_140 = arith.constant 0.000000e+00 : f32
    %432 = vector.broadcast %cst_140 : f32 to vector<2x128xf32>
    %433 = arith.select %431, %420, %432 : vector<2x128xi1>, vector<2x128xf32>
    %cst_141 = arith.constant dense<0.000000e+00> : vector<2xf32>
    %434 = vector.multi_reduction <add>, %433, %cst_141 [1] : vector<2x128xf32> to vector<2xf32>
    %435 = vector.shape_cast %434 : vector<2xf32> to vector<2x1xf32>
    %c0_i32_142 = arith.constant 0 : i32
    %436 = vector.broadcast %c0_i32_142 : i32 to vector<2x1xi32>
    %437 = arith.cmpi ne, %68, %436 : vector<2x1xi32>
    %438 = arith.extui %437 : vector<2x1xi1> to vector<2x1xi32>
    %439 = arith.sitofp %438 : vector<2x1xi32> to vector<2x1xf32>
    %cst_143 = arith.constant 1.000000e+00 : f32
    %440 = vector.broadcast %cst_143 : f32 to vector<2x1xf32>
    %441 = arith.mulf %440, %439 : vector<2x1xf32>
    %c0_i32_144 = arith.constant 0 : i32
    %442 = vector.broadcast %c0_i32_144 : i32 to vector<2x1xi32>
    %443 = arith.cmpi ne, %322, %442 : vector<2x1xi32>
    %444 = arith.extui %443 : vector<2x1xi1> to vector<2x1xi32>
    %445 = arith.sitofp %444 : vector<2x1xi32> to vector<2x1xf32>
    %446 = arith.mulf %441, %445 : vector<2x1xf32>
    %447 = arith.mulf %446, %435 : vector<2x1xf32>
    %448 = arith.addf %357, %447 : vector<2x1xf32>
    %449 = arith.mulf %446, %429 : vector<2x1xf32>
    %450 = arith.addf %359, %449 : vector<2x1xf32>
    %c19_i32 = arith.constant 19 : i32
    %451 = vector.broadcast %c19_i32 : i32 to vector<2x1xi32>
    %452 = arith.addi %408, %451 : vector<2x1xi32>
    %453 = vector.broadcast %452 : vector<2x1xi32> to vector<2x96xi32>
    %454 = arith.cmpi eq, %1, %453 : vector<2x96xi32>
    %455 = arith.extui %454 : vector<2x96xi1> to vector<2x96xi32>
    %456 = arith.sitofp %455 : vector<2x96xi32> to vector<2x96xf32>
    %457 = tpu.concatenate %456, %382 in 1 : vector<2x96xf32>, vector<2x32xf32> -> vector<2x128xf32>
    %cst_145 = arith.constant dense<0.000000e+00> : vector<2x128xf32>
    %458 = tpu.matmul %457, %14, %cst_145 {dimension_numbers = #tpu.dot_dimension_numbers<[1], [0], [0], [1], [0, 0, 1, 1], [], []>} : vector<2x128xf32>, vector<128x128xf32>, vector<2x128xf32> -> vector<2x128xf32>
    %459 = vector.broadcast %15 : vector<1x128xf32> to vector<2x128xf32>
    %460 = arith.addf %458, %459 : vector<2x128xf32>
    %461 = arith.mulf %460, %10 : vector<2x128xf32>
    %462 = math.tanh %461 : vector<2x128xf32>
    %463 = arith.mulf %10, %462 : vector<2x128xf32>
    %464 = arith.addf %463, %13 : vector<2x128xf32>
    %465 = vector.extract_strided_slice %464 {offsets = [0, 0], sizes = [2, 32], strides = [1, 1]} : vector<2x128xf32> to vector<2x32xf32>
    %466 = vector.extract_strided_slice %464 {offsets = [0, 32], sizes = [2, 32], strides = [1, 1]} : vector<2x128xf32> to vector<2x32xf32>
    %467 = vector.extract_strided_slice %464 {offsets = [0, 64], sizes = [2, 32], strides = [1, 1]} : vector<2x128xf32> to vector<2x32xf32>
    %468 = vector.extract_strided_slice %464 {offsets = [0, 96], sizes = [2, 32], strides = [1, 1]} : vector<2x128xf32> to vector<2x32xf32>
    %469 = arith.mulf %466, %380 : vector<2x32xf32>
    %470 = arith.mulf %465, %467 : vector<2x32xf32>
    %471 = arith.addf %469, %470 : vector<2x32xf32>
    %472 = math.tanh %471 : vector<2x32xf32>
    %473 = arith.mulf %468, %472 : vector<2x32xf32>
    %c5 = arith.constant 5 : index
    %c0_146 = arith.constant 0 : index
    %c0_147 = arith.constant 0 : index
    %474 = vector.load %arg6[%c5, %c0_146, %c0_147] : memref<11x32x128xf32, #tpu.memory_space<vmem>>, vector<1x32x128xf32>
    %475 = vector.shape_cast %474 : vector<1x32x128xf32> to vector<32x128xf32>
    %cst_148 = arith.constant dense<0.000000e+00> : vector<2x128xf32>
    %476 = tpu.matmul %473, %475, %cst_148 {dimension_numbers = #tpu.dot_dimension_numbers<[1], [0], [0], [1], [0, 0, 1, 1], [], []>} : vector<2x32xf32>, vector<32x128xf32>, vector<2x128xf32> -> vector<2x128xf32>
    %c5_149 = arith.constant 5 : index
    %c0_150 = arith.constant 0 : index
    %c0_151 = arith.constant 0 : index
    %477 = vector.load %arg7[%c5_149, %c0_150, %c0_151] : memref<11x1x128xf32, #tpu.memory_space<vmem>>, vector<1x1x128xf32>
    %478 = vector.shape_cast %477 : vector<1x1x128xf32> to vector<1x128xf32>
    %479 = vector.broadcast %478 : vector<1x128xf32> to vector<2x128xf32>
    %480 = arith.addf %476, %479 : vector<2x128xf32>
    %c3_i32_152 = arith.constant 3 : i32
    %481 = vector.broadcast %c3_i32_152 : i32 to vector<2x128xi32>
    %482 = arith.cmpi slt, %0, %481 : vector<2x128xi32>
    %cst_153 = arith.constant -1.000000e+30 : f32
    %483 = vector.broadcast %cst_153 : f32 to vector<2x128xf32>
    %484 = arith.select %482, %480, %483 : vector<2x128xi1>, vector<2x128xf32>
    %c5_154 = arith.constant 5 : index
    %c0_155 = arith.constant 0 : index
    %c0_156 = arith.constant 0 : index
    %485 = vector.load %arg8[%c5_154, %c0_155, %c0_156] : memref<11x2x128xf32, #tpu.memory_space<vmem>>, vector<1x2x128xf32>
    %486 = vector.shape_cast %485 : vector<1x2x128xf32> to vector<2x128xf32>
    %487 = arith.addf %484, %486 : vector<2x128xf32>
    %cst_157 = arith.constant -1.000000e+30 : f32
    %488 = vector.broadcast %cst_157 : f32 to vector<2x128xf32>
    %489 = arith.select %482, %487, %488 : vector<2x128xi1>, vector<2x128xf32>
    %cst_158 = arith.constant dense<0xFF800000> : vector<2xf32>
    %490 = vector.multi_reduction <maximumf>, %489, %cst_158 [1] : vector<2x128xf32> to vector<2xf32>
    %491 = vector.shape_cast %490 : vector<2xf32> to vector<2x1xf32>
    %492 = vector.broadcast %491 : vector<2x1xf32> to vector<2x128xf32>
    %493 = arith.cmpf oge, %489, %492 : vector<2x128xf32>
    %c128_i32_159 = arith.constant 128 : i32
    %494 = vector.broadcast %c128_i32_159 : i32 to vector<2x128xi32>
    %495 = arith.select %493, %0, %494 : vector<2x128xi1>, vector<2x128xi32>
    %cst_160 = arith.constant dense<2147483647> : vector<2xi32>
    %496 = vector.multi_reduction <minsi>, %495, %cst_160 [1] : vector<2x128xi32> to vector<2xi32>
    %497 = vector.shape_cast %496 : vector<2xi32> to vector<2x1xi32>
    %c2_i32_161 = arith.constant 2 : i32
    %498 = vector.broadcast %c2_i32_161 : i32 to vector<2x1xi32>
    %499 = arith.minsi %497, %498 : vector<2x1xi32>
    %cst_162 = arith.constant dense<0xFF800000> : vector<2xf32>
    %500 = vector.multi_reduction <maximumf>, %484, %cst_162 [1] : vector<2x128xf32> to vector<2xf32>
    %501 = vector.shape_cast %500 : vector<2xf32> to vector<2x1xf32>
    %502 = vector.broadcast %501 : vector<2x1xf32> to vector<2x128xf32>
    %503 = arith.subf %484, %502 : vector<2x128xf32>
    %504 = math.exp %503 : vector<2x128xf32>
    %cst_163 = arith.constant dense<0.000000e+00> : vector<2xf32>
    %505 = vector.multi_reduction <add>, %504, %cst_163 [1] : vector<2x128xf32> to vector<2xf32>
    %506 = vector.shape_cast %505 : vector<2xf32> to vector<2x1xf32>
    %507 = vector.broadcast %501 : vector<2x1xf32> to vector<2x128xf32>
    %508 = arith.subf %484, %507 : vector<2x128xf32>
    %509 = math.log %506 : vector<2x1xf32>
    %510 = vector.broadcast %509 : vector<2x1xf32> to vector<2x128xf32>
    %511 = arith.subf %508, %510 : vector<2x128xf32>
    %512 = vector.broadcast %506 : vector<2x1xf32> to vector<2x128xf32>
    %513 = arith.divf %504, %512 : vector<2x128xf32>
    %514 = arith.mulf %513, %511 : vector<2x128xf32>
    %cst_164 = arith.constant 0.000000e+00 : f32
    %515 = vector.broadcast %cst_164 : f32 to vector<2x128xf32>
    %516 = arith.select %482, %514, %515 : vector<2x128xi1>, vector<2x128xf32>
    %cst_165 = arith.constant dense<0.000000e+00> : vector<2xf32>
    %517 = vector.multi_reduction <add>, %516, %cst_165 [1] : vector<2x128xf32> to vector<2xf32>
    %518 = vector.shape_cast %517 : vector<2xf32> to vector<2x1xf32>
    %cst_166 = arith.constant 0.000000e+00 : f32
    %519 = vector.broadcast %cst_166 : f32 to vector<2x1xf32>
    %520 = arith.subf %519, %518 : vector<2x1xf32>
    %521 = vector.broadcast %499 : vector<2x1xi32> to vector<2x128xi32>
    %522 = arith.cmpi eq, %0, %521 : vector<2x128xi32>
    %cst_167 = arith.constant 0.000000e+00 : f32
    %523 = vector.broadcast %cst_167 : f32 to vector<2x128xf32>
    %524 = arith.select %522, %511, %523 : vector<2x128xi1>, vector<2x128xf32>
    %cst_168 = arith.constant dense<0.000000e+00> : vector<2xf32>
    %525 = vector.multi_reduction <add>, %524, %cst_168 [1] : vector<2x128xf32> to vector<2xf32>
    %526 = vector.shape_cast %525 : vector<2xf32> to vector<2x1xf32>
    %c0_i32_169 = arith.constant 0 : i32
    %527 = vector.broadcast %c0_i32_169 : i32 to vector<2x1xi32>
    %528 = arith.cmpi ne, %68, %527 : vector<2x1xi32>
    %529 = arith.extui %528 : vector<2x1xi1> to vector<2x1xi32>
    %530 = arith.sitofp %529 : vector<2x1xi32> to vector<2x1xf32>
    %cst_170 = arith.constant 1.000000e+00 : f32
    %531 = vector.broadcast %cst_170 : f32 to vector<2x1xf32>
    %532 = arith.mulf %531, %530 : vector<2x1xf32>
    %c0_i32_171 = arith.constant 0 : i32
    %533 = vector.broadcast %c0_i32_171 : i32 to vector<2x1xi32>
    %534 = arith.cmpi ne, %322, %533 : vector<2x1xi32>
    %535 = arith.extui %534 : vector<2x1xi1> to vector<2x1xi32>
    %536 = arith.sitofp %535 : vector<2x1xi32> to vector<2x1xf32>
    %537 = arith.mulf %532, %536 : vector<2x1xf32>
    %c0_i32_172 = arith.constant 0 : i32
    %538 = vector.broadcast %c0_i32_172 : i32 to vector<2x1xi32>
    %539 = arith.cmpi ne, %408, %538 : vector<2x1xi32>
    %540 = arith.extui %539 : vector<2x1xi1> to vector<2x1xi32>
    %541 = arith.sitofp %540 : vector<2x1xi32> to vector<2x1xf32>
    %542 = arith.mulf %537, %541 : vector<2x1xf32>
    %543 = arith.mulf %542, %526 : vector<2x1xf32>
    %544 = arith.addf %448, %543 : vector<2x1xf32>
    %545 = arith.mulf %542, %520 : vector<2x1xf32>
    %546 = arith.addf %450, %545 : vector<2x1xf32>
    %c21_i32 = arith.constant 21 : i32
    %547 = vector.broadcast %c21_i32 : i32 to vector<2x1xi32>
    %548 = arith.addi %499, %547 : vector<2x1xi32>
    %549 = vector.broadcast %548 : vector<2x1xi32> to vector<2x96xi32>
    %550 = arith.cmpi eq, %1, %549 : vector<2x96xi32>
    %551 = arith.extui %550 : vector<2x96xi1> to vector<2x96xi32>
    %552 = arith.sitofp %551 : vector<2x96xi32> to vector<2x96xf32>
    %553 = tpu.concatenate %552, %473 in 1 : vector<2x96xf32>, vector<2x32xf32> -> vector<2x128xf32>
    %cst_173 = arith.constant dense<0.000000e+00> : vector<2x128xf32>
    %554 = tpu.matmul %553, %14, %cst_173 {dimension_numbers = #tpu.dot_dimension_numbers<[1], [0], [0], [1], [0, 0, 1, 1], [], []>} : vector<2x128xf32>, vector<128x128xf32>, vector<2x128xf32> -> vector<2x128xf32>
    %555 = vector.broadcast %15 : vector<1x128xf32> to vector<2x128xf32>
    %556 = arith.addf %554, %555 : vector<2x128xf32>
    %557 = arith.mulf %556, %10 : vector<2x128xf32>
    %558 = math.tanh %557 : vector<2x128xf32>
    %559 = arith.mulf %10, %558 : vector<2x128xf32>
    %560 = arith.addf %559, %13 : vector<2x128xf32>
    %561 = vector.extract_strided_slice %560 {offsets = [0, 0], sizes = [2, 32], strides = [1, 1]} : vector<2x128xf32> to vector<2x32xf32>
    %562 = vector.extract_strided_slice %560 {offsets = [0, 32], sizes = [2, 32], strides = [1, 1]} : vector<2x128xf32> to vector<2x32xf32>
    %563 = vector.extract_strided_slice %560 {offsets = [0, 64], sizes = [2, 32], strides = [1, 1]} : vector<2x128xf32> to vector<2x32xf32>
    %564 = vector.extract_strided_slice %560 {offsets = [0, 96], sizes = [2, 32], strides = [1, 1]} : vector<2x128xf32> to vector<2x32xf32>
    %565 = arith.mulf %562, %471 : vector<2x32xf32>
    %566 = arith.mulf %561, %563 : vector<2x32xf32>
    %567 = arith.addf %565, %566 : vector<2x32xf32>
    %568 = math.tanh %567 : vector<2x32xf32>
    %569 = arith.mulf %564, %568 : vector<2x32xf32>
    %c6 = arith.constant 6 : index
    %c0_174 = arith.constant 0 : index
    %c0_175 = arith.constant 0 : index
    %570 = vector.load %arg6[%c6, %c0_174, %c0_175] : memref<11x32x128xf32, #tpu.memory_space<vmem>>, vector<1x32x128xf32>
    %571 = vector.shape_cast %570 : vector<1x32x128xf32> to vector<32x128xf32>
    %cst_176 = arith.constant dense<0.000000e+00> : vector<2x128xf32>
    %572 = tpu.matmul %569, %571, %cst_176 {dimension_numbers = #tpu.dot_dimension_numbers<[1], [0], [0], [1], [0, 0, 1, 1], [], []>} : vector<2x32xf32>, vector<32x128xf32>, vector<2x128xf32> -> vector<2x128xf32>
    %c6_177 = arith.constant 6 : index
    %c0_178 = arith.constant 0 : index
    %c0_179 = arith.constant 0 : index
    %573 = vector.load %arg7[%c6_177, %c0_178, %c0_179] : memref<11x1x128xf32, #tpu.memory_space<vmem>>, vector<1x1x128xf32>
    %574 = vector.shape_cast %573 : vector<1x1x128xf32> to vector<1x128xf32>
    %575 = vector.broadcast %574 : vector<1x128xf32> to vector<2x128xf32>
    %576 = arith.addf %572, %575 : vector<2x128xf32>
    %c2_i32_180 = arith.constant 2 : i32
    %577 = vector.broadcast %c2_i32_180 : i32 to vector<2x128xi32>
    %578 = arith.cmpi slt, %0, %577 : vector<2x128xi32>
    %cst_181 = arith.constant -1.000000e+30 : f32
    %579 = vector.broadcast %cst_181 : f32 to vector<2x128xf32>
    %580 = arith.select %578, %576, %579 : vector<2x128xi1>, vector<2x128xf32>
    %c6_182 = arith.constant 6 : index
    %c0_183 = arith.constant 0 : index
    %c0_184 = arith.constant 0 : index
    %581 = vector.load %arg8[%c6_182, %c0_183, %c0_184] : memref<11x2x128xf32, #tpu.memory_space<vmem>>, vector<1x2x128xf32>
    %582 = vector.shape_cast %581 : vector<1x2x128xf32> to vector<2x128xf32>
    %583 = arith.addf %580, %582 : vector<2x128xf32>
    %cst_185 = arith.constant -1.000000e+30 : f32
    %584 = vector.broadcast %cst_185 : f32 to vector<2x128xf32>
    %585 = arith.select %578, %583, %584 : vector<2x128xi1>, vector<2x128xf32>
    %cst_186 = arith.constant dense<0xFF800000> : vector<2xf32>
    %586 = vector.multi_reduction <maximumf>, %585, %cst_186 [1] : vector<2x128xf32> to vector<2xf32>
    %587 = vector.shape_cast %586 : vector<2xf32> to vector<2x1xf32>
    %588 = vector.broadcast %587 : vector<2x1xf32> to vector<2x128xf32>
    %589 = arith.cmpf oge, %585, %588 : vector<2x128xf32>
    %c128_i32_187 = arith.constant 128 : i32
    %590 = vector.broadcast %c128_i32_187 : i32 to vector<2x128xi32>
    %591 = arith.select %589, %0, %590 : vector<2x128xi1>, vector<2x128xi32>
    %cst_188 = arith.constant dense<2147483647> : vector<2xi32>
    %592 = vector.multi_reduction <minsi>, %591, %cst_188 [1] : vector<2x128xi32> to vector<2xi32>
    %593 = vector.shape_cast %592 : vector<2xi32> to vector<2x1xi32>
    %c1_i32_189 = arith.constant 1 : i32
    %594 = vector.broadcast %c1_i32_189 : i32 to vector<2x1xi32>
    %595 = arith.minsi %593, %594 : vector<2x1xi32>
    %cst_190 = arith.constant dense<0xFF800000> : vector<2xf32>
    %596 = vector.multi_reduction <maximumf>, %580, %cst_190 [1] : vector<2x128xf32> to vector<2xf32>
    %597 = vector.shape_cast %596 : vector<2xf32> to vector<2x1xf32>
    %598 = vector.broadcast %597 : vector<2x1xf32> to vector<2x128xf32>
    %599 = arith.subf %580, %598 : vector<2x128xf32>
    %600 = math.exp %599 : vector<2x128xf32>
    %cst_191 = arith.constant dense<0.000000e+00> : vector<2xf32>
    %601 = vector.multi_reduction <add>, %600, %cst_191 [1] : vector<2x128xf32> to vector<2xf32>
    %602 = vector.shape_cast %601 : vector<2xf32> to vector<2x1xf32>
    %603 = vector.broadcast %597 : vector<2x1xf32> to vector<2x128xf32>
    %604 = arith.subf %580, %603 : vector<2x128xf32>
    %605 = math.log %602 : vector<2x1xf32>
    %606 = vector.broadcast %605 : vector<2x1xf32> to vector<2x128xf32>
    %607 = arith.subf %604, %606 : vector<2x128xf32>
    %608 = vector.broadcast %602 : vector<2x1xf32> to vector<2x128xf32>
    %609 = arith.divf %600, %608 : vector<2x128xf32>
    %610 = arith.mulf %609, %607 : vector<2x128xf32>
    %cst_192 = arith.constant 0.000000e+00 : f32
    %611 = vector.broadcast %cst_192 : f32 to vector<2x128xf32>
    %612 = arith.select %578, %610, %611 : vector<2x128xi1>, vector<2x128xf32>
    %cst_193 = arith.constant dense<0.000000e+00> : vector<2xf32>
    %613 = vector.multi_reduction <add>, %612, %cst_193 [1] : vector<2x128xf32> to vector<2xf32>
    %614 = vector.shape_cast %613 : vector<2xf32> to vector<2x1xf32>
    %cst_194 = arith.constant 0.000000e+00 : f32
    %615 = vector.broadcast %cst_194 : f32 to vector<2x1xf32>
    %616 = arith.subf %615, %614 : vector<2x1xf32>
    %617 = vector.broadcast %595 : vector<2x1xi32> to vector<2x128xi32>
    %618 = arith.cmpi eq, %0, %617 : vector<2x128xi32>
    %cst_195 = arith.constant 0.000000e+00 : f32
    %619 = vector.broadcast %cst_195 : f32 to vector<2x128xf32>
    %620 = arith.select %618, %607, %619 : vector<2x128xi1>, vector<2x128xf32>
    %cst_196 = arith.constant dense<0.000000e+00> : vector<2xf32>
    %621 = vector.multi_reduction <add>, %620, %cst_196 [1] : vector<2x128xf32> to vector<2xf32>
    %622 = vector.shape_cast %621 : vector<2xf32> to vector<2x1xf32>
    %c0_i32_197 = arith.constant 0 : i32
    %623 = vector.broadcast %c0_i32_197 : i32 to vector<2x1xi32>
    %624 = arith.cmpi ne, %68, %623 : vector<2x1xi32>
    %625 = arith.extui %624 : vector<2x1xi1> to vector<2x1xi32>
    %626 = arith.sitofp %625 : vector<2x1xi32> to vector<2x1xf32>
    %cst_198 = arith.constant 1.000000e+00 : f32
    %627 = vector.broadcast %cst_198 : f32 to vector<2x1xf32>
    %628 = arith.mulf %627, %626 : vector<2x1xf32>
    %c0_i32_199 = arith.constant 0 : i32
    %629 = vector.broadcast %c0_i32_199 : i32 to vector<2x1xi32>
    %630 = arith.cmpi ne, %322, %629 : vector<2x1xi32>
    %631 = arith.extui %630 : vector<2x1xi1> to vector<2x1xi32>
    %632 = arith.sitofp %631 : vector<2x1xi32> to vector<2x1xf32>
    %633 = arith.mulf %628, %632 : vector<2x1xf32>
    %c0_i32_200 = arith.constant 0 : i32
    %634 = vector.broadcast %c0_i32_200 : i32 to vector<2x1xi32>
    %635 = arith.cmpi ne, %408, %634 : vector<2x1xi32>
    %636 = arith.extui %635 : vector<2x1xi1> to vector<2x1xi32>
    %637 = arith.sitofp %636 : vector<2x1xi32> to vector<2x1xf32>
    %638 = arith.mulf %633, %637 : vector<2x1xf32>
    %639 = arith.mulf %638, %622 : vector<2x1xf32>
    %640 = arith.addf %544, %639 : vector<2x1xf32>
    %641 = arith.mulf %638, %616 : vector<2x1xf32>
    %642 = arith.addf %546, %641 : vector<2x1xf32>
    %c24_i32 = arith.constant 24 : i32
    %643 = vector.broadcast %c24_i32 : i32 to vector<2x1xi32>
    %644 = arith.addi %595, %643 : vector<2x1xi32>
    %645 = vector.broadcast %644 : vector<2x1xi32> to vector<2x96xi32>
    %646 = arith.cmpi eq, %1, %645 : vector<2x96xi32>
    %647 = arith.extui %646 : vector<2x96xi1> to vector<2x96xi32>
    %648 = arith.sitofp %647 : vector<2x96xi32> to vector<2x96xf32>
    %649 = tpu.concatenate %648, %569 in 1 : vector<2x96xf32>, vector<2x32xf32> -> vector<2x128xf32>
    %cst_201 = arith.constant dense<0.000000e+00> : vector<2x128xf32>
    %650 = tpu.matmul %649, %14, %cst_201 {dimension_numbers = #tpu.dot_dimension_numbers<[1], [0], [0], [1], [0, 0, 1, 1], [], []>} : vector<2x128xf32>, vector<128x128xf32>, vector<2x128xf32> -> vector<2x128xf32>
    %651 = vector.broadcast %15 : vector<1x128xf32> to vector<2x128xf32>
    %652 = arith.addf %650, %651 : vector<2x128xf32>
    %653 = arith.mulf %652, %10 : vector<2x128xf32>
    %654 = math.tanh %653 : vector<2x128xf32>
    %655 = arith.mulf %10, %654 : vector<2x128xf32>
    %656 = arith.addf %655, %13 : vector<2x128xf32>
    %657 = vector.extract_strided_slice %656 {offsets = [0, 0], sizes = [2, 32], strides = [1, 1]} : vector<2x128xf32> to vector<2x32xf32>
    %658 = vector.extract_strided_slice %656 {offsets = [0, 32], sizes = [2, 32], strides = [1, 1]} : vector<2x128xf32> to vector<2x32xf32>
    %659 = vector.extract_strided_slice %656 {offsets = [0, 64], sizes = [2, 32], strides = [1, 1]} : vector<2x128xf32> to vector<2x32xf32>
    %660 = vector.extract_strided_slice %656 {offsets = [0, 96], sizes = [2, 32], strides = [1, 1]} : vector<2x128xf32> to vector<2x32xf32>
    %661 = arith.mulf %658, %567 : vector<2x32xf32>
    %662 = arith.mulf %657, %659 : vector<2x32xf32>
    %663 = arith.addf %661, %662 : vector<2x32xf32>
    %664 = math.tanh %663 : vector<2x32xf32>
    %665 = arith.mulf %660, %664 : vector<2x32xf32>
    %c7 = arith.constant 7 : index
    %c0_202 = arith.constant 0 : index
    %c0_203 = arith.constant 0 : index
    %666 = vector.load %arg6[%c7, %c0_202, %c0_203] : memref<11x32x128xf32, #tpu.memory_space<vmem>>, vector<1x32x128xf32>
    %667 = vector.shape_cast %666 : vector<1x32x128xf32> to vector<32x128xf32>
    %cst_204 = arith.constant dense<0.000000e+00> : vector<2x128xf32>
    %668 = tpu.matmul %665, %667, %cst_204 {dimension_numbers = #tpu.dot_dimension_numbers<[1], [0], [0], [1], [0, 0, 1, 1], [], []>} : vector<2x32xf32>, vector<32x128xf32>, vector<2x128xf32> -> vector<2x128xf32>
    %c7_205 = arith.constant 7 : index
    %c0_206 = arith.constant 0 : index
    %c0_207 = arith.constant 0 : index
    %669 = vector.load %arg7[%c7_205, %c0_206, %c0_207] : memref<11x1x128xf32, #tpu.memory_space<vmem>>, vector<1x1x128xf32>
    %670 = vector.shape_cast %669 : vector<1x1x128xf32> to vector<1x128xf32>
    %671 = vector.broadcast %670 : vector<1x128xf32> to vector<2x128xf32>
    %672 = arith.addf %668, %671 : vector<2x128xf32>
    %c2_i32_208 = arith.constant 2 : i32
    %673 = vector.broadcast %c2_i32_208 : i32 to vector<2x128xi32>
    %674 = arith.cmpi slt, %0, %673 : vector<2x128xi32>
    %cst_209 = arith.constant -1.000000e+30 : f32
    %675 = vector.broadcast %cst_209 : f32 to vector<2x128xf32>
    %676 = arith.select %674, %672, %675 : vector<2x128xi1>, vector<2x128xf32>
    %c7_210 = arith.constant 7 : index
    %c0_211 = arith.constant 0 : index
    %c0_212 = arith.constant 0 : index
    %677 = vector.load %arg8[%c7_210, %c0_211, %c0_212] : memref<11x2x128xf32, #tpu.memory_space<vmem>>, vector<1x2x128xf32>
    %678 = vector.shape_cast %677 : vector<1x2x128xf32> to vector<2x128xf32>
    %679 = arith.addf %676, %678 : vector<2x128xf32>
    %cst_213 = arith.constant -1.000000e+30 : f32
    %680 = vector.broadcast %cst_213 : f32 to vector<2x128xf32>
    %681 = arith.select %674, %679, %680 : vector<2x128xi1>, vector<2x128xf32>
    %cst_214 = arith.constant dense<0xFF800000> : vector<2xf32>
    %682 = vector.multi_reduction <maximumf>, %681, %cst_214 [1] : vector<2x128xf32> to vector<2xf32>
    %683 = vector.shape_cast %682 : vector<2xf32> to vector<2x1xf32>
    %684 = vector.broadcast %683 : vector<2x1xf32> to vector<2x128xf32>
    %685 = arith.cmpf oge, %681, %684 : vector<2x128xf32>
    %c128_i32_215 = arith.constant 128 : i32
    %686 = vector.broadcast %c128_i32_215 : i32 to vector<2x128xi32>
    %687 = arith.select %685, %0, %686 : vector<2x128xi1>, vector<2x128xi32>
    %cst_216 = arith.constant dense<2147483647> : vector<2xi32>
    %688 = vector.multi_reduction <minsi>, %687, %cst_216 [1] : vector<2x128xi32> to vector<2xi32>
    %689 = vector.shape_cast %688 : vector<2xi32> to vector<2x1xi32>
    %c1_i32_217 = arith.constant 1 : i32
    %690 = vector.broadcast %c1_i32_217 : i32 to vector<2x1xi32>
    %691 = arith.minsi %689, %690 : vector<2x1xi32>
    %cst_218 = arith.constant dense<0xFF800000> : vector<2xf32>
    %692 = vector.multi_reduction <maximumf>, %676, %cst_218 [1] : vector<2x128xf32> to vector<2xf32>
    %693 = vector.shape_cast %692 : vector<2xf32> to vector<2x1xf32>
    %694 = vector.broadcast %693 : vector<2x1xf32> to vector<2x128xf32>
    %695 = arith.subf %676, %694 : vector<2x128xf32>
    %696 = math.exp %695 : vector<2x128xf32>
    %cst_219 = arith.constant dense<0.000000e+00> : vector<2xf32>
    %697 = vector.multi_reduction <add>, %696, %cst_219 [1] : vector<2x128xf32> to vector<2xf32>
    %698 = vector.shape_cast %697 : vector<2xf32> to vector<2x1xf32>
    %699 = vector.broadcast %693 : vector<2x1xf32> to vector<2x128xf32>
    %700 = arith.subf %676, %699 : vector<2x128xf32>
    %701 = math.log %698 : vector<2x1xf32>
    %702 = vector.broadcast %701 : vector<2x1xf32> to vector<2x128xf32>
    %703 = arith.subf %700, %702 : vector<2x128xf32>
    %704 = vector.broadcast %698 : vector<2x1xf32> to vector<2x128xf32>
    %705 = arith.divf %696, %704 : vector<2x128xf32>
    %706 = arith.mulf %705, %703 : vector<2x128xf32>
    %cst_220 = arith.constant 0.000000e+00 : f32
    %707 = vector.broadcast %cst_220 : f32 to vector<2x128xf32>
    %708 = arith.select %674, %706, %707 : vector<2x128xi1>, vector<2x128xf32>
    %cst_221 = arith.constant dense<0.000000e+00> : vector<2xf32>
    %709 = vector.multi_reduction <add>, %708, %cst_221 [1] : vector<2x128xf32> to vector<2xf32>
    %710 = vector.shape_cast %709 : vector<2xf32> to vector<2x1xf32>
    %cst_222 = arith.constant 0.000000e+00 : f32
    %711 = vector.broadcast %cst_222 : f32 to vector<2x1xf32>
    %712 = arith.subf %711, %710 : vector<2x1xf32>
    %713 = vector.broadcast %691 : vector<2x1xi32> to vector<2x128xi32>
    %714 = arith.cmpi eq, %0, %713 : vector<2x128xi32>
    %cst_223 = arith.constant 0.000000e+00 : f32
    %715 = vector.broadcast %cst_223 : f32 to vector<2x128xf32>
    %716 = arith.select %714, %703, %715 : vector<2x128xi1>, vector<2x128xf32>
    %cst_224 = arith.constant dense<0.000000e+00> : vector<2xf32>
    %717 = vector.multi_reduction <add>, %716, %cst_224 [1] : vector<2x128xf32> to vector<2xf32>
    %718 = vector.shape_cast %717 : vector<2xf32> to vector<2x1xf32>
    %c0_i32_225 = arith.constant 0 : i32
    %719 = vector.broadcast %c0_i32_225 : i32 to vector<2x1xi32>
    %720 = arith.cmpi ne, %68, %719 : vector<2x1xi32>
    %721 = arith.extui %720 : vector<2x1xi1> to vector<2x1xi32>
    %722 = arith.sitofp %721 : vector<2x1xi32> to vector<2x1xf32>
    %cst_226 = arith.constant 1.000000e+00 : f32
    %723 = vector.broadcast %cst_226 : f32 to vector<2x1xf32>
    %724 = arith.mulf %723, %722 : vector<2x1xf32>
    %c0_i32_227 = arith.constant 0 : i32
    %725 = vector.broadcast %c0_i32_227 : i32 to vector<2x1xi32>
    %726 = arith.cmpi ne, %322, %725 : vector<2x1xi32>
    %727 = arith.extui %726 : vector<2x1xi1> to vector<2x1xi32>
    %728 = arith.sitofp %727 : vector<2x1xi32> to vector<2x1xf32>
    %729 = arith.mulf %724, %728 : vector<2x1xf32>
    %730 = arith.mulf %729, %718 : vector<2x1xf32>
    %731 = arith.addf %640, %730 : vector<2x1xf32>
    %732 = arith.mulf %729, %712 : vector<2x1xf32>
    %733 = arith.addf %642, %732 : vector<2x1xf32>
    %c26_i32 = arith.constant 26 : i32
    %734 = vector.broadcast %c26_i32 : i32 to vector<2x1xi32>
    %735 = arith.addi %691, %734 : vector<2x1xi32>
    %736 = vector.broadcast %735 : vector<2x1xi32> to vector<2x96xi32>
    %737 = arith.cmpi eq, %1, %736 : vector<2x96xi32>
    %738 = arith.extui %737 : vector<2x96xi1> to vector<2x96xi32>
    %739 = arith.sitofp %738 : vector<2x96xi32> to vector<2x96xf32>
    %740 = tpu.concatenate %739, %665 in 1 : vector<2x96xf32>, vector<2x32xf32> -> vector<2x128xf32>
    %cst_228 = arith.constant dense<0.000000e+00> : vector<2x128xf32>
    %741 = tpu.matmul %740, %14, %cst_228 {dimension_numbers = #tpu.dot_dimension_numbers<[1], [0], [0], [1], [0, 0, 1, 1], [], []>} : vector<2x128xf32>, vector<128x128xf32>, vector<2x128xf32> -> vector<2x128xf32>
    %742 = vector.broadcast %15 : vector<1x128xf32> to vector<2x128xf32>
    %743 = arith.addf %741, %742 : vector<2x128xf32>
    %744 = arith.mulf %743, %10 : vector<2x128xf32>
    %745 = math.tanh %744 : vector<2x128xf32>
    %746 = arith.mulf %10, %745 : vector<2x128xf32>
    %747 = arith.addf %746, %13 : vector<2x128xf32>
    %748 = vector.extract_strided_slice %747 {offsets = [0, 0], sizes = [2, 32], strides = [1, 1]} : vector<2x128xf32> to vector<2x32xf32>
    %749 = vector.extract_strided_slice %747 {offsets = [0, 32], sizes = [2, 32], strides = [1, 1]} : vector<2x128xf32> to vector<2x32xf32>
    %750 = vector.extract_strided_slice %747 {offsets = [0, 64], sizes = [2, 32], strides = [1, 1]} : vector<2x128xf32> to vector<2x32xf32>
    %751 = vector.extract_strided_slice %747 {offsets = [0, 96], sizes = [2, 32], strides = [1, 1]} : vector<2x128xf32> to vector<2x32xf32>
    %752 = arith.mulf %749, %663 : vector<2x32xf32>
    %753 = arith.mulf %748, %750 : vector<2x32xf32>
    %754 = arith.addf %752, %753 : vector<2x32xf32>
    %755 = math.tanh %754 : vector<2x32xf32>
    %756 = arith.mulf %751, %755 : vector<2x32xf32>
    %c8 = arith.constant 8 : index
    %c0_229 = arith.constant 0 : index
    %c0_230 = arith.constant 0 : index
    %757 = vector.load %arg6[%c8, %c0_229, %c0_230] : memref<11x32x128xf32, #tpu.memory_space<vmem>>, vector<1x32x128xf32>
    %758 = vector.shape_cast %757 : vector<1x32x128xf32> to vector<32x128xf32>
    %cst_231 = arith.constant dense<0.000000e+00> : vector<2x128xf32>
    %759 = tpu.matmul %756, %758, %cst_231 {dimension_numbers = #tpu.dot_dimension_numbers<[1], [0], [0], [1], [0, 0, 1, 1], [], []>} : vector<2x32xf32>, vector<32x128xf32>, vector<2x128xf32> -> vector<2x128xf32>
    %c8_232 = arith.constant 8 : index
    %c0_233 = arith.constant 0 : index
    %c0_234 = arith.constant 0 : index
    %760 = vector.load %arg7[%c8_232, %c0_233, %c0_234] : memref<11x1x128xf32, #tpu.memory_space<vmem>>, vector<1x1x128xf32>
    %761 = vector.shape_cast %760 : vector<1x1x128xf32> to vector<1x128xf32>
    %762 = vector.broadcast %761 : vector<1x128xf32> to vector<2x128xf32>
    %763 = arith.addf %759, %762 : vector<2x128xf32>
    %c8_i32 = arith.constant 8 : i32
    %764 = vector.broadcast %c8_i32 : i32 to vector<2x128xi32>
    %765 = arith.cmpi slt, %0, %764 : vector<2x128xi32>
    %cst_235 = arith.constant -1.000000e+30 : f32
    %766 = vector.broadcast %cst_235 : f32 to vector<2x128xf32>
    %767 = arith.select %765, %763, %766 : vector<2x128xi1>, vector<2x128xf32>
    %c8_236 = arith.constant 8 : index
    %c0_237 = arith.constant 0 : index
    %c0_238 = arith.constant 0 : index
    %768 = vector.load %arg8[%c8_236, %c0_237, %c0_238] : memref<11x2x128xf32, #tpu.memory_space<vmem>>, vector<1x2x128xf32>
    %769 = vector.shape_cast %768 : vector<1x2x128xf32> to vector<2x128xf32>
    %770 = arith.addf %767, %769 : vector<2x128xf32>
    %cst_239 = arith.constant -1.000000e+30 : f32
    %771 = vector.broadcast %cst_239 : f32 to vector<2x128xf32>
    %772 = arith.select %765, %770, %771 : vector<2x128xi1>, vector<2x128xf32>
    %cst_240 = arith.constant dense<0xFF800000> : vector<2xf32>
    %773 = vector.multi_reduction <maximumf>, %772, %cst_240 [1] : vector<2x128xf32> to vector<2xf32>
    %774 = vector.shape_cast %773 : vector<2xf32> to vector<2x1xf32>
    %775 = vector.broadcast %774 : vector<2x1xf32> to vector<2x128xf32>
    %776 = arith.cmpf oge, %772, %775 : vector<2x128xf32>
    %c128_i32_241 = arith.constant 128 : i32
    %777 = vector.broadcast %c128_i32_241 : i32 to vector<2x128xi32>
    %778 = arith.select %776, %0, %777 : vector<2x128xi1>, vector<2x128xi32>
    %cst_242 = arith.constant dense<2147483647> : vector<2xi32>
    %779 = vector.multi_reduction <minsi>, %778, %cst_242 [1] : vector<2x128xi32> to vector<2xi32>
    %780 = vector.shape_cast %779 : vector<2xi32> to vector<2x1xi32>
    %c7_i32 = arith.constant 7 : i32
    %781 = vector.broadcast %c7_i32 : i32 to vector<2x1xi32>
    %782 = arith.minsi %780, %781 : vector<2x1xi32>
    %cst_243 = arith.constant dense<0xFF800000> : vector<2xf32>
    %783 = vector.multi_reduction <maximumf>, %767, %cst_243 [1] : vector<2x128xf32> to vector<2xf32>
    %784 = vector.shape_cast %783 : vector<2xf32> to vector<2x1xf32>
    %785 = vector.broadcast %784 : vector<2x1xf32> to vector<2x128xf32>
    %786 = arith.subf %767, %785 : vector<2x128xf32>
    %787 = math.exp %786 : vector<2x128xf32>
    %cst_244 = arith.constant dense<0.000000e+00> : vector<2xf32>
    %788 = vector.multi_reduction <add>, %787, %cst_244 [1] : vector<2x128xf32> to vector<2xf32>
    %789 = vector.shape_cast %788 : vector<2xf32> to vector<2x1xf32>
    %790 = vector.broadcast %784 : vector<2x1xf32> to vector<2x128xf32>
    %791 = arith.subf %767, %790 : vector<2x128xf32>
    %792 = math.log %789 : vector<2x1xf32>
    %793 = vector.broadcast %792 : vector<2x1xf32> to vector<2x128xf32>
    %794 = arith.subf %791, %793 : vector<2x128xf32>
    %795 = vector.broadcast %789 : vector<2x1xf32> to vector<2x128xf32>
    %796 = arith.divf %787, %795 : vector<2x128xf32>
    %797 = arith.mulf %796, %794 : vector<2x128xf32>
    %cst_245 = arith.constant 0.000000e+00 : f32
    %798 = vector.broadcast %cst_245 : f32 to vector<2x128xf32>
    %799 = arith.select %765, %797, %798 : vector<2x128xi1>, vector<2x128xf32>
    %cst_246 = arith.constant dense<0.000000e+00> : vector<2xf32>
    %800 = vector.multi_reduction <add>, %799, %cst_246 [1] : vector<2x128xf32> to vector<2xf32>
    %801 = vector.shape_cast %800 : vector<2xf32> to vector<2x1xf32>
    %cst_247 = arith.constant 0.000000e+00 : f32
    %802 = vector.broadcast %cst_247 : f32 to vector<2x1xf32>
    %803 = arith.subf %802, %801 : vector<2x1xf32>
    %804 = vector.broadcast %782 : vector<2x1xi32> to vector<2x128xi32>
    %805 = arith.cmpi eq, %0, %804 : vector<2x128xi32>
    %cst_248 = arith.constant 0.000000e+00 : f32
    %806 = vector.broadcast %cst_248 : f32 to vector<2x128xf32>
    %807 = arith.select %805, %794, %806 : vector<2x128xi1>, vector<2x128xf32>
    %cst_249 = arith.constant dense<0.000000e+00> : vector<2xf32>
    %808 = vector.multi_reduction <add>, %807, %cst_249 [1] : vector<2x128xf32> to vector<2xf32>
    %809 = vector.shape_cast %808 : vector<2xf32> to vector<2x1xf32>
    %c0_i32_250 = arith.constant 0 : i32
    %810 = vector.broadcast %c0_i32_250 : i32 to vector<2x1xi32>
    %811 = arith.cmpi ne, %68, %810 : vector<2x1xi32>
    %812 = arith.extui %811 : vector<2x1xi1> to vector<2x1xi32>
    %813 = arith.sitofp %812 : vector<2x1xi32> to vector<2x1xf32>
    %cst_251 = arith.constant 1.000000e+00 : f32
    %814 = vector.broadcast %cst_251 : f32 to vector<2x1xf32>
    %815 = arith.mulf %814, %813 : vector<2x1xf32>
    %c0_i32_252 = arith.constant 0 : i32
    %816 = vector.broadcast %c0_i32_252 : i32 to vector<2x1xi32>
    %817 = arith.cmpi ne, %322, %816 : vector<2x1xi32>
    %818 = arith.extui %817 : vector<2x1xi1> to vector<2x1xi32>
    %819 = arith.sitofp %818 : vector<2x1xi32> to vector<2x1xf32>
    %820 = arith.mulf %815, %819 : vector<2x1xf32>
    %c0_i32_253 = arith.constant 0 : i32
    %821 = vector.broadcast %c0_i32_253 : i32 to vector<2x1xi32>
    %822 = arith.cmpi ne, %691, %821 : vector<2x1xi32>
    %823 = arith.extui %822 : vector<2x1xi1> to vector<2x1xi32>
    %824 = arith.sitofp %823 : vector<2x1xi32> to vector<2x1xf32>
    %825 = arith.mulf %820, %824 : vector<2x1xf32>
    %826 = arith.mulf %825, %809 : vector<2x1xf32>
    %827 = arith.addf %731, %826 : vector<2x1xf32>
    %828 = arith.mulf %825, %803 : vector<2x1xf32>
    %829 = arith.addf %733, %828 : vector<2x1xf32>
    %c28_i32 = arith.constant 28 : i32
    %830 = vector.broadcast %c28_i32 : i32 to vector<2x1xi32>
    %831 = arith.addi %782, %830 : vector<2x1xi32>
    %832 = vector.broadcast %831 : vector<2x1xi32> to vector<2x96xi32>
    %833 = arith.cmpi eq, %1, %832 : vector<2x96xi32>
    %834 = arith.extui %833 : vector<2x96xi1> to vector<2x96xi32>
    %835 = arith.sitofp %834 : vector<2x96xi32> to vector<2x96xf32>
    %836 = tpu.concatenate %835, %756 in 1 : vector<2x96xf32>, vector<2x32xf32> -> vector<2x128xf32>
    %cst_254 = arith.constant dense<0.000000e+00> : vector<2x128xf32>
    %837 = tpu.matmul %836, %14, %cst_254 {dimension_numbers = #tpu.dot_dimension_numbers<[1], [0], [0], [1], [0, 0, 1, 1], [], []>} : vector<2x128xf32>, vector<128x128xf32>, vector<2x128xf32> -> vector<2x128xf32>
    %838 = vector.broadcast %15 : vector<1x128xf32> to vector<2x128xf32>
    %839 = arith.addf %837, %838 : vector<2x128xf32>
    %840 = arith.mulf %839, %10 : vector<2x128xf32>
    %841 = math.tanh %840 : vector<2x128xf32>
    %842 = arith.mulf %10, %841 : vector<2x128xf32>
    %843 = arith.addf %842, %13 : vector<2x128xf32>
    %844 = vector.extract_strided_slice %843 {offsets = [0, 0], sizes = [2, 32], strides = [1, 1]} : vector<2x128xf32> to vector<2x32xf32>
    %845 = vector.extract_strided_slice %843 {offsets = [0, 32], sizes = [2, 32], strides = [1, 1]} : vector<2x128xf32> to vector<2x32xf32>
    %846 = vector.extract_strided_slice %843 {offsets = [0, 64], sizes = [2, 32], strides = [1, 1]} : vector<2x128xf32> to vector<2x32xf32>
    %847 = vector.extract_strided_slice %843 {offsets = [0, 96], sizes = [2, 32], strides = [1, 1]} : vector<2x128xf32> to vector<2x32xf32>
    %848 = arith.mulf %845, %754 : vector<2x32xf32>
    %849 = arith.mulf %844, %846 : vector<2x32xf32>
    %850 = arith.addf %848, %849 : vector<2x32xf32>
    %851 = math.tanh %850 : vector<2x32xf32>
    %852 = arith.mulf %847, %851 : vector<2x32xf32>
    %c9 = arith.constant 9 : index
    %c0_255 = arith.constant 0 : index
    %c0_256 = arith.constant 0 : index
    %853 = vector.load %arg6[%c9, %c0_255, %c0_256] : memref<11x32x128xf32, #tpu.memory_space<vmem>>, vector<1x32x128xf32>
    %854 = vector.shape_cast %853 : vector<1x32x128xf32> to vector<32x128xf32>
    %cst_257 = arith.constant dense<0.000000e+00> : vector<2x128xf32>
    %855 = tpu.matmul %852, %854, %cst_257 {dimension_numbers = #tpu.dot_dimension_numbers<[1], [0], [0], [1], [0, 0, 1, 1], [], []>} : vector<2x32xf32>, vector<32x128xf32>, vector<2x128xf32> -> vector<2x128xf32>
    %c9_258 = arith.constant 9 : index
    %c0_259 = arith.constant 0 : index
    %c0_260 = arith.constant 0 : index
    %856 = vector.load %arg7[%c9_258, %c0_259, %c0_260] : memref<11x1x128xf32, #tpu.memory_space<vmem>>, vector<1x1x128xf32>
    %857 = vector.shape_cast %856 : vector<1x1x128xf32> to vector<1x128xf32>
    %858 = vector.broadcast %857 : vector<1x128xf32> to vector<2x128xf32>
    %859 = arith.addf %855, %858 : vector<2x128xf32>
    %c4_i32 = arith.constant 4 : i32
    %860 = vector.broadcast %c4_i32 : i32 to vector<2x128xi32>
    %861 = arith.cmpi slt, %0, %860 : vector<2x128xi32>
    %cst_261 = arith.constant -1.000000e+30 : f32
    %862 = vector.broadcast %cst_261 : f32 to vector<2x128xf32>
    %863 = arith.select %861, %859, %862 : vector<2x128xi1>, vector<2x128xf32>
    %c9_262 = arith.constant 9 : index
    %c0_263 = arith.constant 0 : index
    %c0_264 = arith.constant 0 : index
    %864 = vector.load %arg8[%c9_262, %c0_263, %c0_264] : memref<11x2x128xf32, #tpu.memory_space<vmem>>, vector<1x2x128xf32>
    %865 = vector.shape_cast %864 : vector<1x2x128xf32> to vector<2x128xf32>
    %866 = arith.addf %863, %865 : vector<2x128xf32>
    %cst_265 = arith.constant -1.000000e+30 : f32
    %867 = vector.broadcast %cst_265 : f32 to vector<2x128xf32>
    %868 = arith.select %861, %866, %867 : vector<2x128xi1>, vector<2x128xf32>
    %cst_266 = arith.constant dense<0xFF800000> : vector<2xf32>
    %869 = vector.multi_reduction <maximumf>, %868, %cst_266 [1] : vector<2x128xf32> to vector<2xf32>
    %870 = vector.shape_cast %869 : vector<2xf32> to vector<2x1xf32>
    %871 = vector.broadcast %870 : vector<2x1xf32> to vector<2x128xf32>
    %872 = arith.cmpf oge, %868, %871 : vector<2x128xf32>
    %c128_i32_267 = arith.constant 128 : i32
    %873 = vector.broadcast %c128_i32_267 : i32 to vector<2x128xi32>
    %874 = arith.select %872, %0, %873 : vector<2x128xi1>, vector<2x128xi32>
    %cst_268 = arith.constant dense<2147483647> : vector<2xi32>
    %875 = vector.multi_reduction <minsi>, %874, %cst_268 [1] : vector<2x128xi32> to vector<2xi32>
    %876 = vector.shape_cast %875 : vector<2xi32> to vector<2x1xi32>
    %c3_i32_269 = arith.constant 3 : i32
    %877 = vector.broadcast %c3_i32_269 : i32 to vector<2x1xi32>
    %878 = arith.minsi %876, %877 : vector<2x1xi32>
    %cst_270 = arith.constant dense<0xFF800000> : vector<2xf32>
    %879 = vector.multi_reduction <maximumf>, %863, %cst_270 [1] : vector<2x128xf32> to vector<2xf32>
    %880 = vector.shape_cast %879 : vector<2xf32> to vector<2x1xf32>
    %881 = vector.broadcast %880 : vector<2x1xf32> to vector<2x128xf32>
    %882 = arith.subf %863, %881 : vector<2x128xf32>
    %883 = math.exp %882 : vector<2x128xf32>
    %cst_271 = arith.constant dense<0.000000e+00> : vector<2xf32>
    %884 = vector.multi_reduction <add>, %883, %cst_271 [1] : vector<2x128xf32> to vector<2xf32>
    %885 = vector.shape_cast %884 : vector<2xf32> to vector<2x1xf32>
    %886 = vector.broadcast %880 : vector<2x1xf32> to vector<2x128xf32>
    %887 = arith.subf %863, %886 : vector<2x128xf32>
    %888 = math.log %885 : vector<2x1xf32>
    %889 = vector.broadcast %888 : vector<2x1xf32> to vector<2x128xf32>
    %890 = arith.subf %887, %889 : vector<2x128xf32>
    %891 = vector.broadcast %885 : vector<2x1xf32> to vector<2x128xf32>
    %892 = arith.divf %883, %891 : vector<2x128xf32>
    %893 = arith.mulf %892, %890 : vector<2x128xf32>
    %cst_272 = arith.constant 0.000000e+00 : f32
    %894 = vector.broadcast %cst_272 : f32 to vector<2x128xf32>
    %895 = arith.select %861, %893, %894 : vector<2x128xi1>, vector<2x128xf32>
    %cst_273 = arith.constant dense<0.000000e+00> : vector<2xf32>
    %896 = vector.multi_reduction <add>, %895, %cst_273 [1] : vector<2x128xf32> to vector<2xf32>
    %897 = vector.shape_cast %896 : vector<2xf32> to vector<2x1xf32>
    %cst_274 = arith.constant 0.000000e+00 : f32
    %898 = vector.broadcast %cst_274 : f32 to vector<2x1xf32>
    %899 = arith.subf %898, %897 : vector<2x1xf32>
    %900 = vector.broadcast %878 : vector<2x1xi32> to vector<2x128xi32>
    %901 = arith.cmpi eq, %0, %900 : vector<2x128xi32>
    %cst_275 = arith.constant 0.000000e+00 : f32
    %902 = vector.broadcast %cst_275 : f32 to vector<2x128xf32>
    %903 = arith.select %901, %890, %902 : vector<2x128xi1>, vector<2x128xf32>
    %cst_276 = arith.constant dense<0.000000e+00> : vector<2xf32>
    %904 = vector.multi_reduction <add>, %903, %cst_276 [1] : vector<2x128xf32> to vector<2xf32>
    %905 = vector.shape_cast %904 : vector<2xf32> to vector<2x1xf32>
    %c0_i32_277 = arith.constant 0 : i32
    %906 = vector.broadcast %c0_i32_277 : i32 to vector<2x1xi32>
    %907 = arith.cmpi ne, %68, %906 : vector<2x1xi32>
    %908 = arith.extui %907 : vector<2x1xi1> to vector<2x1xi32>
    %909 = arith.sitofp %908 : vector<2x1xi32> to vector<2x1xf32>
    %cst_278 = arith.constant 1.000000e+00 : f32
    %910 = vector.broadcast %cst_278 : f32 to vector<2x1xf32>
    %911 = arith.mulf %910, %909 : vector<2x1xf32>
    %c0_i32_279 = arith.constant 0 : i32
    %912 = vector.broadcast %c0_i32_279 : i32 to vector<2x1xi32>
    %913 = arith.cmpi ne, %322, %912 : vector<2x1xi32>
    %914 = arith.extui %913 : vector<2x1xi1> to vector<2x1xi32>
    %915 = arith.sitofp %914 : vector<2x1xi32> to vector<2x1xf32>
    %916 = arith.mulf %911, %915 : vector<2x1xf32>
    %c0_i32_280 = arith.constant 0 : i32
    %917 = vector.broadcast %c0_i32_280 : i32 to vector<2x1xi32>
    %918 = arith.cmpi ne, %691, %917 : vector<2x1xi32>
    %919 = arith.extui %918 : vector<2x1xi1> to vector<2x1xi32>
    %920 = arith.sitofp %919 : vector<2x1xi32> to vector<2x1xf32>
    %921 = arith.mulf %916, %920 : vector<2x1xf32>
    %922 = arith.mulf %921, %905 : vector<2x1xf32>
    %923 = arith.addf %827, %922 : vector<2x1xf32>
    %924 = arith.mulf %921, %899 : vector<2x1xf32>
    %925 = arith.addf %829, %924 : vector<2x1xf32>
    %c36_i32 = arith.constant 36 : i32
    %926 = vector.broadcast %c36_i32 : i32 to vector<2x1xi32>
    %927 = arith.addi %878, %926 : vector<2x1xi32>
    %928 = vector.broadcast %927 : vector<2x1xi32> to vector<2x96xi32>
    %929 = arith.cmpi eq, %1, %928 : vector<2x96xi32>
    %930 = arith.extui %929 : vector<2x96xi1> to vector<2x96xi32>
    %931 = arith.sitofp %930 : vector<2x96xi32> to vector<2x96xf32>
    %932 = tpu.concatenate %931, %852 in 1 : vector<2x96xf32>, vector<2x32xf32> -> vector<2x128xf32>
    %cst_281 = arith.constant dense<0.000000e+00> : vector<2x128xf32>
    %933 = tpu.matmul %932, %14, %cst_281 {dimension_numbers = #tpu.dot_dimension_numbers<[1], [0], [0], [1], [0, 0, 1, 1], [], []>} : vector<2x128xf32>, vector<128x128xf32>, vector<2x128xf32> -> vector<2x128xf32>
    %934 = vector.broadcast %15 : vector<1x128xf32> to vector<2x128xf32>
    %935 = arith.addf %933, %934 : vector<2x128xf32>
    %936 = arith.mulf %935, %10 : vector<2x128xf32>
    %937 = math.tanh %936 : vector<2x128xf32>
    %938 = arith.mulf %10, %937 : vector<2x128xf32>
    %939 = arith.addf %938, %13 : vector<2x128xf32>
    %940 = vector.extract_strided_slice %939 {offsets = [0, 0], sizes = [2, 32], strides = [1, 1]} : vector<2x128xf32> to vector<2x32xf32>
    %941 = vector.extract_strided_slice %939 {offsets = [0, 32], sizes = [2, 32], strides = [1, 1]} : vector<2x128xf32> to vector<2x32xf32>
    %942 = vector.extract_strided_slice %939 {offsets = [0, 64], sizes = [2, 32], strides = [1, 1]} : vector<2x128xf32> to vector<2x32xf32>
    %943 = vector.extract_strided_slice %939 {offsets = [0, 96], sizes = [2, 32], strides = [1, 1]} : vector<2x128xf32> to vector<2x32xf32>
    %944 = arith.mulf %941, %850 : vector<2x32xf32>
    %945 = arith.mulf %940, %942 : vector<2x32xf32>
    %946 = arith.addf %944, %945 : vector<2x32xf32>
    %947 = math.tanh %946 : vector<2x32xf32>
    %948 = arith.mulf %943, %947 : vector<2x32xf32>
    %c10 = arith.constant 10 : index
    %c0_282 = arith.constant 0 : index
    %c0_283 = arith.constant 0 : index
    %949 = vector.load %arg6[%c10, %c0_282, %c0_283] : memref<11x32x128xf32, #tpu.memory_space<vmem>>, vector<1x32x128xf32>
    %950 = vector.shape_cast %949 : vector<1x32x128xf32> to vector<32x128xf32>
    %cst_284 = arith.constant dense<0.000000e+00> : vector<2x128xf32>
    %951 = tpu.matmul %948, %950, %cst_284 {dimension_numbers = #tpu.dot_dimension_numbers<[1], [0], [0], [1], [0, 0, 1, 1], [], []>} : vector<2x32xf32>, vector<32x128xf32>, vector<2x128xf32> -> vector<2x128xf32>
    %c10_285 = arith.constant 10 : index
    %c0_286 = arith.constant 0 : index
    %c0_287 = arith.constant 0 : index
    %952 = vector.load %arg7[%c10_285, %c0_286, %c0_287] : memref<11x1x128xf32, #tpu.memory_space<vmem>>, vector<1x1x128xf32>
    %953 = vector.shape_cast %952 : vector<1x1x128xf32> to vector<1x128xf32>
    %954 = vector.broadcast %953 : vector<1x128xf32> to vector<2x128xf32>
    %955 = arith.addf %951, %954 : vector<2x128xf32>
    %c2_i32_288 = arith.constant 2 : i32
    %956 = vector.broadcast %c2_i32_288 : i32 to vector<2x128xi32>
    %957 = arith.cmpi slt, %0, %956 : vector<2x128xi32>
    %cst_289 = arith.constant -1.000000e+30 : f32
    %958 = vector.broadcast %cst_289 : f32 to vector<2x128xf32>
    %959 = arith.select %957, %955, %958 : vector<2x128xi1>, vector<2x128xf32>
    %c10_290 = arith.constant 10 : index
    %c0_291 = arith.constant 0 : index
    %c0_292 = arith.constant 0 : index
    %960 = vector.load %arg8[%c10_290, %c0_291, %c0_292] : memref<11x2x128xf32, #tpu.memory_space<vmem>>, vector<1x2x128xf32>
    %961 = vector.shape_cast %960 : vector<1x2x128xf32> to vector<2x128xf32>
    %962 = arith.addf %959, %961 : vector<2x128xf32>
    %cst_293 = arith.constant -1.000000e+30 : f32
    %963 = vector.broadcast %cst_293 : f32 to vector<2x128xf32>
    %964 = arith.select %957, %962, %963 : vector<2x128xi1>, vector<2x128xf32>
    %cst_294 = arith.constant dense<0xFF800000> : vector<2xf32>
    %965 = vector.multi_reduction <maximumf>, %964, %cst_294 [1] : vector<2x128xf32> to vector<2xf32>
    %966 = vector.shape_cast %965 : vector<2xf32> to vector<2x1xf32>
    %967 = vector.broadcast %966 : vector<2x1xf32> to vector<2x128xf32>
    %968 = arith.cmpf oge, %964, %967 : vector<2x128xf32>
    %c128_i32_295 = arith.constant 128 : i32
    %969 = vector.broadcast %c128_i32_295 : i32 to vector<2x128xi32>
    %970 = arith.select %968, %0, %969 : vector<2x128xi1>, vector<2x128xi32>
    %cst_296 = arith.constant dense<2147483647> : vector<2xi32>
    %971 = vector.multi_reduction <minsi>, %970, %cst_296 [1] : vector<2x128xi32> to vector<2xi32>
    %972 = vector.shape_cast %971 : vector<2xi32> to vector<2x1xi32>
    %c1_i32_297 = arith.constant 1 : i32
    %973 = vector.broadcast %c1_i32_297 : i32 to vector<2x1xi32>
    %974 = arith.minsi %972, %973 : vector<2x1xi32>
    %cst_298 = arith.constant dense<0xFF800000> : vector<2xf32>
    %975 = vector.multi_reduction <maximumf>, %959, %cst_298 [1] : vector<2x128xf32> to vector<2xf32>
    %976 = vector.shape_cast %975 : vector<2xf32> to vector<2x1xf32>
    %977 = vector.broadcast %976 : vector<2x1xf32> to vector<2x128xf32>
    %978 = arith.subf %959, %977 : vector<2x128xf32>
    %979 = math.exp %978 : vector<2x128xf32>
    %cst_299 = arith.constant dense<0.000000e+00> : vector<2xf32>
    %980 = vector.multi_reduction <add>, %979, %cst_299 [1] : vector<2x128xf32> to vector<2xf32>
    %981 = vector.shape_cast %980 : vector<2xf32> to vector<2x1xf32>
    %982 = vector.broadcast %976 : vector<2x1xf32> to vector<2x128xf32>
    %983 = arith.subf %959, %982 : vector<2x128xf32>
    %984 = math.log %981 : vector<2x1xf32>
    %985 = vector.broadcast %984 : vector<2x1xf32> to vector<2x128xf32>
    %986 = arith.subf %983, %985 : vector<2x128xf32>
    %987 = vector.broadcast %981 : vector<2x1xf32> to vector<2x128xf32>
    %988 = arith.divf %979, %987 : vector<2x128xf32>
    %989 = arith.mulf %988, %986 : vector<2x128xf32>
    %cst_300 = arith.constant 0.000000e+00 : f32
    %990 = vector.broadcast %cst_300 : f32 to vector<2x128xf32>
    %991 = arith.select %957, %989, %990 : vector<2x128xi1>, vector<2x128xf32>
    %cst_301 = arith.constant dense<0.000000e+00> : vector<2xf32>
    %992 = vector.multi_reduction <add>, %991, %cst_301 [1] : vector<2x128xf32> to vector<2xf32>
    %993 = vector.shape_cast %992 : vector<2xf32> to vector<2x1xf32>
    %cst_302 = arith.constant 0.000000e+00 : f32
    %994 = vector.broadcast %cst_302 : f32 to vector<2x1xf32>
    %995 = arith.subf %994, %993 : vector<2x1xf32>
    %996 = vector.broadcast %974 : vector<2x1xi32> to vector<2x128xi32>
    %997 = arith.cmpi eq, %0, %996 : vector<2x128xi32>
    %cst_303 = arith.constant 0.000000e+00 : f32
    %998 = vector.broadcast %cst_303 : f32 to vector<2x128xf32>
    %999 = arith.select %997, %986, %998 : vector<2x128xi1>, vector<2x128xf32>
    %cst_304 = arith.constant dense<0.000000e+00> : vector<2xf32>
    %1000 = vector.multi_reduction <add>, %999, %cst_304 [1] : vector<2x128xf32> to vector<2xf32>
    %1001 = vector.shape_cast %1000 : vector<2xf32> to vector<2x1xf32>
    %c0_i32_305 = arith.constant 0 : i32
    %1002 = vector.broadcast %c0_i32_305 : i32 to vector<2x1xi32>
    %1003 = arith.cmpi ne, %68, %1002 : vector<2x1xi32>
    %1004 = arith.extui %1003 : vector<2x1xi1> to vector<2x1xi32>
    %1005 = arith.sitofp %1004 : vector<2x1xi32> to vector<2x1xf32>
    %cst_306 = arith.constant 1.000000e+00 : f32
    %1006 = vector.broadcast %cst_306 : f32 to vector<2x1xf32>
    %1007 = arith.mulf %1006, %1005 : vector<2x1xf32>
    %c0_i32_307 = arith.constant 0 : i32
    %1008 = vector.broadcast %c0_i32_307 : i32 to vector<2x1xi32>
    %1009 = arith.cmpi ne, %322, %1008 : vector<2x1xi32>
    %1010 = arith.extui %1009 : vector<2x1xi1> to vector<2x1xi32>
    %1011 = arith.sitofp %1010 : vector<2x1xi32> to vector<2x1xf32>
    %1012 = arith.mulf %1007, %1011 : vector<2x1xf32>
    %c0_i32_308 = arith.constant 0 : i32
    %1013 = vector.broadcast %c0_i32_308 : i32 to vector<2x1xi32>
    %1014 = arith.cmpi ne, %691, %1013 : vector<2x1xi32>
    %1015 = arith.extui %1014 : vector<2x1xi1> to vector<2x1xi32>
    %1016 = arith.sitofp %1015 : vector<2x1xi32> to vector<2x1xf32>
    %1017 = arith.mulf %1012, %1016 : vector<2x1xf32>
    %1018 = arith.mulf %1017, %1001 : vector<2x1xf32>
    %1019 = arith.addf %923, %1018 : vector<2x1xf32>
    %1020 = arith.mulf %1017, %995 : vector<2x1xf32>
    %1021 = arith.addf %925, %1020 : vector<2x1xf32>
    %1022 = tpu.concatenate %68, %150, %236, %322, %408, %499, %595, %691, %782, %878, %974 in 1 : vector<2x1xi32>, vector<2x1xi32>, vector<2x1xi32>, vector<2x1xi32>, vector<2x1xi32>, vector<2x1xi32>, vector<2x1xi32>, vector<2x1xi32>, vector<2x1xi32>, vector<2x1xi32>, vector<2x1xi32> -> vector<2x11xi32>
    %c0_309 = arith.constant 0 : index
    %c0_310 = arith.constant 0 : index
    %1023 = vector.load %arg9[%c0_309, %c0_310] : memref<2x11xi32, #tpu.memory_space<vmem>>, vector<2x11xi32>
    tpu.vector_store %arg9[%c0_309, %c0_310], %1022 {strides = array<i32>} : memref<2x11xi32, #tpu.memory_space<vmem>>, vector<2x11xi32>,
    %c0_311 = arith.constant 0 : index
    %c0_312 = arith.constant 0 : index
    %1024 = vector.load %arg10[%c0_311, %c0_312] : memref<2x1xf32, #tpu.memory_space<vmem>>, vector<2x1xf32>
    tpu.vector_store %arg10[%c0_311, %c0_312], %1019 {strides = array<i32>} : memref<2x1xf32, #tpu.memory_space<vmem>>, vector<2x1xf32>,
    %c0_313 = arith.constant 0 : index
    %c0_314 = arith.constant 0 : index
    %1025 = vector.load %arg11[%c0_313, %c0_314] : memref<2x1xf32, #tpu.memory_space<vmem>>, vector<2x1xf32>
    tpu.vector_store %arg11[%c0_313, %c0_314], %1021 {strides = array<i32>} : memref<2x1xf32, #tpu.memory_space<vmem>>, vector<2x1xf32>,
    return
  }
}

</mosaic_0001>

<bundles_post_ra>
// kernel: controller_forward.1
= control target key start
LH: loop header
LB: loop body
LE: loop exit
PB: predicated region body
PF: predicated region fallthrough
CT: control target
= control target key end

     0   :  { %v4170_v3 = vmov 0.0|0.0   ;;  %vm4171_vm0 = vmmov 0   ;;  %v4172_v6 = vmov 0.0   ;;  %s5385_s0 = inlined_call_operand.vmem [shape: f32[2,64], index: 0, kind: input, shape index: {}]   ;;  %s5386_s1 = inlined_call_operand.vmem [shape: f32[64,32], index: 1, kind: input, shape index: {}]   ;;  %s5387_s2 = inlined_call_operand.vmem [shape: f32[1,32], index: 2, kind: input, shape index: {}]   ;;  %s5388_s3 = inlined_call_operand.vmem [shape: f32[32,128], index: 3, kind: input, shape index: {}]   ;;  %s5389_s4 = inlined_call_operand.vmem [shape: f32[128,128], index: 4, kind: input, shape index: {}]   ;;  %s5390_s5 = inlined_call_operand.vmem [shape: f32[1,128], index: 5, kind: input, shape index: {}]   ;;  %s5391_s6 = inlined_call_operand.vmem [shape: f32[11,32,128], index: 6, kind: input, shape index: {}]   ;;  %s5392_s7 = inlined_call_operand.vmem [shape: f32[11,1,128], index: 7, kind: input, shape index: {}]   ;;  %s5393_s8 = inlined_call_operand.vmem [shape: f32[11,2,128], index: 8, kind: input, shape index: {}]   ;;  %s5394_s9 = inlined_call_operand.hbm [shape: s32[2,11], index: 9, kind: output, shape index: {0}]   ;;  %s5395_s10 = inlined_call_operand.vmem [shape: f32[2,1], index: 10, kind: output, shape index: {1}]   ;;  %s5396_s11 = inlined_call_operand.vmem [shape: f32[2,1], index: 11, kind: output, shape index: {2}]  }
   0x1   :  { %v61_v0 = vld [vmem:[%s5386_s1] sm:$0xff]  ;;  %v62_v1 = vld [vmem:[%s5386_s1 + $0x8] sm:$0xff]  ;;  %v63_v2 = vld [vmem:[%s5386_s1 + $0x10] sm:$0xff]  ;;  %3702 = vmatprep.subr.bf16.mxu0 %v4170_v3  ;;  %3217 = vmatprep.mubr.msk.f32.mxu0 %vm4171_vm0, %v4172_v6 }
   0x2   :  { %v3703_v4 = vpack.c.bf16 %v62_v1, %v61_v0  ;;  %v64_v5 = vld [vmem:[%s5386_s1 + $0x18] sm:$0xff]  ;;  %3714 = vmatprep.subr.bf16.mxu1 %v4170_v3  ;;  %3228 = vmatprep.mubr.msk.f32.mxu1 %vm4171_vm0, %v4172_v6 }
   0x3   :  { %v3706_v7 = vpack.c.bf16 %v64_v5, %v63_v2 }
   0x4   :  { %3704 = vmatpush3.bf16.msra.mxu0 %v3703_v4 }
   0x5   :  { %17 = vsyncpa [#allocation3], 0  ;;  %3705 = vmatprep.subr.bf16.mxu0 %v4170_v3  ;;  %v65_v8 = vld [vmem:[%s5386_s1 + $0x20] sm:$0xff]  ;;  %v66_v9 = vld [vmem:[%s5386_s1 + $0x28] sm:$0xff]  ;;  %vm76_vm1 = vcmask 523264   ;;  %vm161_vm2 = vcmask 261120   ;;  %v36_v26 = vlaneseq }
   0x6   :  { %v3709_v10 = vpack.c.bf16 %v66_v9, %v65_v8  ;;  %v67_v11 = vld [vmem:[%s5386_s1 + $0x30] sm:$0xff]  ;;  %v68_v12 = vld [vmem:[%s5386_s1 + $0x38] sm:$0xff]  ;;  %v60_v14 = vld [vmem:[%s5385_s0] sm:$0x3]  ;;  %v4173_v29 = vmov 0.5   ;;  %s4174_s24 = smov 64  }
   0x7   :  { %v3712_v13 = vpack.c.bf16 %v68_v12, %v67_v11  ;;  %v151_v15 = vld [vmem:[%s5388_s3] sm:$0xff]  ;;  %v152_v16 = vld [vmem:[%s5388_s3 + $0x8] sm:$0xff]  ;;  %v153_v17 = vld [vmem:[%s5388_s3 + $0x10] sm:$0xff]  ;;  %v4296_v27 = vand.u32 127, %v36_v26  ;;  %s4175_s25 = smov 32   ;;  %vm347_vm7 = vcmask 1041408  }
   0x8   :  { %3707 = vmatpush3.bf16.msra.mxu0 %v3706_v7  ;;  %v3715_v18 = vpack.c.bf16 %v152_v16, %v151_v15  ;;  %v154_v19 = vld [vmem:[%s5388_s3 + $0x18] sm:$0xff]  ;;  %v2862_v21 = vld [vmem:[%s5387_s2] ss:$0 sm:$0xff]  ;;  %v257_v45 = vld [vmem:[%s5391_s6 + $0x8] sm:$0xff]  ;;  %vm399_vm11 = vcmask 785408  }
   0x9   :  { %3708 = vmatprep.subr.bf16.mxu0 %v4170_v3  ;;  %v3718_v20 = vpack.c.bf16 %v154_v19, %v153_v17  ;;  %vm38_vm3 = vcmp.ge.s32.totalorder %v4296_v27, 64  ;;  %vm39_vm4 = vcmp.lt.s32.totalorder %v4296_v27, 96  ;;  %v4303_v28 = vld [vmem:[%s5390_s5] ss:$0 sm:$0xff]  ;;  %v258_v46 = vld [vmem:[%s5391_s6 + $0x10] sm:$0xff]  ;;  %v259_v48 = vld [vmem:[%s5391_s6 + $0x18] sm:$0xff] }
   0xa   :  { %3716 = vmatpush3.bf16.msra.mxu1 %v3715_v18  ;;  %vm40_vm5 = vmand %vm38_vm3, %vm39_vm4  ;;  %v256_v44 = vld [vmem:[%s5391_s6] sm:$0xff]  ;;  %v3724_v49 = vpack.c.bf16 %v259_v48, %v258_v46  ;;  %vm342_vm6 = vcmp.lt.s32.totalorder %v4296_v27, 2  ;;  %v44_v7 = vld [vmem:[%s5389_s4 + $0x8] sm:$0xff]  ;;  %vm580_vm13 = vcmp.lt.s32.totalorder %v4296_v27, 12  ;;  %vm824_vm4 = vcmp.lt.s32.totalorder %v4296_v27, 3 }
   0xb   :  { %3717 = vmatprep.subr.bf16.mxu1 %v4170_v3  ;;  %v4305_v30 = vsel %vm40_vm5, 1.0, %v4173_v29  ;;  %v4309_v36 = vsel %vm40_vm5, 0.0, %v4173_v29  ;;  %v3721_v47 = vpack.c.bf16 %v257_v45, %v256_v44  ;;  %v2866_v54 = vld [vmem:[%s5392_s7] ss:$0 sm:$0xff]  ;;  %v45_v8 = vld [vmem:[%s5389_s4 + $0x10] sm:$0xff]  ;;  %v50_v16 = vld [vmem:[%s5389_s4 + $0x38] sm:$0xff] }
   0xc   :  { %3710 = vmatpush3.bf16.msra.mxu0 %v3709_v10  ;;  %v344_v58 = vld [vmem:[%s5393_s8] sm:$0x3]  ;;  %v46_v10 = vld [vmem:[%s5389_s4 + $0x18] sm:$0xff]  ;;  %v49_v15 = vld [vmem:[%s5389_s4 + $0x30] sm:$0xff] }
   0xd   :  { %3711 = vmatprep.subr.bf16.mxu0 %v4170_v3  ;;  %v43_v5 = vld [vmem:[%s5389_s4] sm:$0xff]  ;;  %v4372_v11 = vpack.c.bf16 %v46_v10, %v45_v8  ;;  %v4392_v17 = vpack.c.bf16 %v50_v16, %v49_v15  ;;  %v52_v19 = vld [vmem:[%s5389_s4 + $0x48] sm:$0xff] }
   0xe   :  { %3719 = vmatpush3.bf16.msra.mxu1 %v3718_v20  ;;  %v4366_v9 = vpack.c.bf16 %v44_v7, %v43_v5  ;;  %v47_v12 = vld [vmem:[%s5389_s4 + $0x20] sm:$0xff] }
   0xf   :  { %3720 = vmatprep.subr.bf16.mxu1 %v4170_v3  ;;  %v51_v18 = vld [vmem:[%s5389_s4 + $0x40] sm:$0xff] }
  0x10   :  { %3713 = vmatpush3.bf16.msra.mxu0 %v3712_v13  ;;  %v48_v13 = vld [vmem:[%s5389_s4 + $0x28] sm:$0xff]  ;;  %v4402_v20 = vpack.c.bf16 %v52_v19, %v51_v18  ;;  %v2874_v7 = vld [vmem:[%s5392_s7 + $0x1] ss:$0 sm:$0xff] }
  0x11   :  { %3726 = vmatprep.subr.bf16.mxu0 %v4170_v3 }
  0x13   :  { %3218 = vmatmul.mubr.msk.f32.vlgmr.msra.gmra.mrb[0].mxu0 %vm76_vm1, %v60_v14  ;;  %v4382_v14 = vpack.c.bf16 %v48_v13, %v47_v12  ;;  %v2876_v13 = vld [vmem:[%s5393_s8 + $0x2] sm:$0x3] }
  0x14   :  { %3274 = vmatprep.mubr.msk.f32.mxu0 %vm4171_vm0, %v4172_v6  ;;  %3728 = vmatpush3.bf16.msra.mxu0 %v4366_v9 }
  0x15   :  { %3729 = vmatprep.subr.bf16.mxu0 %v4170_v3 }
  0x18   :  { %3731 = vmatpush3.bf16.msra.mxu0 %v4372_v11 }
  0x19   :  { %3732 = vmatprep.subr.bf16.mxu0 %v4170_v3 }
  0x1c   :  { %3734 = vmatpush3.bf16.msra.mxu0 %v4382_v14 }
  0x1d   :  { %3735 = vmatprep.subr.bf16.mxu0 %v4170_v3 }
  0x20   :  { %3737 = vmatpush3.bf16.msra.mxu0 %v4392_v17 }
  0x21   :  { %3738 = vmatprep.subr.bf16.mxu0 %v4170_v3 }
  0x24   :  { %3740 = vmatpush3.bf16.msra.mxu0 %v4402_v20 }
  0x25   :  { %3741 = vmatprep.subr.bf16.mxu0 %v4170_v3 }
  0xe6   :  { %v146_v22 = vpop.f32.mrb[0].mxu0 }
  0xe7   :  { %v147_v23 = vadd.f32 %v2862_v21, %v146_v22  ;;  %v3219_v24 = vpop.f32.mrb[1].mxu0  ;;  %v53_v21 = vld [vmem:[%s5389_s4 + $0x50] sm:$0xff]  ;;  %v54_v22 = vld [vmem:[%s5389_s4 + $0x58] sm:$0xff] }
  0xe9   :  { %4033 = vtanh.f32 %v147_v23  ;;  %v4412_v23 = vpack.c.bf16 %v54_v22, %v53_v21 }
  0xeb   :  { %3743 = vmatpush3.bf16.msra.mxu0 %v4412_v23 }
  0xec   :  { %3744 = vmatprep.subr.bf16.mxu0 %v4170_v3 }
  0xf3   :  { %v4034_v25 = vpop.eup %4033 }
  0xf4   :  { %3229 = vmatmul.mubr.msk.f32.vlgmr.msra.gmra.mrb[0].mxu1 %vm161_vm2, %v4034_v25 }
  0xf5   :  { %3239 = vmatprep.mubr.msk.f32.mxu1 %vm4171_vm0, %v4172_v6  ;;  %3722 = vmatpush3.bf16.msra.mxu1 %v3721_v47 }
  0xf6   :  { %3723 = vmatprep.subr.bf16.mxu1 %v4170_v3 }
  0xf9   :  { %3725 = vmatpush3.bf16.msra.mxu1 %v3724_v49 }
  0xfa   :  { %3750 = vmatprep.subr.bf16.mxu1 %v4170_v3 }
 0x1c7   :  { %v231_v31 = vpop.f32.mrb[0].mxu1 }
 0x1c8   :  { %v232_v32 = vadd.f32 %v4303_v28, %v231_v31  ;;  %v3230_v33 = vpop.f32.mrb[1].mxu1  ;;  %v55_v31 = vld [vmem:[%s5389_s4 + $0x60] sm:$0xff] }
 0x1ca   :  { %v235_v34 = vmul.f32 %v232_v32, %v4305_v30  ;;  %v56_v32 = vld [vmem:[%s5389_s4 + $0x68] sm:$0xff] }
 0x1cb   :  { %v4423_v33 = vpack.c.bf16 %v56_v32, %v55_v31 }
 0x1cc   :  { %4035 = vtanh.f32 %v235_v34  ;;  %v57_v34 = vld [vmem:[%s5389_s4 + $0x70] sm:$0xff] }
 0x1cd   :  { %3746 = vmatpush3.bf16.msra.mxu0 %v4423_v33 }
 0x1ce   :  { %3747 = vmatprep.subr.bf16.mxu0 %v4170_v3 }
 0x1d6   :  { %v4036_v35 = vpop.eup %4035 }
 0x1d7   :  { %v237_v37 = vmul.f32 %v4036_v35, %v4305_v30  ;;  %v58_v35 = vld [vmem:[%s5389_s4 + $0x78] sm:$0xff] }
 0x1d9   :  { %v238_v38 = vadd.f32 %v237_v37, %v4309_v36  ;;  %v4433_v37 = vpack.c.bf16 %v58_v35, %v57_v34 }
 0x1db   :  { %241 = vrot.lane.b32.xlu0 %v238_v38, %s4174_s24  ;;  %v239_v41 = vmul.f32 0.0, %v238_v38  ;;  %3749 = vmatpush3.bf16.msra.mxu0 %v4433_v37 }
 0x1dc   :  { %3780 = vmatprep.subr.bf16.mxu0 %v4170_v3 }
 0x24d   :  { %v242_v39 = vpop.permute.xlu0 %241 }
 0x24e   :  { %v244_v40 = vmul.f32 %v242_v39, %v238_v38 }
 0x250   :  { %246 = vrot.lane.b32.xlu0 %v244_v40, %s4175_s25 }
 0x2c2   :  { %v247_v42 = vpop.permute.xlu0 %246 }
 0x2c3   :  { %v4315_v43 = vadd.f32 %v247_v42, %v239_v41 }
 0x2c5   :  { %4037 = vtanh.f32 %v4315_v43 }
 0x2cf   :  { %v4038_v50 = vpop.eup %4037 }
 0x2d0   :  { %252 = vrot.lane.b32.xlu1 %v4038_v50, %s4174_s24 }
 0x342   :  { %v253_v51 = vpop.permute.xlu1 %252 }
 0x343   :  { %v4333_v52 = vmul.f32 %v253_v51, %v238_v38 }
 0x345   :  { %268 = vrot.lane.b32.xlu1 %v4333_v52, %s4175_s25 }
 0x3b7   :  { %v269_v53 = vpop.permute.xlu1 %268 }
 0x3b8   :  { %3240 = vmatmul.mubr.msk.f32.vlgmr.msra.gmra.mrb[2].mxu1 %vm161_vm2, %v269_v53 }
 0x3b9   :  { %3285 = vmatprep.mubr.msk.f32.mxu1 %vm4171_vm0, %v4172_v6 }
 0x48b   :  { %v338_v55 = vpop.f32.mrb[2].mxu1 }
 0x48c   :  { %v339_v56 = vadd.f32 %v2866_v54, %v338_v55  ;;  %v3241_v57 = vpop.f32.mrb[3].mxu1 }
 0x48e   :  { %v4349_v59 = vsel %vm342_vm6, %v339_v56, -1e+30 }
 0x48f   :  { %v345_v60 = vadd.f32 %v344_v58, %v4349_v59 }
 0x491   :  { %v346_v61 = vsel %vm342_vm6, %v345_v60, -1e+30  ;;  %v2869_v60 = vld [vmem:[%s5391_s6 + $0x20] sm:$0xff] }
 0x492   :  { %v348_v62 = vsel %vm347_vm7, %v346_v61, -inf }
 0x493   :  { %349 = vmax.xlane.f32.xlu0 %v348_v62  ;;  %v2871_v62 = vld [vmem:[%s5391_s6 + $0x30] sm:$0xff] }
 0x520   :  { %v350_v63 = vpop.xlane.xlu0 %349 }
 0x521   :  { %vm351_vm8 = vcmp.ge.f32.partialorder %v346_v61, %v350_v63  ;;  %v2870_v61 = vld [vmem:[%s5391_s6 + $0x28] sm:$0xff] }
 0x522   :  { %v352_v0 = vsel %vm351_vm8, %v4296_v27, 128  ;;  %v3751_v63 = vpack.c.bf16 %v2870_v61, %v2869_v60 }
 0x523   :  { %v353_v1 = vsel %vm347_vm7, %v352_v0, 2147483647 }
 0x524   :  { %v355_v2 = vshra.s32 %v353_v1, 16  ;;  %v354_v24 = vand.u32 65535, %v353_v1  ;;  %3752 = vmatpush3.bf16.msra.mxu1 %v3751_v63  ;;  %v2880_v63 = vld [vmem:[%s5391_s6 + $0x48] sm:$0xff] }
 0x525   :  { %3753 = vmatprep.subr.bf16.mxu1 %v4170_v3 }
 0x526   :  { %v357_v4 = vcvt.s32.f32 %v355_v2  ;;  %v356_v26 = vcvt.s32.f32 %v354_v24 }
 0x528   :  { %358 = vmin.xlane.f32.xlu1 %v357_v4 }
 0x5b5   :  { %v359_v25 = vpop.xlane.xlu1 %358 }
 0x5b6   :  { %vm360_vm9 = vcmp.eq.f32.partialorder %v357_v4, %v359_v25  ;;  %v365_v38 = vcvt.f32.s32 %v359_v25 }
 0x5b7   :  { %v361_v29 = vsel %vm360_vm9, %v356_v26, inf  ;;  %vm2815_vm9 = vcmask 7168  }
 0x5b8   :  { %362 = vmin.xlane.f32.xlu0 %v361_v29  ;;  %v366_v40 = vshll.u32 %v365_v38, 16 }
 0x645   :  { %v363_v39 = vpop.xlane.xlu0 %362 }
 0x646   :  { %v364_v41 = vcvt.f32.s32 %v363_v39 }
 0x648   :  { %v367_v42 = vadd.s32 %v366_v40, %v364_v41 }
 0x64a   :  { %vm368_vm10 = vcmp.lt.s32.totalorder %v367_v42, 1 }
 0x64b   :  { %v4437_v44 = vsel %vm368_vm10, %v367_v42, 1  ;;  %vm2817_vm10 = vcmask 15360  }
 0x64c   :  { %vm390_vm12 = vcmp.eq.s32.totalorder %v4296_v27, %v4437_v44 }
 0x64d   :  { %v2868_v45 = vsel %vm390_vm12, 1.0, %v4172_v6 }
 0x64e   :  { %v400_v46 = vsel %vm399_vm11, %v2868_v45, %v4333_v52 }
 0x64f   :  { %3275 = vmatmul.mubr.f32.vlgmr.msra.gmra.mrb[2].mxu0 %v400_v46 }
 0x650   :  { %3331 = vmatprep.mubr.msk.f32.mxu0 %vm4171_vm0, %v4172_v6 }
 0x722   :  { %v467_v47 = vpop.f32.mrb[2].mxu0 }
 0x723   :  { %v468_v48 = vadd.f32 %v4303_v28, %v467_v47  ;;  %v3276_v49 = vpop.f32.mrb[3].mxu0 }
 0x725   :  { %v471_v50 = vmul.f32 %v468_v48, %v4305_v30 }
 0x727   :  { %4039 = vtanh.f32 %v471_v50 }
 0x731   :  { %v4040_v51 = vpop.eup %4039 }
 0x732   :  { %v473_v53 = vmul.f32 %v4040_v51, %v4305_v30 }
 0x734   :  { %v474_v54 = vadd.f32 %v473_v53, %v4309_v36 }
 0x736   :  { %477 = vrot.lane.b32.xlu0 %v474_v54, %s4174_s24  ;;  %v475_v56 = vmul.f32 %v474_v54, %v4315_v43  ;;  %v2872_v43 = vld [vmem:[%s5391_s6 + $0x38] sm:$0xff] }
 0x737   :  { %v3754_v0 = vpack.c.bf16 %v2872_v43, %v2871_v62  ;;  %v2879_v62 = vld [vmem:[%s5391_s6 + $0x40] sm:$0xff]  ;;  %v2881_v43 = vld [vmem:[%s5391_s6 + $0x50] sm:$0xff] }
 0x739   :  { %3755 = vmatpush3.bf16.msra.mxu1 %v3754_v0  ;;  %v3781_v0 = vpack.c.bf16 %v2880_v63, %v2879_v62 }
 0x73a   :  { %3756 = vmatprep.subr.bf16.mxu1 %v4170_v3 }
 0x73b   :  { %3782 = vmatpush3.bf16.msra.mxu0 %v3781_v0 }
 0x73c   :  { %3783 = vmatprep.subr.bf16.mxu0 %v4170_v3 }
 0x7a8   :  { %v478_v55 = vpop.permute.xlu0 %477 }
 0x7a9   :  { %v480_v52 = vmul.f32 %v478_v55, %v474_v54 }
 0x7ab   :  { %482 = vrot.lane.b32.xlu1 %v480_v52, %s4175_s25 }
 0x81d   :  { %v483_v57 = vpop.permute.xlu1 %482 }
 0x81e   :  { %v4456_v58 = vadd.f32 %v483_v57, %v475_v56 }
 0x820   :  { %4041 = vtanh.f32 %v4456_v58 }
 0x82a   :  { %v4042_v1 = vpop.eup %4041 }
 0x82b   :  { %488 = vrot.lane.b32.xlu1 %v4042_v1, %s4174_s24 }
 0x89d   :  { %v489_v2 = vpop.permute.xlu1 %488 }
 0x89e   :  { %v491_v4 = vmul.f32 %v489_v2, %v474_v54 }
 0x8a0   :  { %506 = vrot.lane.b32.xlu0 %v491_v4, %s4175_s25 }
 0x912   :  { %v507_v5 = vpop.permute.xlu0 %506 }
 0x913   :  { %3286 = vmatmul.mubr.msk.f32.vlgmr.msra.gmra.mrb[4].mxu1 %vm161_vm2, %v507_v5 }
 0x914   :  { %3758 = vmatpush3.bf16.msra.mxu1 %v4366_v9  ;;  %3320 = vmatprep.mubr.msk.f32.mxu1 %vm4171_vm0, %v4172_v6 }
 0x915   :  { %3759 = vmatprep.subr.bf16.mxu1 %v4170_v3 }
 0x918   :  { %3761 = vmatpush3.bf16.msra.mxu1 %v4372_v11 }
 0x919   :  { %3762 = vmatprep.subr.bf16.mxu1 %v4170_v3 }
 0x91c   :  { %3764 = vmatpush3.bf16.msra.mxu1 %v4382_v14 }
 0x91d   :  { %3765 = vmatprep.subr.bf16.mxu1 %v4170_v3 }
 0x920   :  { %3767 = vmatpush3.bf16.msra.mxu1 %v4392_v17 }
 0x921   :  { %3768 = vmatprep.subr.bf16.mxu1 %v4170_v3 }
 0x924   :  { %3770 = vmatpush3.bf16.msra.mxu1 %v4402_v20 }
 0x925   :  { %3771 = vmatprep.subr.bf16.mxu1 %v4170_v3 }
 0x928   :  { %3773 = vmatpush3.bf16.msra.mxu1 %v4412_v23 }
 0x929   :  { %3774 = vmatprep.subr.bf16.mxu1 %v4170_v3 }
 0x92c   :  { %3776 = vmatpush3.bf16.msra.mxu1 %v4423_v33 }
 0x92d   :  { %3777 = vmatprep.subr.bf16.mxu1 %v4170_v3 }
 0x930   :  { %3779 = vmatpush3.bf16.msra.mxu1 %v4433_v37 }
 0x931   :  { %3810 = vmatprep.subr.bf16.mxu1 %v4170_v3 }
 0x9e6   :  { %v576_v8 = vpop.f32.mrb[4].mxu1 }
 0x9e7   :  { %v577_v10 = vadd.f32 %v2874_v7, %v576_v8  ;;  %v3287_v12 = vpop.f32.mrb[5].mxu1  ;;  %v2884_v8 = vld [vmem:[%s5392_s7 + $0x2] ss:$0 sm:$0xff] }
 0x9e9   :  { %v4503_v15 = vsel %vm580_vm13, %v577_v10, -1e+30 }
 0x9ea   :  { %v584_v16 = vadd.f32 %v2876_v13, %v4503_v15 }
 0x9ec   :  { %v585_v18 = vsel %vm580_vm13, %v584_v16, -1e+30  ;;  %v2886_v16 = vld [vmem:[%s5393_s8 + $0x4] sm:$0x3] }
 0x9ed   :  { %v586_v19 = vsel %vm347_vm7, %v585_v18, -inf }
 0x9ee   :  { %587 = vmax.xlane.f32.xlu1 %v586_v19 }
 0xa7b   :  { %v588_v21 = vpop.xlane.xlu1 %587 }
 0xa7c   :  { %vm589_vm14 = vcmp.ge.f32.partialorder %v585_v18, %v588_v21 }
 0xa7d   :  { %v590_v22 = vsel %vm589_vm14, %v4296_v27, 128 }
 0xa7e   :  { %v591_v24 = vsel %vm347_vm7, %v590_v22, 2147483647 }
 0xa7f   :  { %v593_v25 = vshra.s32 %v591_v24, 16  ;;  %v592_v29 = vand.u32 65535, %v591_v24 }
 0xa81   :  { %v595_v26 = vcvt.s32.f32 %v593_v25  ;;  %v594_v32 = vcvt.s32.f32 %v592_v29 }
 0xa83   :  { %596 = vmin.xlane.f32.xlu0 %v595_v26 }
 0xb10   :  { %v597_v31 = vpop.xlane.xlu0 %596 }
 0xb11   :  { %vm598_vm15 = vcmp.eq.f32.partialorder %v595_v26, %v597_v31  ;;  %v603_v35 = vcvt.f32.s32 %v597_v31 }
 0xb12   :  { %v599_v34 = vsel %vm598_vm15, %v594_v32, inf }
 0xb13   :  { %600 = vmin.xlane.f32.xlu0 %v599_v34  ;;  %v604_v39 = vshll.u32 %v603_v35, 16 }
 0xba0   :  { %v601_v38 = vpop.xlane.xlu0 %600 }
 0xba1   :  { %v602_v40 = vcvt.f32.s32 %v601_v38 }
 0xba3   :  { %v605_v41 = vadd.s32 %v604_v39, %v602_v40 }
 0xba5   :  { %vm606_vm1 = vcmp.lt.s32.totalorder %v605_v41, 11 }
 0xba6   :  { %v4511_v42 = vsel %vm606_vm1, %v605_v41, 11 }
 0xba7   :  { %v640_v45 = vadd.s32 2, %v4511_v42 }
 0xba9   :  { %vm641_vm3 = vcmp.eq.s32.totalorder %v4296_v27, %v640_v45 }
 0xbaa   :  { %v2878_v46 = vsel %vm641_vm3, 1.0, %v4172_v6 }
 0xbab   :  { %v644_v47 = vsel %vm399_vm11, %v2878_v46, %v491_v4 }
 0xbac   :  { %3321 = vmatmul.mubr.f32.vlgmr.msra.gmra.mrb[6].mxu1 %v644_v47  ;;  %v2816_v47 = vsel %vm2815_vm9, %v4437_v44, %v4511_v42 }
 0xbad   :  { %3377 = vmatprep.mubr.msk.f32.mxu1 %vm4171_vm0, %v4172_v6 }
 0xc7f   :  { %v711_v48 = vpop.f32.mrb[6].mxu1 }
 0xc80   :  { %v712_v49 = vadd.f32 %v4303_v28, %v711_v48  ;;  %v3322_v50 = vpop.f32.mrb[7].mxu1 }
 0xc82   :  { %v715_v51 = vmul.f32 %v712_v49, %v4305_v30 }
 0xc84   :  { %4043 = vtanh.f32 %v715_v51 }
 0xc8e   :  { %v4044_v53 = vpop.eup %4043 }
 0xc8f   :  { %v717_v54 = vmul.f32 %v4044_v53, %v4305_v30 }
 0xc91   :  { %v718_v55 = vadd.f32 %v717_v54, %v4309_v36 }
 0xc93   :  { %721 = vrot.lane.b32.xlu1 %v718_v55, %s4174_s24  ;;  %v719_v57 = vmul.f32 %v718_v55, %v4456_v58  ;;  %v2882_v58 = vld [vmem:[%s5391_s6 + $0x58] sm:$0xff] }
 0xc94   :  { %v3784_v1 = vpack.c.bf16 %v2882_v58, %v2881_v43 }
 0xc96   :  { %3785 = vmatpush3.bf16.msra.mxu0 %v3784_v1 }
 0xc97   :  { %3786 = vmatprep.subr.bf16.mxu0 %v4170_v3 }
 0xd05   :  { %v722_v52 = vpop.permute.xlu1 %721 }
 0xd06   :  { %v724_v56 = vmul.f32 %v722_v52, %v718_v55 }
 0xd08   :  { %726 = vrot.lane.b32.xlu0 %v724_v56, %s4175_s25 }
 0xd7a   :  { %v727_v60 = vpop.permute.xlu0 %726 }
 0xd7b   :  { %v4526_v61 = vadd.f32 %v727_v60, %v719_v57 }
 0xd7d   :  { %4045 = vtanh.f32 %v4526_v61 }
 0xd87   :  { %v4046_v2 = vpop.eup %4045 }
 0xd88   :  { %732 = vrot.lane.b32.xlu1 %v4046_v2, %s4174_s24  ;;  %v2888_v2 = vld [vmem:[%s5391_s6 + $0x60] sm:$0xff] }
 0xdfa   :  { %v733_v4 = vpop.permute.xlu1 %732 }
 0xdfb   :  { %v735_v5 = vmul.f32 %v733_v4, %v718_v55  ;;  %v2889_v4 = vld [vmem:[%s5391_s6 + $0x68] sm:$0xff] }
 0xdfd   :  { %750 = vrot.lane.b32.xlu1 %v735_v5, %s4175_s25 }
 0xe6f   :  { %v751_v7 = vpop.permute.xlu1 %750 }
 0xe70   :  { %3332 = vmatmul.mubr.msk.f32.vlgmr.msra.gmra.mrb[4].mxu0 %vm161_vm2, %v751_v7  ;;  %v3811_v7 = vpack.c.bf16 %v2889_v4, %v2888_v2 }
 0xe71   :  { %3788 = vmatpush3.bf16.msra.mxu0 %v4366_v9  ;;  %3366 = vmatprep.mubr.msk.f32.mxu0 %vm4171_vm0, %v4172_v6 }
 0xe72   :  { %3789 = vmatprep.subr.bf16.mxu0 %v4170_v3  ;;  %3812 = vmatpush3.bf16.msra.mxu1 %v3811_v7 }
 0xe73   :  { %3813 = vmatprep.subr.bf16.mxu1 %v4170_v3 }
 0xe75   :  { %3791 = vmatpush3.bf16.msra.mxu0 %v4372_v11 }
 0xe76   :  { %3792 = vmatprep.subr.bf16.mxu0 %v4170_v3 }
 0xe79   :  { %3794 = vmatpush3.bf16.msra.mxu0 %v4382_v14 }
 0xe7a   :  { %3795 = vmatprep.subr.bf16.mxu0 %v4170_v3 }
 0xe7d   :  { %3797 = vmatpush3.bf16.msra.mxu0 %v4392_v17 }
 0xe7e   :  { %3798 = vmatprep.subr.bf16.mxu0 %v4170_v3 }
 0xe81   :  { %3800 = vmatpush3.bf16.msra.mxu0 %v4402_v20 }
 0xe82   :  { %3801 = vmatprep.subr.bf16.mxu0 %v4170_v3 }
 0xe85   :  { %3803 = vmatpush3.bf16.msra.mxu0 %v4412_v23 }
 0xe86   :  { %3804 = vmatprep.subr.bf16.mxu0 %v4170_v3 }
 0xe89   :  { %3806 = vmatpush3.bf16.msra.mxu0 %v4423_v33 }
 0xe8a   :  { %3807 = vmatprep.subr.bf16.mxu0 %v4170_v3 }
 0xe8d   :  { %3809 = vmatpush3.bf16.msra.mxu0 %v4433_v37 }
 0xe8e   :  { %3840 = vmatprep.subr.bf16.mxu0 %v4170_v3 }
 0xf43   :  { %v820_v10 = vpop.f32.mrb[4].mxu0 }
 0xf44   :  { %v821_v12 = vadd.f32 %v2884_v8, %v820_v10  ;;  %v3333_v13 = vpop.f32.mrb[5].mxu0 }
 0xf46   :  { %v4573_v18 = vsel %vm824_vm4, %v821_v12, -1e+30 }
 0xf47   :  { %v828_v19 = vadd.f32 %v2886_v16, %v4573_v18 }
 0xf49   :  { %v829_v21 = vsel %vm824_vm4, %v828_v19, -1e+30  ;;  %v2893_v19 = vld [vmem:[%s5392_s7 + $0x3] ss:$0 sm:$0xff] }
 0xf4a   :  { %v830_v22 = vsel %vm347_vm7, %v829_v21, -inf }
 0xf4b   :  { %831 = vmax.xlane.f32.xlu0 %v830_v22 }
 0xfd8   :  { %v832_v24 = vpop.xlane.xlu0 %831 }
 0xfd9   :  { %vm833_vm5 = vcmp.ge.f32.partialorder %v829_v21, %v832_v24 }
 0xfda   :  { %v834_v25 = vsel %vm833_vm5, %v4296_v27, 128  ;;  %vm2819_vm5 = vcmask 23552  }
 0xfdb   :  { %v835_v26 = vsel %vm347_vm7, %v834_v25, 2147483647  ;;  %v2895_v25 = vld [vmem:[%s5393_s8 + $0x6] sm:$0x3] }
 0xfdc   :  { %v837_v29 = vshra.s32 %v835_v26, 16  ;;  %v836_v32 = vand.u32 65535, %v835_v26 }
 0xfde   :  { %v839_v31 = vcvt.s32.f32 %v837_v29  ;;  %v838_v35 = vcvt.s32.f32 %v836_v32 }
 0xfe0   :  { %840 = vmin.xlane.f32.xlu1 %v839_v31 }
0x106d   :  { %v841_v34 = vpop.xlane.xlu1 %840 }
0x106e   :  { %vm842_vm8 = vcmp.eq.f32.partialorder %v839_v31, %v841_v34  ;;  %v847_v39 = vcvt.f32.s32 %v841_v34 }
0x106f   :  { %v843_v38 = vsel %vm842_vm8, %v838_v35, inf }
0x1070   :  { %844 = vmin.xlane.f32.xlu0 %v843_v38  ;;  %v848_v41 = vshll.u32 %v847_v39, 16 }
0x10fd   :  { %v845_v40 = vpop.xlane.xlu0 %844 }
0x10fe   :  { %v846_v45 = vcvt.f32.s32 %v845_v40 }
0x1100   :  { %v849_v46 = vadd.s32 %v848_v41, %v846_v45 }
0x1102   :  { %vm850_vm14 = vcmp.lt.s32.totalorder %v849_v46, 2 }
0x1103   :  { %v4583_v48 = vsel %vm850_vm14, %v849_v46, 2 }
0x1104   :  { %v881_v49 = vadd.s32 14, %v4583_v48  ;;  %v4587_v50 = vsel %vm2817_vm10, %v2816_v47, %v4583_v48 }
0x1106   :  { %vm882_vm15 = vcmp.eq.s32.totalorder %v4296_v27, %v881_v49 }
0x1107   :  { %v2887_v51 = vsel %vm882_vm15, 1.0, %v4172_v6  ;;  %vm2821_vm15 = vcmask 31744  }
0x1108   :  { %v885_v53 = vsel %vm399_vm11, %v2887_v51, %v735_v5  ;;  %v2890_v5 = vld [vmem:[%s5391_s6 + $0x70] sm:$0xff] }
0x1109   :  { %3367 = vmatmul.mubr.f32.vlgmr.msra.gmra.mrb[6].mxu0 %v885_v53 }
0x110a   :  { %3423 = vmatprep.mubr.msk.f32.mxu0 %vm4171_vm0, %v4172_v6 }
0x11dc   :  { %v952_v54 = vpop.f32.mrb[6].mxu0 }
0x11dd   :  { %v953_v55 = vadd.f32 %v4303_v28, %v952_v54  ;;  %v3368_v52 = vpop.f32.mrb[7].mxu0 }
0x11df   :  { %v956_v56 = vmul.f32 %v953_v55, %v4305_v30 }
0x11e1   :  { %4047 = vtanh.f32 %v956_v56 }
0x11eb   :  { %v4048_v57 = vpop.eup %4047 }
0x11ec   :  { %v958_v60 = vmul.f32 %v4048_v57, %v4305_v30 }
0x11ee   :  { %v959_v62 = vadd.f32 %v958_v60, %v4309_v36 }
0x11f0   :  { %962 = vrot.lane.b32.xlu0 %v959_v62, %s4174_s24  ;;  %v960_v0 = vmul.f32 %v959_v62, %v4526_v61  ;;  %v2891_v61 = vld [vmem:[%s5391_s6 + $0x78] sm:$0xff] }
0x11f1   :  { %v3814_v8 = vpack.c.bf16 %v2891_v61, %v2890_v5 }
0x11f3   :  { %3815 = vmatpush3.bf16.msra.mxu1 %v3814_v8 }
0x11f4   :  { %3816 = vmatprep.subr.bf16.mxu1 %v4170_v3 }
0x1262   :  { %v963_v63 = vpop.permute.xlu0 %962 }
0x1263   :  { %v965_v43 = vmul.f32 %v963_v63, %v959_v62 }
0x1265   :  { %967 = vrot.lane.b32.xlu1 %v965_v43, %s4175_s25 }
0x12d7   :  { %v968_v58 = vpop.permute.xlu1 %967 }
0x12d8   :  { %v4601_v1 = vadd.f32 %v968_v58, %v960_v0 }
0x12da   :  { %4049 = vtanh.f32 %v4601_v1 }
0x12e4   :  { %v4050_v10 = vpop.eup %4049 }
0x12e5   :  { %973 = vrot.lane.b32.xlu1 %v4050_v10, %s4174_s24 }
0x1357   :  { %v974_v12 = vpop.permute.xlu1 %973 }
0x1358   :  { %v976_v13 = vmul.f32 %v974_v12, %v959_v62  ;;  %v2897_v12 = vld [vmem:[%s5391_s6 + $0x80] sm:$0xff] }
0x135a   :  { %991 = vrot.lane.b32.xlu0 %v976_v13, %s4175_s25 }
0x13cc   :  { %v992_v16 = vpop.permute.xlu0 %991 }
0x13cd   :  { %3378 = vmatmul.mubr.msk.f32.vlgmr.msra.gmra.mrb[8].mxu1 %vm161_vm2, %v992_v16  ;;  %v2899_v16 = vld [vmem:[%s5391_s6 + $0x90] sm:$0xff] }
0x13ce   :  { %3818 = vmatpush3.bf16.msra.mxu1 %v4366_v9  ;;  %3412 = vmatprep.mubr.msk.f32.mxu1 %vm4171_vm0, %v4172_v6 }
0x13cf   :  { %3819 = vmatprep.subr.bf16.mxu1 %v4170_v3 }
0x13d2   :  { %3821 = vmatpush3.bf16.msra.mxu1 %v4372_v11 }
0x13d3   :  { %3822 = vmatprep.subr.bf16.mxu1 %v4170_v3 }
0x13d6   :  { %3824 = vmatpush3.bf16.msra.mxu1 %v4382_v14 }
0x13d7   :  { %3825 = vmatprep.subr.bf16.mxu1 %v4170_v3 }
0x13da   :  { %3827 = vmatpush3.bf16.msra.mxu1 %v4392_v17 }
0x13db   :  { %3828 = vmatprep.subr.bf16.mxu1 %v4170_v3 }
0x13de   :  { %3830 = vmatpush3.bf16.msra.mxu1 %v4402_v20 }
0x13df   :  { %3831 = vmatprep.subr.bf16.mxu1 %v4170_v3 }
0x13e2   :  { %3833 = vmatpush3.bf16.msra.mxu1 %v4412_v23 }
0x13e3   :  { %3834 = vmatprep.subr.bf16.mxu1 %v4170_v3 }
0x13e6   :  { %3836 = vmatpush3.bf16.msra.mxu1 %v4423_v33 }
0x13e7   :  { %3837 = vmatprep.subr.bf16.mxu1 %v4170_v3 }
0x13ea   :  { %3839 = vmatpush3.bf16.msra.mxu1 %v4433_v37 }
0x13eb   :  { %3870 = vmatprep.subr.bf16.mxu1 %v4170_v3 }
0x14a0   :  { %v1061_v21 = vpop.f32.mrb[8].mxu1 }
0x14a1   :  { %v1062_v22 = vadd.f32 %v2893_v19, %v1061_v21  ;;  %v3379_v24 = vpop.f32.mrb[9].mxu1 }
0x14a3   :  { %v4647_v26 = vsel %vm342_vm6, %v1062_v22, -1e+30 }
0x14a4   :  { %v1068_v29 = vadd.f32 %v2895_v25, %v4647_v26 }
0x14a6   :  { %v1069_v31 = vsel %vm342_vm6, %v1068_v29, -1e+30 }
0x14a7   :  { %v1070_v32 = vsel %vm347_vm7, %v1069_v31, -inf }
0x14a8   :  { %1071 = vmax.xlane.f32.xlu1 %v1070_v32 }
0x1535   :  { %v1072_v34 = vpop.xlane.xlu1 %1071 }
0x1536   :  { %vm1073_vm1 = vcmp.ge.f32.partialorder %v1069_v31, %v1072_v34  ;;  %v2902_v31 = vld [vmem:[%s5392_s7 + $0x4] ss:$0 sm:$0xff] }
0x1537   :  { %v1074_v35 = vsel %vm1073_vm1, %v4296_v27, 128 }
0x1538   :  { %v1075_v38 = vsel %vm347_vm7, %v1074_v35, 2147483647 }
0x1539   :  { %v1077_v39 = vshra.s32 %v1075_v38, 16  ;;  %v1076_v41 = vand.u32 65535, %v1075_v38  ;;  %v2904_v38 = vld [vmem:[%s5393_s8 + $0x8] sm:$0x3] }
0x153b   :  { %v1079_v40 = vcvt.s32.f32 %v1077_v39  ;;  %v1078_v46 = vcvt.s32.f32 %v1076_v41 }
0x153d   :  { %1080 = vmin.xlane.f32.xlu0 %v1079_v40 }
0x15ca   :  { %v1081_v45 = vpop.xlane.xlu0 %1080 }
0x15cb   :  { %vm1082_vm3 = vcmp.eq.f32.partialorder %v1079_v40, %v1081_v45  ;;  %v1087_v49 = vcvt.f32.s32 %v1081_v45 }
0x15cc   :  { %v1083_v47 = vsel %vm1082_vm3, %v1078_v46, inf }
0x15cd   :  { %1084 = vmin.xlane.f32.xlu0 %v1083_v47  ;;  %v1088_v53 = vshll.u32 %v1087_v49, 16 }
0x165a   :  { %v1085_v51 = vpop.xlane.xlu0 %1084 }
0x165b   :  { %v1086_v54 = vcvt.f32.s32 %v1085_v51 }
0x165d   :  { %v1089_v55 = vadd.s32 %v1088_v53, %v1086_v54 }
0x165f   :  { %vm1090_vm8 = vcmp.lt.s32.totalorder %v1089_v55, 1 }
0x1660   :  { %v4655_v52 = vsel %vm1090_vm8, %v1089_v55, 1 }
0x1661   :  { %v1121_v56 = vadd.s32 17, %v4655_v52  ;;  %v4660_v57 = vsel %vm2819_vm5, %v4587_v50, %v4655_v52 }
0x1663   :  { %vm1122_vm9 = vcmp.eq.s32.totalorder %v4296_v27, %v1121_v56 }
0x1664   :  { %v2896_v60 = vsel %vm1122_vm9, 1.0, %v4172_v6  ;;  %vm2823_vm9 = vcmask 39936  }
0x1665   :  { %v1125_v62 = vsel %vm399_vm11, %v2896_v60, %v976_v13  ;;  %v2898_v13 = vld [vmem:[%s5391_s6 + $0x88] sm:$0xff] }
0x1666   :  { %3413 = vmatmul.mubr.f32.vlgmr.msra.gmra.mrb[10].mxu1 %v1125_v62  ;;  %v3841_v19 = vpack.c.bf16 %v2898_v13, %v2897_v12 }
0x1667   :  { %3469 = vmatprep.mubr.msk.f32.mxu1 %vm4171_vm0, %v4172_v6 }
0x1668   :  { %3842 = vmatpush3.bf16.msra.mxu0 %v3841_v19 }
0x1669   :  { %3843 = vmatprep.subr.bf16.mxu0 %v4170_v3 }
0x1739   :  { %v1192_v63 = vpop.f32.mrb[10].mxu1 }
0x173a   :  { %v1193_v43 = vadd.f32 %v4303_v28, %v1192_v63  ;;  %v3414_v0 = vpop.f32.mrb[11].mxu1 }
0x173c   :  { %v1196_v58 = vmul.f32 %v1193_v43, %v4305_v30 }
0x173e   :  { %4051 = vtanh.f32 %v1196_v58 }
0x1748   :  { %v4052_v2 = vpop.eup %4051 }
0x1749   :  { %v1198_v50 = vmul.f32 %v4052_v2, %v4305_v30 }
0x174b   :  { %v1199_v4 = vadd.f32 %v1198_v50, %v4309_v36 }
0x174d   :  { %1202 = vrot.lane.b32.xlu1 %v1199_v4, %s4174_s24  ;;  %v1200_v61 = vmul.f32 %v1199_v4, %v4601_v1  ;;  %v2900_v1 = vld [vmem:[%s5391_s6 + $0x98] sm:$0xff] }
0x174e   :  { %v3844_v21 = vpack.c.bf16 %v2900_v1, %v2899_v16 }
0x1750   :  { %3845 = vmatpush3.bf16.msra.mxu0 %v3844_v21 }
0x1751   :  { %3846 = vmatprep.subr.bf16.mxu0 %v4170_v3 }
0x17bf   :  { %v1203_v5 = vpop.permute.xlu1 %1202 }
0x17c0   :  { %v1205_v7 = vmul.f32 %v1203_v5, %v1199_v4 }
0x17c2   :  { %1207 = vrot.lane.b32.xlu0 %v1205_v7, %s4175_s25 }
0x1834   :  { %v1208_v8 = vpop.permute.xlu0 %1207 }
0x1835   :  { %v4674_v10 = vadd.f32 %v1208_v8, %v1200_v61 }
0x1837   :  { %4053 = vtanh.f32 %v4674_v10 }
0x1841   :  { %v4054_v22 = vpop.eup %4053 }
0x1842   :  { %1213 = vrot.lane.b32.xlu1 %v4054_v22, %s4174_s24 }
0x18b4   :  { %v1214_v24 = vpop.permute.xlu1 %1213 }
0x18b5   :  { %v1216_v25 = vmul.f32 %v1214_v24, %v1199_v4 }
0x18b7   :  { %1231 = vrot.lane.b32.xlu1 %v1216_v25, %s4175_s25 }
0x1929   :  { %v1232_v29 = vpop.permute.xlu1 %1231 }
0x192a   :  { %3424 = vmatmul.mubr.msk.f32.vlgmr.msra.gmra.mrb[8].mxu0 %vm161_vm2, %v1232_v29  ;;  %v2908_v29 = vld [vmem:[%s5391_s6 + $0xa8] sm:$0xff] }
0x192b   :  { %3848 = vmatpush3.bf16.msra.mxu0 %v4366_v9  ;;  %3458 = vmatprep.mubr.msk.f32.mxu0 %vm4171_vm0, %v4172_v6 }
0x192c   :  { %3849 = vmatprep.subr.bf16.mxu0 %v4170_v3 }
0x192f   :  { %3851 = vmatpush3.bf16.msra.mxu0 %v4372_v11 }
0x1930   :  { %3852 = vmatprep.subr.bf16.mxu0 %v4170_v3 }
0x1933   :  { %3854 = vmatpush3.bf16.msra.mxu0 %v4382_v14 }
0x1934   :  { %3855 = vmatprep.subr.bf16.mxu0 %v4170_v3 }
0x1937   :  { %3857 = vmatpush3.bf16.msra.mxu0 %v4392_v17 }
0x1938   :  { %3858 = vmatprep.subr.bf16.mxu0 %v4170_v3 }
0x193b   :  { %3860 = vmatpush3.bf16.msra.mxu0 %v4402_v20 }
0x193c   :  { %3861 = vmatprep.subr.bf16.mxu0 %v4170_v3 }
0x193f   :  { %3863 = vmatpush3.bf16.msra.mxu0 %v4412_v23 }
0x1940   :  { %3864 = vmatprep.subr.bf16.mxu0 %v4170_v3 }
0x1943   :  { %3866 = vmatpush3.bf16.msra.mxu0 %v4423_v33 }
0x1944   :  { %3867 = vmatprep.subr.bf16.mxu0 %v4170_v3 }
0x1947   :  { %3869 = vmatpush3.bf16.msra.mxu0 %v4433_v37 }
0x1948   :  { %3900 = vmatprep.subr.bf16.mxu0 %v4170_v3 }
0x19fd   :  { %v1301_v32 = vpop.f32.mrb[8].mxu0 }
0x19fe   :  { %v1302_v34 = vadd.f32 %v2902_v31, %v1301_v32  ;;  %v3425_v35 = vpop.f32.mrb[9].mxu0  ;;  %v2909_v31 = vld [vmem:[%s5391_s6 + $0xb0] sm:$0xff] }
0x1a00   :  { %v4720_v39 = vsel %vm342_vm6, %v1302_v34, -1e+30 }
0x1a01   :  { %v1308_v40 = vadd.f32 %v2904_v38, %v4720_v39 }
0x1a03   :  { %v1309_v41 = vsel %vm342_vm6, %v1308_v40, -1e+30 }
0x1a04   :  { %v1310_v45 = vsel %vm347_vm7, %v1309_v41, -inf }
0x1a05   :  { %1311 = vmax.xlane.f32.xlu0 %v1310_v45  ;;  %v2912_v45 = vld [vmem:[%s5392_s7 + $0x5] ss:$0 sm:$0xff] }
0x1a92   :  { %v1312_v46 = vpop.xlane.xlu0 %1311 }
0x1a93   :  { %vm1313_vm10 = vcmp.ge.f32.partialorder %v1309_v41, %v1312_v46 }
0x1a94   :  { %v1314_v47 = vsel %vm1313_vm10, %v4296_v27, 128 }
0x1a95   :  { %v1315_v49 = vsel %vm347_vm7, %v1314_v47, 2147483647 }
0x1a96   :  { %v1317_v51 = vshra.s32 %v1315_v49, 16  ;;  %v1316_v54 = vand.u32 65535, %v1315_v49 }
0x1a98   :  { %v1319_v53 = vcvt.s32.f32 %v1317_v51  ;;  %v1318_v56 = vcvt.s32.f32 %v1316_v54  ;;  %v2914_v51 = vld [vmem:[%s5393_s8 + $0xa] sm:$0x3] }
0x1a9a   :  { %1320 = vmin.xlane.f32.xlu1 %v1319_v53 }
0x1b27   :  { %v1321_v55 = vpop.xlane.xlu1 %1320 }
0x1b28   :  { %vm1322_vm14 = vcmp.eq.f32.partialorder %v1319_v53, %v1321_v55  ;;  %v1327_v62 = vcvt.f32.s32 %v1321_v55 }
0x1b29   :  { %v1323_v60 = vsel %vm1322_vm14, %v1318_v56, inf }
0x1b2a   :  { %1324 = vmin.xlane.f32.xlu0 %v1323_v60  ;;  %v1328_v43 = vshll.u32 %v1327_v62, 16 }
0x1bb7   :  { %v1325_v63 = vpop.xlane.xlu0 %1324 }
0x1bb8   :  { %v1326_v0 = vcvt.f32.s32 %v1325_v63 }
0x1bba   :  { %v1329_v58 = vadd.s32 %v1328_v43, %v1326_v0 }
0x1bbc   :  { %vm1330_vm1 = vcmp.lt.s32.totalorder %v1329_v58, 1 }
0x1bbd   :  { %v4728_v2 = vsel %vm1330_vm1, %v1329_v58, 1 }
0x1bbe   :  { %v1365_v50 = vadd.s32 19, %v4728_v2  ;;  %v4733_v4 = vsel %vm2821_vm15, %v4660_v57, %v4728_v2 }
0x1bc0   :  { %vm1366_vm3 = vcmp.eq.s32.totalorder %v4296_v27, %v1365_v50 }
0x1bc1   :  { %v2906_v5 = vsel %vm1366_vm3, 1.0, %v4172_v6  ;;  %vm2825_vm3 = vcmask 48128  }
0x1bc2   :  { %v1369_v7 = vsel %vm399_vm11, %v2906_v5, %v1216_v25 }
0x1bc3   :  { %3459 = vmatmul.mubr.f32.vlgmr.msra.gmra.mrb[10].mxu0 %v1369_v7 }
0x1bc4   :  { %3515 = vmatprep.mubr.msk.f32.mxu0 %vm4171_vm0, %v4172_v6 }
0x1c96   :  { %v1436_v61 = vpop.f32.mrb[10].mxu0 }
0x1c97   :  { %v1437_v8 = vadd.f32 %v4303_v28, %v1436_v61  ;;  %v3460_v12 = vpop.f32.mrb[11].mxu0  ;;  %v2907_v28 = vld [vmem:[%s5391_s6 + $0xa0] sm:$0xff] }
0x1c98   :  { %v3871_v32 = vpack.c.bf16 %v2908_v29, %v2907_v28  ;;  %v4816_v28 = vld [vmem:[%s5390_s5] ss:$0 sm:$0xff] }
0x1c99   :  { %v1440_v13 = vmul.f32 %v1437_v8, %v4305_v30 }
0x1c9a   :  { %3872 = vmatpush3.bf16.msra.mxu1 %v3871_v32 }
0x1c9b   :  { %4055 = vtanh.f32 %v1440_v13  ;;  %3873 = vmatprep.subr.bf16.mxu1 %v4170_v3 }
0x1ca5   :  { %v4056_v16 = vpop.eup %4055 }
0x1ca6   :  { %v1442_v57 = vmul.f32 %v4056_v16, %v4305_v30 }
0x1ca8   :  { %v1443_v19 = vadd.f32 %v1442_v57, %v4309_v36 }
0x1caa   :  { %1446 = vrot.lane.b32.xlu0 %v1443_v19, %s4174_s24  ;;  %v1444_v22 = vmul.f32 %v1443_v19, %v4674_v10  ;;  %v2910_v10 = vld [vmem:[%s5391_s6 + $0xb8] sm:$0xff] }
0x1cab   :  { %v3874_v34 = vpack.c.bf16 %v2910_v10, %v2909_v31 }
0x1cad   :  { %3875 = vmatpush3.bf16.msra.mxu1 %v3874_v34 }
0x1cae   :  { %3876 = vmatprep.subr.bf16.mxu1 %v4170_v3 }
0x1d1c   :  { %v1447_v1 = vpop.permute.xlu0 %1446 }
0x1d1d   :  { %v1449_v21 = vmul.f32 %v1447_v1, %v1443_v19 }
0x1d1f   :  { %1451 = vrot.lane.b32.xlu1 %v1449_v21, %s4175_s25 }
0x1d91   :  { %v1452_v24 = vpop.permute.xlu1 %1451 }
0x1d92   :  { %v4747_v25 = vadd.f32 %v1452_v24, %v1444_v22 }
0x1d94   :  { %4057 = vtanh.f32 %v4747_v25 }
0x1d9e   :  { %v4058_v35 = vpop.eup %4057 }
0x1d9f   :  { %1457 = vrot.lane.b32.xlu1 %v4058_v35, %s4174_s24 }
0x1e11   :  { %v1458_v38 = vpop.permute.xlu1 %1457 }
0x1e12   :  { %v1460_v40 = vmul.f32 %v1458_v38, %v1443_v19 }
0x1e14   :  { %1475 = vrot.lane.b32.xlu0 %v1460_v40, %s4175_s25 }
0x1e86   :  { %v1476_v41 = vpop.permute.xlu0 %1475 }
0x1e87   :  { %3470 = vmatmul.mubr.msk.f32.vlgmr.msra.gmra.mrb[12].mxu1 %vm161_vm2, %v1476_v41 }
0x1e88   :  { %3878 = vmatpush3.bf16.msra.mxu1 %v4366_v9  ;;  %3504 = vmatprep.mubr.msk.f32.mxu1 %vm4171_vm0, %v4172_v6 }
0x1e89   :  { %3879 = vmatprep.subr.bf16.mxu1 %v4170_v3 }
0x1e8c   :  { %3881 = vmatpush3.bf16.msra.mxu1 %v4372_v11 }
0x1e8d   :  { %3882 = vmatprep.subr.bf16.mxu1 %v4170_v3 }
0x1e90   :  { %3884 = vmatpush3.bf16.msra.mxu1 %v4382_v14 }
0x1e91   :  { %3885 = vmatprep.subr.bf16.mxu1 %v4170_v3 }
0x1e94   :  { %3887 = vmatpush3.bf16.msra.mxu1 %v4392_v17 }
0x1e95   :  { %3888 = vmatprep.subr.bf16.mxu1 %v4170_v3 }
0x1e98   :  { %3890 = vmatpush3.bf16.msra.mxu1 %v4402_v20 }
0x1e99   :  { %3891 = vmatprep.subr.bf16.mxu1 %v4170_v3 }
0x1e9c   :  { %3893 = vmatpush3.bf16.msra.mxu1 %v4412_v23 }
0x1e9d   :  { %3894 = vmatprep.subr.bf16.mxu1 %v4170_v3 }
0x1ea0   :  { %3896 = vmatpush3.bf16.msra.mxu1 %v4423_v33 }
0x1ea1   :  { %3897 = vmatprep.subr.bf16.mxu1 %v4170_v3 }
0x1ea4   :  { %3899 = vmatpush3.bf16.msra.mxu1 %v4433_v37 }
0x1ea5   :  { %3930 = vmatprep.subr.bf16.mxu1 %v4170_v3 }
0x1f5a   :  { %v1545_v46 = vpop.f32.mrb[12].mxu1 }
0x1f5b   :  { %v1546_v47 = vadd.f32 %v2912_v45, %v1545_v46  ;;  %v3471_v49 = vpop.f32.mrb[13].mxu1  ;;  %v2917_v46 = vld [vmem:[%s5391_s6 + $0xc0] sm:$0xff] }
0x1f5c   :  { %v2919_v49 = vld [vmem:[%s5391_s6 + $0xd0] sm:$0xff] }
0x1f5d   :  { %v4793_v53 = vsel %vm824_vm4, %v1546_v47, -1e+30  ;;  %v2918_v47 = vld [vmem:[%s5391_s6 + $0xc8] sm:$0xff] }
0x1f5e   :  { %v1552_v54 = vadd.f32 %v2914_v51, %v4793_v53  ;;  %v3901_v51 = vpack.c.bf16 %v2918_v47, %v2917_v46 }
0x1f60   :  { %v1553_v55 = vsel %vm824_vm4, %v1552_v54, -1e+30  ;;  %3902 = vmatpush3.bf16.msra.mxu0 %v3901_v51 }
0x1f61   :  { %v1554_v56 = vsel %vm347_vm7, %v1553_v55, -inf  ;;  %3903 = vmatprep.subr.bf16.mxu0 %v4170_v3 }
0x1f62   :  { %1555 = vmax.xlane.f32.xlu1 %v1554_v56 }
0x1fef   :  { %v1556_v60 = vpop.xlane.xlu1 %1555 }
0x1ff0   :  { %vm1557_vm5 = vcmp.ge.f32.partialorder %v1553_v55, %v1556_v60 }
0x1ff1   :  { %v1558_v62 = vsel %vm1557_vm5, %v4296_v27, 128 }
0x1ff2   :  { %v1559_v63 = vsel %vm347_vm7, %v1558_v62, 2147483647 }
0x1ff3   :  { %v1561_v43 = vshra.s32 %v1559_v63, 16  ;;  %v1560_v58 = vand.u32 65535, %v1559_v63  ;;  %v2922_v63 = vld [vmem:[%s5392_s7 + $0x6] ss:$0 sm:$0xff] }
0x1ff5   :  { %v1563_v0 = vcvt.s32.f32 %v1561_v43  ;;  %v1562_v5 = vcvt.s32.f32 %v1560_v58 }
0x1ff7   :  { %1564 = vmin.xlane.f32.xlu0 %v1563_v0 }
0x2084   :  { %v1565_v50 = vpop.xlane.xlu0 %1564 }
0x2085   :  { %vm1566_vm8 = vcmp.eq.f32.partialorder %v1563_v0, %v1565_v50  ;;  %v1571_v61 = vcvt.f32.s32 %v1565_v50  ;;  %v2924_v50 = vld [vmem:[%s5393_s8 + $0xc] sm:$0x3] }
0x2086   :  { %v1567_v7 = vsel %vm1566_vm8, %v1562_v5, inf }
0x2087   :  { %1568 = vmin.xlane.f32.xlu0 %v1567_v7  ;;  %v1572_v12 = vshll.u32 %v1571_v61, 16 }
0x2114   :  { %v1569_v8 = vpop.xlane.xlu0 %1568 }
0x2115   :  { %v1570_v13 = vcvt.f32.s32 %v1569_v8 }
0x2117   :  { %v1573_v16 = vadd.s32 %v1572_v12, %v1570_v13 }
0x2119   :  { %vm1574_vm10 = vcmp.lt.s32.totalorder %v1573_v16, 2 }
0x211a   :  { %v4801_v57 = vsel %vm1574_vm10, %v1573_v16, 2 }
0x211b   :  { %v1609_v19 = vadd.s32 21, %v4801_v57  ;;  %v4806_v1 = vsel %vm2823_vm9, %v4733_v4, %v4801_v57 }
0x211d   :  { %vm1610_vm14 = vcmp.eq.s32.totalorder %v4296_v27, %v1609_v19 }
0x211e   :  { %v2916_v21 = vsel %vm1610_vm14, 1.0, %v4172_v6  ;;  %vm2827_vm14 = vcmask 56320  }
0x211f   :  { %v1613_v22 = vsel %vm399_vm11, %v2916_v21, %v1460_v40 }
0x2120   :  { %3505 = vmatmul.mubr.f32.vlgmr.msra.gmra.mrb[14].mxu1 %v1613_v22 }
0x2121   :  { %3561 = vmatprep.mubr.msk.f32.mxu1 %vm4171_vm0, %v4172_v6 }
0x21f3   :  { %v1680_v24 = vpop.f32.mrb[14].mxu1 }
0x21f4   :  { %v1681_v29 = vadd.f32 %v4816_v28, %v1680_v24  ;;  %v3506_v4 = vpop.f32.mrb[15].mxu1 }
0x21f6   :  { %v1684_v31 = vmul.f32 %v1681_v29, %v4305_v30 }
0x21f8   :  { %4059 = vtanh.f32 %v1684_v31 }
0x2202   :  { %v4060_v32 = vpop.eup %4059 }
0x2203   :  { %v1686_v10 = vmul.f32 %v4060_v32, %v4305_v30 }
0x2205   :  { %v1687_v34 = vadd.f32 %v1686_v10, %v4309_v36 }
0x2207   :  { %1690 = vrot.lane.b32.xlu1 %v1687_v34, %s4174_s24  ;;  %v1688_v40 = vmul.f32 %v1687_v34, %v4747_v25  ;;  %v2920_v25 = vld [vmem:[%s5391_s6 + $0xd8] sm:$0xff] }
0x2208   :  { %v3904_v54 = vpack.c.bf16 %v2920_v25, %v2919_v49 }
0x220a   :  { %3905 = vmatpush3.bf16.msra.mxu0 %v3904_v54 }
0x220b   :  { %3906 = vmatprep.subr.bf16.mxu0 %v4170_v3 }
0x2279   :  { %v1691_v35 = vpop.permute.xlu1 %1690 }
0x227a   :  { %v1693_v38 = vmul.f32 %v1691_v35, %v1687_v34 }
0x227c   :  { %1695 = vrot.lane.b32.xlu0 %v1693_v38, %s4175_s25 }
0x22ee   :  { %v1696_v41 = vpop.permute.xlu0 %1695 }
0x22ef   :  { %v4825_v45 = vadd.f32 %v1696_v41, %v1688_v40 }
0x22f1   :  { %4061 = vtanh.f32 %v4825_v45 }
0x22fb   :  { %v4062_v55 = vpop.eup %4061 }
0x22fc   :  { %1701 = vrot.lane.b32.xlu1 %v4062_v55, %s4174_s24 }
0x236e   :  { %v1702_v56 = vpop.permute.xlu1 %1701 }
0x236f   :  { %v1704_v60 = vmul.f32 %v1702_v56, %v1687_v34 }
0x2371   :  { %1719 = vrot.lane.b32.xlu1 %v1704_v60, %s4175_s25 }
0x23e3   :  { %v1720_v62 = vpop.permute.xlu1 %1719 }
0x23e4   :  { %3516 = vmatmul.mubr.msk.f32.vlgmr.msra.gmra.mrb[12].mxu0 %vm161_vm2, %v1720_v62 }
0x23e5   :  { %3908 = vmatpush3.bf16.msra.mxu0 %v4366_v9  ;;  %3550 = vmatprep.mubr.msk.f32.mxu0 %vm4171_vm0, %v4172_v6 }
0x23e6   :  { %3909 = vmatprep.subr.bf16.mxu0 %v4170_v3 }
0x23e9   :  { %3911 = vmatpush3.bf16.msra.mxu0 %v4372_v11 }
0x23ea   :  { %3912 = vmatprep.subr.bf16.mxu0 %v4170_v3 }
0x23ed   :  { %3914 = vmatpush3.bf16.msra.mxu0 %v4382_v14 }
0x23ee   :  { %3915 = vmatprep.subr.bf16.mxu0 %v4170_v3 }
0x23f1   :  { %3917 = vmatpush3.bf16.msra.mxu0 %v4392_v17 }
0x23f2   :  { %3918 = vmatprep.subr.bf16.mxu0 %v4170_v3 }
0x23f5   :  { %3920 = vmatpush3.bf16.msra.mxu0 %v4402_v20 }
0x23f6   :  { %3921 = vmatprep.subr.bf16.mxu0 %v4170_v3 }
0x23f9   :  { %3923 = vmatpush3.bf16.msra.mxu0 %v4412_v23 }
0x23fa   :  { %3924 = vmatprep.subr.bf16.mxu0 %v4170_v3 }
0x23fd   :  { %3926 = vmatpush3.bf16.msra.mxu0 %v4423_v33 }
0x23fe   :  { %3927 = vmatprep.subr.bf16.mxu0 %v4170_v3 }
0x2401   :  { %3929 = vmatpush3.bf16.msra.mxu0 %v4433_v37 }
0x2402   :  { %3960 = vmatprep.subr.bf16.mxu0 %v4170_v3 }
0x24b7   :  { %v1789_v43 = vpop.f32.mrb[12].mxu0 }
0x24b8   :  { %v1790_v0 = vadd.f32 %v2922_v63, %v1789_v43  ;;  %v3517_v58 = vpop.f32.mrb[13].mxu0 }
0x24b9   :  { %v2926_v58 = vld [vmem:[%s5391_s6 + $0xe0] sm:$0xff] }
0x24ba   :  { %v4871_v5 = vsel %vm342_vm6, %v1790_v0, -1e+30 }
0x24bb   :  { %v1796_v7 = vadd.f32 %v2924_v50, %v4871_v5  ;;  %v2927_v50 = vld [vmem:[%s5391_s6 + $0xe8] sm:$0xff] }
0x24bd   :  { %v1797_v61 = vsel %vm342_vm6, %v1796_v7, -1e+30  ;;  %v2928_v7 = vld [vmem:[%s5391_s6 + $0xf0] sm:$0xff] }
0x24be   :  { %v1798_v8 = vsel %vm347_vm7, %v1797_v61, -inf }
0x24bf   :  { %1799 = vmax.xlane.f32.xlu0 %v1798_v8 }
0x254c   :  { %v1800_v12 = vpop.xlane.xlu0 %1799 }
0x254d   :  { %vm1801_vm15 = vcmp.ge.f32.partialorder %v1797_v61, %v1800_v12  ;;  %v3931_v61 = vpack.c.bf16 %v2927_v50, %v2926_v58 }
0x254e   :  { %v1802_v13 = vsel %vm1801_vm15, %v4296_v27, 128 }
0x254f   :  { %v1803_v16 = vsel %vm347_vm7, %v1802_v13, 2147483647  ;;  %3932 = vmatpush3.bf16.msra.mxu1 %v3931_v61 }
0x2550   :  { %v1805_v19 = vshra.s32 %v1803_v16, 16  ;;  %v1804_v22 = vand.u32 65535, %v1803_v16  ;;  %3933 = vmatprep.subr.bf16.mxu1 %v4170_v3 }
0x2552   :  { %v1807_v21 = vcvt.s32.f32 %v1805_v19  ;;  %v1806_v29 = vcvt.s32.f32 %v1804_v22 }
0x2554   :  { %1808 = vmin.xlane.f32.xlu1 %v1807_v21 }
0x25e1   :  { %v1809_v24 = vpop.xlane.xlu1 %1808 }
0x25e2   :  { %vm1810_vm1 = vcmp.eq.f32.partialorder %v1807_v21, %v1809_v24  ;;  %v1815_v31 = vcvt.f32.s32 %v1809_v24  ;;  %v2931_v21 = vld [vmem:[%s5392_s7 + $0x7] ss:$0 sm:$0xff] }
0x25e3   :  { %v1811_v4 = vsel %vm1810_vm1, %v1806_v29, inf }
0x25e4   :  { %1812 = vmin.xlane.f32.xlu0 %v1811_v4  ;;  %v1816_v10 = vshll.u32 %v1815_v31, 16  ;;  %v2933_v4 = vld [vmem:[%s5393_s8 + $0xe] sm:$0x3] }
0x2671   :  { %v1813_v32 = vpop.xlane.xlu0 %1812 }
0x2672   :  { %v1814_v34 = vcvt.f32.s32 %v1813_v32 }
0x2674   :  { %v1817_v35 = vadd.s32 %v1816_v10, %v1814_v34 }
0x2676   :  { %vm1818_vm5 = vcmp.lt.s32.totalorder %v1817_v35, 1 }
0x2677   :  { %v4879_v38 = vsel %vm1818_vm5, %v1817_v35, 1 }
0x2678   :  { %v1849_v40 = vadd.s32 24, %v4879_v38  ;;  %v4884_v41 = vsel %vm2825_vm3, %v4806_v1, %v4879_v38  ;;  %vm2273_vm3 = vcmp.lt.s32.totalorder %v4296_v27, 8 }
0x267a   :  { %vm1850_vm8 = vcmp.eq.s32.totalorder %v4296_v27, %v1849_v40 }
0x267b   :  { %v2925_v46 = vsel %vm1850_vm8, 1.0, %v4172_v6 }
0x267c   :  { %v1853_v47 = vsel %vm399_vm11, %v2925_v46, %v1704_v60 }
0x267d   :  { %3551 = vmatmul.mubr.f32.vlgmr.msra.gmra.mrb[14].mxu0 %v1853_v47 }
0x267e   :  { %3607 = vmatprep.mubr.msk.f32.mxu0 %vm4171_vm0, %v4172_v6 }
0x2750   :  { %v1920_v49 = vpop.f32.mrb[14].mxu0 }
0x2751   :  { %v1921_v51 = vadd.f32 %v4816_v28, %v1920_v49  ;;  %v3552_v25 = vpop.f32.mrb[15].mxu0 }
0x2753   :  { %v1924_v54 = vmul.f32 %v1921_v51, %v4305_v30 }
0x2755   :  { %4063 = vtanh.f32 %v1924_v54 }
0x275f   :  { %v4064_v55 = vpop.eup %4063 }
0x2760   :  { %v1926_v1 = vmul.f32 %v4064_v55, %v4305_v30 }
0x2762   :  { %v1927_v56 = vadd.f32 %v1926_v1, %v4309_v36 }
0x2764   :  { %1930 = vrot.lane.b32.xlu0 %v1927_v56, %s4174_s24  ;;  %v1928_v63 = vmul.f32 %v1927_v56, %v4825_v45  ;;  %v2929_v45 = vld [vmem:[%s5391_s6 + $0xf8] sm:$0xff] }
0x2765   :  { %v3934_v8 = vpack.c.bf16 %v2929_v45, %v2928_v7 }
0x2767   :  { %3935 = vmatpush3.bf16.msra.mxu1 %v3934_v8 }
0x2768   :  { %3936 = vmatprep.subr.bf16.mxu1 %v4170_v3 }
0x27d6   :  { %v1931_v62 = vpop.permute.xlu0 %1930 }
0x27d7   :  { %v1933_v60 = vmul.f32 %v1931_v62, %v1927_v56 }
0x27d9   :  { %1935 = vrot.lane.b32.xlu1 %v1933_v60, %s4175_s25 }
0x284b   :  { %v1936_v43 = vpop.permute.xlu1 %1935 }
0x284c   :  { %v4898_v0 = vadd.f32 %v1936_v43, %v1928_v63 }
0x284e   :  { %4065 = vtanh.f32 %v4898_v0 }
0x2858   :  { %v4066_v12 = vpop.eup %4065 }
0x2859   :  { %1941 = vrot.lane.b32.xlu1 %v4066_v12, %s4174_s24 }
0x28cb   :  { %v1942_v13 = vpop.permute.xlu1 %1941 }
0x28cc   :  { %v1944_v16 = vmul.f32 %v1942_v13, %v1927_v56 }
0x28ce   :  { %1959 = vrot.lane.b32.xlu0 %v1944_v16, %s4175_s25 }
0x2940   :  { %v1960_v19 = vpop.permute.xlu0 %1959 }
0x2941   :  { %3562 = vmatmul.mubr.msk.f32.vlgmr.msra.gmra.mrb[16].mxu1 %vm161_vm2, %v1960_v19 }
0x2942   :  { %3938 = vmatpush3.bf16.msra.mxu1 %v4366_v9  ;;  %3596 = vmatprep.mubr.msk.f32.mxu1 %vm4171_vm0, %v4172_v6 }
0x2943   :  { %3939 = vmatprep.subr.bf16.mxu1 %v4170_v3 }
0x2946   :  { %3941 = vmatpush3.bf16.msra.mxu1 %v4372_v11 }
0x2947   :  { %3942 = vmatprep.subr.bf16.mxu1 %v4170_v3 }
0x294a   :  { %3944 = vmatpush3.bf16.msra.mxu1 %v4382_v14 }
0x294b   :  { %3945 = vmatprep.subr.bf16.mxu1 %v4170_v3 }
0x294e   :  { %3947 = vmatpush3.bf16.msra.mxu1 %v4392_v17 }
0x294f   :  { %3948 = vmatprep.subr.bf16.mxu1 %v4170_v3 }
0x2952   :  { %3950 = vmatpush3.bf16.msra.mxu1 %v4402_v20 }
0x2953   :  { %3951 = vmatprep.subr.bf16.mxu1 %v4170_v3 }
0x2956   :  { %3953 = vmatpush3.bf16.msra.mxu1 %v4412_v23 }
0x2957   :  { %3954 = vmatprep.subr.bf16.mxu1 %v4170_v3 }
0x295a   :  { %3956 = vmatpush3.bf16.msra.mxu1 %v4423_v33 }
0x295b   :  { %3957 = vmatprep.subr.bf16.mxu1 %v4170_v3 }
0x295e   :  { %3959 = vmatpush3.bf16.msra.mxu1 %v4433_v37 }
0x295f   :  { %3990 = vmatprep.subr.bf16.mxu1 %v4170_v3 }
0x2a14   :  { %v2029_v22 = vpop.f32.mrb[16].mxu1 }
0x2a15   :  { %v2030_v24 = vadd.f32 %v2931_v21, %v2029_v22  ;;  %v3563_v29 = vpop.f32.mrb[17].mxu1 }
0x2a17   :  { %v4944_v31 = vsel %vm342_vm6, %v2030_v24, -1e+30 }
0x2a18   :  { %v2036_v32 = vadd.f32 %v2933_v4, %v4944_v31 }
0x2a1a   :  { %v2037_v10 = vsel %vm342_vm6, %v2036_v32, -1e+30  ;;  %v2935_v32 = vld [vmem:[%s5391_s6 + $0x100] sm:$0xff] }
0x2a1b   :  { %v2038_v34 = vsel %vm347_vm7, %v2037_v10, -inf }
0x2a1c   :  { %2039 = vmax.xlane.f32.xlu1 %v2038_v34  ;;  %v2937_v34 = vld [vmem:[%s5391_s6 + $0x110] sm:$0xff] }
0x2aa9   :  { %v2040_v35 = vpop.xlane.xlu1 %2039 }
0x2aaa   :  { %vm2041_vm9 = vcmp.ge.f32.partialorder %v2037_v10, %v2040_v35  ;;  %v2936_v10 = vld [vmem:[%s5391_s6 + $0x108] sm:$0xff] }
0x2aab   :  { %v2042_v40 = vsel %vm2041_vm9, %v4296_v27, 128  ;;  %v3961_v35 = vpack.c.bf16 %v2936_v10, %v2935_v32  ;;  %vm2829_vm9 = vcmask 64512  }
0x2aac   :  { %v2043_v46 = vsel %vm347_vm7, %v2042_v40, 2147483647 }
0x2aad   :  { %v2045_v47 = vshra.s32 %v2043_v46, 16  ;;  %v2044_v51 = vand.u32 65535, %v2043_v46  ;;  %3962 = vmatpush3.bf16.msra.mxu0 %v3961_v35 }
0x2aae   :  { %3963 = vmatprep.subr.bf16.mxu0 %v4170_v3 }
0x2aaf   :  { %v2047_v49 = vcvt.s32.f32 %v2045_v47  ;;  %v2046_v54 = vcvt.s32.f32 %v2044_v51 }
0x2ab1   :  { %2048 = vmin.xlane.f32.xlu0 %v2047_v49 }
0x2b3e   :  { %v2049_v25 = vpop.xlane.xlu0 %2048 }
0x2b3f   :  { %vm2050_vm10 = vcmp.eq.f32.partialorder %v2047_v49, %v2049_v25  ;;  %v2055_v1 = vcvt.f32.s32 %v2049_v25  ;;  %v2940_v25 = vld [vmem:[%s5392_s7 + $0x8] ss:$0 sm:$0xff] }
0x2b40   :  { %v2051_v55 = vsel %vm2050_vm10, %v2046_v54, inf }
0x2b41   :  { %2052 = vmin.xlane.f32.xlu0 %v2051_v55  ;;  %v2056_v62 = vshll.u32 %v2055_v1, 16 }
0x2bce   :  { %v2053_v56 = vpop.xlane.xlu0 %2052 }
0x2bcf   :  { %v2054_v60 = vcvt.f32.s32 %v2053_v56  ;;  %v2942_v56 = vld [vmem:[%s5393_s8 + $0x10] sm:$0x3] }
0x2bd1   :  { %v2057_v63 = vadd.s32 %v2056_v62, %v2054_v60 }
0x2bd3   :  { %vm2058_vm15 = vcmp.lt.s32.totalorder %v2057_v63, 1 }
0x2bd4   :  { %v4952_v43 = vsel %vm2058_vm15, %v2057_v63, 1 }
0x2bd5   :  { %v2089_v58 = vadd.s32 26, %v4952_v43  ;;  %v4957_v50 = vsel %vm2827_vm14, %v4884_v41, %v4952_v43 }
0x2bd7   :  { %vm2090_vm1 = vcmp.eq.s32.totalorder %v4296_v27, %v2089_v58 }
0x2bd8   :  { %v2934_v7 = vsel %vm2090_vm1, 1.0, %v4172_v6 }
0x2bd9   :  { %v2093_v61 = vsel %vm399_vm11, %v2934_v7, %v1944_v16 }
0x2bda   :  { %3597 = vmatmul.mubr.f32.vlgmr.msra.gmra.mrb[18].mxu1 %v2093_v61 }
0x2bdb   :  { %3653 = vmatprep.mubr.msk.f32.mxu1 %vm4171_vm0, %v4172_v6 }
0x2cad   :  { %v2160_v45 = vpop.f32.mrb[18].mxu1 }
0x2cae   :  { %v2161_v8 = vadd.f32 %v4816_v28, %v2160_v45  ;;  %v3598_v12 = vpop.f32.mrb[19].mxu1 }
0x2cb0   :  { %v2164_v13 = vmul.f32 %v2161_v8, %v4305_v30 }
0x2cb2   :  { %4067 = vtanh.f32 %v2164_v13 }
0x2cbc   :  { %v4068_v19 = vpop.eup %4067 }
0x2cbd   :  { %v2166_v41 = vmul.f32 %v4068_v19, %v4305_v30 }
0x2cbf   :  { %v2167_v21 = vadd.f32 %v2166_v41, %v4309_v36 }
0x2cc1   :  { %2170 = vrot.lane.b32.xlu1 %v2167_v21, %s4174_s24  ;;  %v2168_v24 = vmul.f32 %v2167_v21, %v4898_v0  ;;  %v2938_v0 = vld [vmem:[%s5391_s6 + $0x118] sm:$0xff] }
0x2cc2   :  { %v3964_v40 = vpack.c.bf16 %v2938_v0, %v2937_v34 }
0x2cc4   :  { %3965 = vmatpush3.bf16.msra.mxu0 %v3964_v40 }
0x2cc5   :  { %3966 = vmatprep.subr.bf16.mxu0 %v4170_v3 }
0x2d33   :  { %v2171_v22 = vpop.permute.xlu1 %2170 }
0x2d34   :  { %v2173_v16 = vmul.f32 %v2171_v22, %v2167_v21 }
0x2d36   :  { %2175 = vrot.lane.b32.xlu0 %v2173_v16, %s4175_s25 }
0x2da8   :  { %v2176_v29 = vpop.permute.xlu0 %2175 }
0x2da9   :  { %v4971_v4 = vadd.f32 %v2176_v29, %v2168_v24 }
0x2dab   :  { %4069 = vtanh.f32 %v4971_v4 }
0x2db5   :  { %v4070_v46 = vpop.eup %4069 }
0x2db6   :  { %2181 = vrot.lane.b32.xlu1 %v4070_v46, %s4174_s24 }
0x2e28   :  { %v2182_v47 = vpop.permute.xlu1 %2181 }
0x2e29   :  { %v2184_v49 = vmul.f32 %v2182_v47, %v2167_v21 }
0x2e2b   :  { %2199 = vrot.lane.b32.xlu1 %v2184_v49, %s4175_s25 }
0x2e9d   :  { %v2200_v51 = vpop.permute.xlu1 %2199 }
0x2e9e   :  { %3608 = vmatmul.mubr.msk.f32.vlgmr.msra.gmra.mrb[16].mxu0 %vm161_vm2, %v2200_v51 }
0x2e9f   :  { %3968 = vmatpush3.bf16.msra.mxu0 %v4366_v9  ;;  %3642 = vmatprep.mubr.msk.f32.mxu0 %vm4171_vm0, %v4172_v6 }
0x2ea0   :  { %3969 = vmatprep.subr.bf16.mxu0 %v4170_v3 }
0x2ea3   :  { %3971 = vmatpush3.bf16.msra.mxu0 %v4372_v11 }
0x2ea4   :  { %3972 = vmatprep.subr.bf16.mxu0 %v4170_v3 }
0x2ea7   :  { %3974 = vmatpush3.bf16.msra.mxu0 %v4382_v14 }
0x2ea8   :  { %3975 = vmatprep.subr.bf16.mxu0 %v4170_v3 }
0x2eab   :  { %3977 = vmatpush3.bf16.msra.mxu0 %v4392_v17 }
0x2eac   :  { %3978 = vmatprep.subr.bf16.mxu0 %v4170_v3 }
0x2eaf   :  { %3980 = vmatpush3.bf16.msra.mxu0 %v4402_v20 }
0x2eb0   :  { %3981 = vmatprep.subr.bf16.mxu0 %v4170_v3 }
0x2eb3   :  { %3983 = vmatpush3.bf16.msra.mxu0 %v4412_v23 }
0x2eb4   :  { %3984 = vmatprep.subr.bf16.mxu0 %v4170_v3 }
0x2eb7   :  { %3986 = vmatpush3.bf16.msra.mxu0 %v4423_v33 }
0x2eb8   :  { %3987 = vmatprep.subr.bf16.mxu0 %v4170_v3 }
0x2ebb   :  { %3989 = vmatpush3.bf16.msra.mxu0 %v4433_v37 }
0x2ebc   :  { %4020 = vmatprep.subr.bf16.mxu0 %v4170_v3 }
0x2f71   :  { %v2269_v54 = vpop.f32.mrb[16].mxu0 }
0x2f72   :  { %v2270_v55 = vadd.f32 %v2940_v25, %v2269_v54  ;;  %v3609_v1 = vpop.f32.mrb[17].mxu0 }
0x2f74   :  { %v5018_v62 = vsel %vm2273_vm3, %v2270_v55, -1e+30 }
0x2f75   :  { %v2277_v60 = vadd.f32 %v2942_v56, %v5018_v62 }
0x2f77   :  { %v2278_v63 = vsel %vm2273_vm3, %v2277_v60, -1e+30 }
0x2f78   :  { %v2279_v58 = vsel %vm347_vm7, %v2278_v63, -inf }
0x2f79   :  { %2280 = vmax.xlane.f32.xlu0 %v2279_v58  ;;  %v2945_v58 = vld [vmem:[%s5391_s6 + $0x120] sm:$0xff] }
0x3006   :  { %v2281_v7 = vpop.xlane.xlu0 %2280 }
0x3007   :  { %vm2282_vm5 = vcmp.ge.f32.partialorder %v2278_v63, %v2281_v7  ;;  %v2946_v7 = vld [vmem:[%s5391_s6 + $0x128] sm:$0xff] }
0x3008   :  { %v2283_v61 = vsel %vm2282_vm5, %v4296_v27, 128  ;;  %vm2831_vm5 = vcmask 72704  }
0x3009   :  { %v2284_v45 = vsel %vm347_vm7, %v2283_v61, 2147483647  ;;  %v2947_v61 = vld [vmem:[%s5391_s6 + $0x130] sm:$0xff] }
0x300a   :  { %v2286_v8 = vshra.s32 %v2284_v45, 16  ;;  %v2285_v13 = vand.u32 65535, %v2284_v45  ;;  %v3991_v45 = vpack.c.bf16 %v2946_v7, %v2945_v58 }
0x300c   :  { %v2288_v12 = vcvt.s32.f32 %v2286_v8  ;;  %v2287_v41 = vcvt.s32.f32 %v2285_v13  ;;  %3992 = vmatpush3.bf16.msra.mxu1 %v3991_v45 }
0x300d   :  { %3993 = vmatprep.subr.bf16.mxu1 %v4170_v3 }
0x300e   :  { %2289 = vmin.xlane.f32.xlu1 %v2288_v12 }
0x309b   :  { %v2290_v19 = vpop.xlane.xlu1 %2289 }
0x309c   :  { %vm2291_vm8 = vcmp.eq.f32.partialorder %v2288_v12, %v2290_v19  ;;  %v2296_v22 = vcvt.f32.s32 %v2290_v19 }
0x309d   :  { %v2292_v21 = vsel %vm2291_vm8, %v2287_v41, inf }
0x309e   :  { %2293 = vmin.xlane.f32.xlu0 %v2292_v21  ;;  %v2297_v24 = vshll.u32 %v2296_v22, 16 }
0x312b   :  { %v2294_v16 = vpop.xlane.xlu0 %2293 }
0x312c   :  { %v2295_v29 = vcvt.f32.s32 %v2294_v16 }
0x312e   :  { %v2298_v32 = vadd.s32 %v2297_v24, %v2295_v29 }
0x3130   :  { %vm2299_vm10 = vcmp.lt.s32.totalorder %v2298_v32, 7 }
0x3131   :  { %v5026_v10 = vsel %vm2299_vm10, %v2298_v32, 7 }
0x3132   :  { %v2334_v34 = vadd.s32 28, %v5026_v10  ;;  %v5031_v35 = vsel %vm2829_vm9, %v4957_v50, %v5026_v10 }
0x3134   :  { %vm2335_vm14 = vcmp.eq.s32.totalorder %v4296_v27, %v2334_v34 }
0x3135   :  { %v2944_v0 = vsel %vm2335_vm14, 1.0, %v4172_v6  ;;  %vm1352_vm14 = vcmp.eq.s32.totalorder %v4296_v27, %v4728_v2 }
0x3136   :  { %v2338_v40 = vsel %vm399_vm11, %v2944_v0, %v2184_v49 }
0x3137   :  { %3643 = vmatmul.mubr.f32.vlgmr.msra.gmra.mrb[18].mxu0 %v2338_v40 }
0x3138   :  { %3699 = vmatprep.mubr.msk.f32.mxu0 %vm4171_vm0, %v4172_v6 }
0x320a   :  { %v2405_v46 = vpop.f32.mrb[18].mxu0 }
0x320b   :  { %v2406_v47 = vadd.f32 %v4816_v28, %v2405_v46  ;;  %v3644_v51 = vpop.f32.mrb[19].mxu0 }
0x320d   :  { %v2409_v25 = vmul.f32 %v2406_v47, %v4305_v30 }
0x320f   :  { %4071 = vtanh.f32 %v2409_v25 }
0x3219   :  { %v4072_v54 = vpop.eup %4071 }
0x321a   :  { %v2411_v50 = vmul.f32 %v4072_v54, %v4305_v30 }
0x321c   :  { %v2412_v55 = vadd.f32 %v2411_v50, %v4309_v36 }
0x321e   :  { %2415 = vrot.lane.b32.xlu0 %v2412_v55, %s4174_s24  ;;  %v2413_v56 = vmul.f32 %v2412_v55, %v4971_v4  ;;  %v2948_v4 = vld [vmem:[%s5391_s6 + $0x138] sm:$0xff] }
0x321f   :  { %v3994_v8 = vpack.c.bf16 %v2948_v4, %v2947_v61 }
0x3221   :  { %3995 = vmatpush3.bf16.msra.mxu1 %v3994_v8 }
0x3222   :  { %3996 = vmatprep.subr.bf16.mxu1 %v4170_v3 }
0x3290   :  { %v2416_v1 = vpop.permute.xlu0 %2415 }
0x3291   :  { %v2418_v49 = vmul.f32 %v2416_v1, %v2412_v55 }
0x3293   :  { %2420 = vrot.lane.b32.xlu1 %v2418_v49, %s4175_s25 }
0x3305   :  { %v2421_v60 = vpop.permute.xlu1 %2420 }
0x3306   :  { %v5045_v63 = vadd.f32 %v2421_v60, %v2413_v56 }
0x3308   :  { %4073 = vtanh.f32 %v5045_v63 }
0x3312   :  { %v4074_v12 = vpop.eup %4073 }
0x3313   :  { %2426 = vrot.lane.b32.xlu1 %v4074_v12, %s4174_s24 }
0x3385   :  { %v2427_v13 = vpop.permute.xlu1 %2426 }
0x3386   :  { %v2429_v19 = vmul.f32 %v2427_v13, %v2412_v55 }
0x3388   :  { %2444 = vrot.lane.b32.xlu0 %v2429_v19, %s4175_s25 }
0x33fa   :  { %v2445_v41 = vpop.permute.xlu0 %2444 }
0x33fb   :  { %3654 = vmatmul.mubr.msk.f32.vlgmr.msra.gmra.mrb[20].mxu1 %vm161_vm2, %v2445_v41 }
0x33fc   :  { %3998 = vmatpush3.bf16.msra.mxu1 %v4366_v9  ;;  %3688 = vmatprep.mubr.msk.f32.mxu1 %vm4171_vm0, %v4172_v6  ;;  %v2950_v9 = vld [vmem:[%s5392_s7 + $0x9] ss:$0 sm:$0xff]  ;;  %vm2518_vm0 = vcmp.lt.s32.totalorder %v4296_v27, 4 }
0x33fd   :  { %3999 = vmatprep.subr.bf16.mxu1 %v4170_v3 }
0x3400   :  { %4001 = vmatpush3.bf16.msra.mxu1 %v4372_v11 }
0x3401   :  { %4002 = vmatprep.subr.bf16.mxu1 %v4170_v3 }
0x3404   :  { %4004 = vmatpush3.bf16.msra.mxu1 %v4382_v14 }
0x3405   :  { %4005 = vmatprep.subr.bf16.mxu1 %v4170_v3 }
0x3408   :  { %4007 = vmatpush3.bf16.msra.mxu1 %v4392_v17 }
0x3409   :  { %4008 = vmatprep.subr.bf16.mxu1 %v4170_v3 }
0x340c   :  { %4010 = vmatpush3.bf16.msra.mxu1 %v4402_v20  ;;  %v2952_v20 = vld [vmem:[%s5393_s8 + $0x12] sm:$0x3] }
0x340d   :  { %4011 = vmatprep.subr.bf16.mxu1 %v4170_v3 }
0x3410   :  { %4013 = vmatpush3.bf16.msra.mxu1 %v4412_v23 }
0x3411   :  { %4014 = vmatprep.subr.bf16.mxu1 %v4170_v3 }
0x3414   :  { %4016 = vmatpush3.bf16.msra.mxu1 %v4423_v33 }
0x3415   :  { %4017 = vmatprep.subr.bf16.mxu1 %v4170_v3 }
0x3418   :  { %4019 = vmatpush3.bf16.msra.mxu1 %v4433_v37 }
0x34ce   :  { %v2514_v11 = vpop.f32.mrb[20].mxu1 }
0x34cf   :  { %v2515_v14 = vadd.f32 %v2950_v9, %v2514_v11  ;;  %v3655_v17 = vpop.f32.mrb[21].mxu1  ;;  %v2956_v11 = vld [vmem:[%s5391_s6 + $0x150] sm:$0xff] }
0x34d1   :  { %v5091_v23 = vsel %vm2518_vm0, %v2515_v14, -1e+30 }
0x34d2   :  { %v2522_v33 = vadd.f32 %v2952_v20, %v5091_v23 }
0x34d4   :  { %v2523_v37 = vsel %vm2518_vm0, %v2522_v33, -1e+30 }
0x34d5   :  { %v2524_v21 = vsel %vm347_vm7, %v2523_v37, -inf }
0x34d6   :  { %2525 = vmax.xlane.f32.xlu1 %v2524_v21  ;;  %v1092_v21 = vsel %vm347_vm7, %v4647_v26, -inf }
0x3563   :  { %v2526_v22 = vpop.xlane.xlu1 %2525 }
0x3564   :  { %vm2527_vm15 = vcmp.ge.f32.partialorder %v2523_v37, %v2526_v22  ;;  %v608_v37 = vsel %vm347_vm7, %v4503_v15, -inf  ;;  %v1576_v22 = vsel %vm347_vm7, %v4793_v53, -inf }
0x3565   :  { %v2528_v16 = vsel %vm2527_vm15, %v4296_v27, 128  ;;  %vm1596_vm15 = vcmp.eq.s32.totalorder %v4296_v27, %v4801_v57 }
0x3566   :  { %v2529_v24 = vsel %vm347_vm7, %v2528_v16, 2147483647  ;;  %v2546_v16 = vsel %vm347_vm7, %v5091_v23, -inf }
0x3567   :  { %v2531_v29 = vshra.s32 %v2529_v24, 16  ;;  %v2530_v34 = vand.u32 65535, %v2529_v24 }
0x3569   :  { %v2533_v32 = vcvt.s32.f32 %v2531_v29  ;;  %v2532_v40 = vcvt.s32.f32 %v2530_v34  ;;  %v2959_v29 = vld [vmem:[%s5392_s7 + $0xa] ss:$0 sm:$0xff]  ;;  %s4176_s7 = smov [#allocation2]  }
0x356b   :  { %2534 = vmin.xlane.f32.xlu0 %v2533_v32 }
0x35f8   :  { %v2535_v0 = vpop.xlane.xlu0 %2534 }
0x35f9   :  { %vm2536_vm1 = vcmp.eq.f32.partialorder %v2533_v32, %v2535_v0  ;;  %v2541_v47 = vcvt.f32.s32 %v2535_v0 }
0x35fa   :  { %v2537_v46 = vsel %vm2536_vm1, %v2532_v40, inf  ;;  %v2961_v40 = vld [vmem:[%s5393_s8 + $0x14] sm:$0x3]  ;;  %vm2080_vm1 = vcmp.eq.s32.totalorder %v4296_v27, %v4952_v43  ;;  %s2846_s8 = sshll.u32 %s4176_s7, 4  ;;  %s2847_s8 = int_to_ptr.vmem [resolvable:$true] %s2846_s8 }
0x35fb   :  { %2538 = vmin.xlane.f32.xlu0 %v2537_v46  ;;  %v2542_v25 = vshll.u32 %v2541_v47, 16  ;;  %s4146_s14 = scalar_lea.vmem %s2847_s8, 32  ;;  %p4151_p1 = scmp.lt.s32.totalorder %s2847_s8, %s2847_s8 }
0x35fc   :  { %p4147_p0 = scmp.ne.s32.totalorder %s2847_s8, %s4146_s14  ;;  %p4152_p2 = scmp.lt.s32.totalorder %s4146_s14, %s4146_s14 }
0x35fe   :  { %p4153_p3 = por %p4152_p2, %p4151_p1 }
0x3600   :  { %p4154_p4 = pnand %p4153_p3, %p4147_p0 }
0x3688   :  { %v2539_v51 = vpop.xlane.xlu0 %2538 }
0x3689   :  { %v2540_v54 = vcvt.f32.s32 %v2539_v51 }
0x368b   :  { %v2543_v50 = vadd.s32 %v2542_v25, %v2540_v54 }
0x368d   :  { %vm2544_vm8 = vcmp.lt.s32.totalorder %v2543_v50, 3 }
0x368e   :  { %v5099_v55 = vsel %vm2544_vm8, %v2543_v50, 3  ;;  %v370_v50 = vsel %vm347_vm7, %v4349_v59, -inf }
0x368f   :  { %v2575_v1 = vadd.s32 36, %v5099_v55  ;;  %v5104_v49 = vsel %vm2831_vm5, %v5031_v35, %v5099_v55  ;;  %vm2321_vm5 = vcmp.eq.s32.totalorder %v4296_v27, %v5026_v10 }
0x3691   :  { %vm2576_vm9 = vcmp.eq.s32.totalorder %v4296_v27, %v2575_v1 }
0x3692   :  { %v2953_v56 = vsel %vm2576_vm9, 1.0, %v4172_v6 }
0x3693   :  { %v2579_v60 = vsel %vm399_vm11, %v2953_v56, %v2429_v19  ;;  %v852_v56 = vsel %vm347_vm7, %v4573_v18, -inf  ;;  %vm628_vm11 = vcmp.eq.s32.totalorder %v4296_v27, %v4511_v42 }
0x3694   :  { %3689 = vmatmul.mubr.f32.vlgmr.msra.gmra.mrb[22].mxu1 %v2579_v60 }
0x3767   :  { %v2646_v58 = vpop.f32.mrb[22].mxu1 }
0x3768   :  { %v2647_v7 = vadd.f32 %v4816_v28, %v2646_v58  ;;  %v3690_v61 = vpop.f32.mrb[23].mxu1  ;;  %v1332_v58 = vsel %vm347_vm7, %v4720_v39, -inf }
0x3769   :  { %v2301_v61 = vsel %vm347_vm7, %v5018_v62, -inf }
0x376a   :  { %v2650_v45 = vmul.f32 %v2647_v7, %v4305_v30  ;;  %v1820_v7 = vsel %vm347_vm7, %v4871_v5, -inf }
0x376c   :  { %4075 = vtanh.f32 %v2650_v45 }
0x3776   :  { %v4076_v4 = vpop.eup %4075 }
0x3777   :  { %v2652_v8 = vmul.f32 %v4076_v4, %v4305_v30  ;;  %v2954_v30 = vld [vmem:[%s5391_s6 + $0x140] sm:$0xff] }
0x3779   :  { %v2653_v35 = vadd.f32 %v2652_v8, %v4309_v36  ;;  %v2955_v36 = vld [vmem:[%s5391_s6 + $0x148] sm:$0xff] }
0x377a   :  { %v4021_v14 = vpack.c.bf16 %v2955_v36, %v2954_v30 }
0x377b   :  { %2656 = vrot.lane.b32.xlu1 %v2653_v35, %s4174_s24  ;;  %v2654_v19 = vmul.f32 %v2653_v35, %v5045_v63  ;;  %v2957_v63 = vld [vmem:[%s5391_s6 + $0x158] sm:$0xff] }
0x377c   :  { %4022 = vmatpush3.bf16.msra.mxu0 %v4021_v14  ;;  %v4024_v17 = vpack.c.bf16 %v2957_v63, %v2956_v11 }
0x377d   :  { %4023 = vmatprep.subr.bf16.mxu0 %v4170_v3  ;;  %v2060_v3 = vsel %vm347_vm7, %v4944_v31, -inf }
0x3780   :  { %4025 = vmatpush3.bf16.msra.mxu0 %v4024_v17 }
0x37ed   :  { %v2657_v12 = vpop.permute.xlu1 %2656 }
0x37ee   :  { %v2659_v13 = vmul.f32 %v2657_v12, %v2653_v35 }
0x37f0   :  { %2661 = vrot.lane.b32.xlu0 %v2659_v13, %s4175_s25 }
0x3862   :  { %v2662_v41 = vpop.permute.xlu0 %2661 }
0x3863   :  { %v2664_v9 = vadd.f32 %v2662_v41, %v2654_v19 }
0x3865   :  { %4077 = vtanh.f32 %v2664_v9 }
0x386f   :  { %v4078_v28 = vpop.eup %4077 }
0x3870   :  { %2667 = vrot.lane.b32.xlu1 %v4078_v28, %s4174_s24 }
0x38e2   :  { %v2668_v20 = vpop.permute.xlu1 %2667 }
0x38e3   :  { %v2670_v33 = vmul.f32 %v2668_v20, %v2653_v35 }
0x38e5   :  { %2685 = vrot.lane.b32.xlu1 %v2670_v33, %s4175_s25 }
0x3909   :  { %609 = vmax.xlane.f32.xlu1 %v608_v37 }
0x390d   :  { %1093 = vmax.xlane.f32.xlu1 %v1092_v21 }
0x3911   :  { %1577 = vmax.xlane.f32.xlu1 %v1576_v22 }
0x3915   :  { %2061 = vmax.xlane.f32.xlu1 %v2060_v3 }
0x3919   :  { %2547 = vmax.xlane.f32.xlu1 %v2546_v16 }
0x3957   :  { %v2686_v24 = vpop.permute.xlu1 %2685 }
0x3958   :  { %3700 = vmatmul.mubr.msk.f32.vlgmr.msra.gmra.mrb[20].mxu0 %vm161_vm2, %v2686_v24 }
0x3996   :  { %v610_v54 = vpop.xlane.xlu1 %609 }
0x3997   :  { %v5159_v1 = vsub.f32 %v4503_v15, %v610_v54 }
0x3999   :  { %v612_v60 = vmul.f32 1.442695, %v5159_v1 }
0x399a   :  { %v1094_v8 = vpop.xlane.xlu1 %1093 }
0x399b   :  { %4079 = vpow2.f32 %v612_v60  ;;  %v5178_v19 = vsub.f32 %v4647_v26, %v1094_v8 }
0x399d   :  { %v1096_v14 = vmul.f32 1.442695, %v5178_v19 }
0x399e   :  { %v1578_v35 = vpop.xlane.xlu1 %1577 }
0x399f   :  { %v5191_v63 = vsub.f32 %v4793_v53, %v1578_v35 }
0x39a2   :  { %v2062_v36 = vpop.xlane.xlu1 %2061 }
0x39a3   :  { %v5200_v33 = vsub.f32 %v4944_v31, %v2062_v36 }
0x39a5   :  { %v5172_v45 = vpop.eup %4079  ;;  %v2064_v3 = vmul.f32 1.442695, %v5200_v33 }
0x39a6   :  { %v614_v4 = vsel %vm347_vm7, %v5172_v45, 0.0  ;;  %v2548_v21 = vpop.xlane.xlu1 %2547 }
0x3a2b   :  { %v2755_v32 = vpop.f32.mrb[20].mxu0 }
0x3a2c   :  { %v2756_v34 = vadd.f32 %v2959_v29, %v2755_v32  ;;  %v3701_v0 = vpop.f32.mrb[21].mxu0 }
0x3a2e   :  { %v5150_v46 = vsel %vm342_vm6, %v2756_v34, -1e+30 }
0x3a2f   :  { %v2762_v47 = vadd.f32 %v2961_v40, %v5150_v46  ;;  %v2786_v15 = vsel %vm347_vm7, %v5150_v46, -inf }
0x3a31   :  { %v2763_v51 = vsel %vm342_vm6, %v2762_v47, -1e+30 }
0x3a32   :  { %v2764_v25 = vsel %vm347_vm7, %v2763_v51, -inf }
0x3a33   :  { %2765 = vmax.xlane.f32.xlu0 %v2764_v25 }
0x3a37   :  { %371 = vmax.xlane.f32.xlu0 %v370_v50 }
0x3a3b   :  { %853 = vmax.xlane.f32.xlu0 %v852_v56 }
0x3a3f   :  { %1333 = vmax.xlane.f32.xlu0 %v1332_v58 }
0x3a43   :  { %1821 = vmax.xlane.f32.xlu0 %v1820_v7 }
0x3a47   :  { %2302 = vmax.xlane.f32.xlu0 %v2301_v61 }
0x3a4b   :  { %2787 = vmax.xlane.f32.xlu0 %v2786_v15 }
0x3a4f   :  { %615 = vadd.xlane.f32.xlu0 %v614_v4 }
0x3ac0   :  { %v2766_v12 = vpop.xlane.xlu0 %2765 }
0x3ac1   :  { %vm2767_vm2 = vcmp.ge.f32.partialorder %v2763_v51, %v2766_v12 }
0x3ac2   :  { %v2768_v13 = vsel %vm2767_vm2, %v4296_v27, 128 }
0x3ac3   :  { %v5181_v41 = vsel %vm347_vm7, %v2768_v13, 2147483647 }
0x3ac4   :  { %v372_v9 = vpop.xlane.xlu0 %371  ;;  %v2771_v28 = vshra.s32 %v5181_v41, 16 }
0x3ac5   :  { %v5185_v30 = vsub.f32 %v4349_v59, %v372_v9  ;;  %v1580_v59 = vmul.f32 1.442695, %v5191_v63 }
0x3ac6   :  { %v5187_v11 = vcvt.s32.f32 %v2771_v28 }
0x3ac7   :  { %v374_v26 = vmul.f32 1.442695, %v5185_v30 }
0x3ac8   :  { %2774 = vmin.xlane.f32.xlu1 %v5187_v11  ;;  %v854_v17 = vpop.xlane.xlu0 %853 }
0x3ac9   :  { %4081 = vpow2.f32 %v374_v26  ;;  %v5196_v20 = vsub.f32 %v4573_v18, %v854_v17  ;;  %v5208_v18 = vsub.f32 %v5091_v23, %v2548_v21 }
0x3aca   :  { %4083 = vpow2.f32 %v1096_v14 }
0x3acb   :  { %v856_v37 = vmul.f32 1.442695, %v5196_v20  ;;  %v2550_v32 = vmul.f32 1.442695, %v5208_v18 }
0x3acc   :  { %v1334_v53 = vpop.xlane.xlu0 %1333 }
0x3acd   :  { %4085 = vpow2.f32 %v856_v37  ;;  %v5204_v22 = vsub.f32 %v4720_v39, %v1334_v53 }
0x3ace   :  { %4087 = vpow2.f32 %v1580_v59 }
0x3acf   :  { %v1336_v16 = vmul.f32 1.442695, %v5204_v22 }
0x3ad0   :  { %v1822_v24 = vpop.xlane.xlu0 %1821 }
0x3ad1   :  { %4089 = vpow2.f32 %v1336_v16  ;;  %v5212_v31 = vsub.f32 %v4871_v5, %v1822_v24 }
0x3ad2   :  { %4091 = vpow2.f32 %v2064_v3 }
0x3ad3   :  { %v5214_v29 = vpop.eup %4081  ;;  %v1824_v39 = vmul.f32 1.442695, %v5212_v31 }
0x3ad4   :  { %v2303_v34 = vpop.xlane.xlu0 %2302  ;;  %v376_v0 = vsel %vm347_vm7, %v5214_v29, 0.0  ;;  %v5220_v23 = vpop.eup %4083 }
0x3ad5   :  { %4093 = vpow2.f32 %v1824_v39  ;;  %v5223_v40 = vsub.f32 %v5018_v62, %v2303_v34  ;;  %377 = vadd.xlane.f32.xlu1 %v376_v0  ;;  %v1098_v54 = vsel %vm347_vm7, %v5220_v23, 0.0 }
0x3ad6   :  { %4095 = vpow2.f32 %v2550_v32  ;;  %v2770_v32 = vand.u32 65535, %v5181_v41 }
0x3ad7   :  { %v5225_v5 = vpop.eup %4085  ;;  %v2305_v47 = vmul.f32 1.442695, %v5223_v40 }
0x3ad8   :  { %v2788_v51 = vpop.xlane.xlu0 %2787  ;;  %v858_v25 = vsel %vm347_vm7, %v5225_v5, 0.0  ;;  %v5232_v50 = vpop.eup %4087 }
0x3ad9   :  { %4097 = vpow2.f32 %v2305_v47  ;;  %v5235_v56 = vsub.f32 %v5150_v46, %v2788_v51  ;;  %859 = vadd.xlane.f32.xlu0 %v858_v25  ;;  %1099 = vadd.xlane.f32.xlu1 %v1098_v54  ;;  %v1582_v61 = vsel %vm347_vm7, %v5232_v50, 0.0 }
0x3adb   :  { %v5237_v62 = vpop.eup %4089  ;;  %v2790_v60 = vmul.f32 1.442695, %v5235_v56 }
0x3adc   :  { %v616_v58 = vpop.xlane.xlu0 %615  ;;  %v1338_v7 = vsel %vm347_vm7, %v5237_v62, 0.0  ;;  %v5244_v15 = vpop.eup %4091 }
0x3add   :  { %4099 = vpow2.f32 %v2790_v60  ;;  %1339 = vadd.xlane.f32.xlu0 %v1338_v7  ;;  %1583 = vadd.xlane.f32.xlu1 %v1582_v61  ;;  %v2066_v8 = vsel %vm347_vm7, %v5244_v15, 0.0 }
0x3ade   :  { %4101 = vlog2.f32 %v616_v58 }
0x3adf   :  { %v5246_v46 = vpop.eup %4093  ;;  %4103 = vrcp.f32 %v616_v58 }
0x3ae0   :  { %v1826_v4 = vsel %vm347_vm7, %v5246_v46, 0.0  ;;  %v5252_v35 = vpop.eup %4095 }
0x3ae1   :  { %1827 = vadd.xlane.f32.xlu0 %v1826_v4  ;;  %2067 = vadd.xlane.f32.xlu1 %v2066_v8  ;;  %v2552_v9 = vsel %vm347_vm7, %v5252_v35, 0.0 }
0x3ae3   :  { %v5254_v12 = vpop.eup %4097 }
0x3ae4   :  { %v2307_v13 = vsel %vm347_vm7, %v5254_v12, 0.0 }
0x3ae5   :  { %2308 = vadd.xlane.f32.xlu0 %v2307_v13  ;;  %2553 = vadd.xlane.f32.xlu1 %v2552_v9 }
0x3ae7   :  { %v5260_v28 = vpop.eup %4099 }
0x3ae8   :  { %v4102_v36 = vpop.eup %4101  ;;  %v2792_v14 = vsel %vm347_vm7, %v5260_v28, 0.0 }
0x3ae9   :  { %v4104_v26 = vpop.eup %4103  ;;  %v618_v17 = vmul.f32 0.6931472, %v4102_v36  ;;  %2793 = vadd.xlane.f32.xlu0 %v2792_v14 }
0x3aea   :  { %v621_v37 = vmul.f32 %v4104_v26, %v5172_v45 }
0x3aeb   :  { %v619_v59 = vsub.f32 %v5159_v1, %v618_v17  ;;  %v2772_v1 = vcvt.s32.f32 %v2770_v32 }
0x3aed   :  { %v622_v21 = vmul.f32 %v621_v37, %v619_v59  ;;  %v629_v16 = vsel %vm628_vm11, %v619_v59, 0.0 }
0x3aee   :  { %v630_v24 = vsel %vm347_vm7, %v629_v16, 0.0 }
0x3aef   :  { %v623_v53 = vsel %vm580_vm13, %v622_v21, 0.0  ;;  %vm1112_vm13 = vcmp.eq.s32.totalorder %v4296_v27, %v4655_v52 }
0x3af0   :  { %v624_v3 = vsel %vm347_vm7, %v623_v53, 0.0 }
0x3af1   :  { %625 = vadd.xlane.f32.xlu0 %v624_v3 }
0x3af5   :  { %631 = vadd.xlane.f32.xlu0 %v630_v24 }
0x3b55   :  { %v5273_v39 = vpop.xlane.xlu1 %2774 }
0x3b56   :  { %vm2776_vm10 = vcmp.eq.f32.partialorder %v5187_v11, %v5273_v39 }
0x3b57   :  { %v2777_v45 = vsel %vm2776_vm10, %v2772_v1, inf }
0x3b58   :  { %2778 = vmin.xlane.f32.xlu1 %v2777_v45 }
0x3b62   :  { %v378_v34 = vpop.xlane.xlu1 %377 }
0x3b63   :  { %4105 = vlog2.f32 %v378_v34 }
0x3b64   :  { %4107 = vrcp.f32 %v378_v34 }
0x3b66   :  { %v860_v0 = vpop.xlane.xlu0 %859  ;;  %v1100_v42 = vpop.xlane.xlu1 %1099 }
0x3b67   :  { %4109 = vlog2.f32 %v860_v0 }
0x3b68   :  { %4111 = vrcp.f32 %v860_v0 }
0x3b69   :  { %4113 = vlog2.f32 %v1100_v42 }
0x3b6a   :  { %4115 = vrcp.f32 %v1100_v42  ;;  %v1340_v47 = vpop.xlane.xlu0 %1339  ;;  %v1584_v51 = vpop.xlane.xlu1 %1583 }
0x3b6b   :  { %4117 = vlog2.f32 %v1340_v47 }
0x3b6c   :  { %4119 = vrcp.f32 %v1340_v47 }
0x3b6d   :  { %v4106_v41 = vpop.eup %4105  ;;  %4121 = vlog2.f32 %v1584_v51 }
0x3b6e   :  { %v4108_v25 = vpop.eup %4107  ;;  %v380_v54 = vmul.f32 0.6931472, %v4106_v41  ;;  %4123 = vrcp.f32 %v1584_v51  ;;  %v1828_v11 = vpop.xlane.xlu0 %1827 }
0x3b6f   :  { %v2068_v60 = vpop.xlane.xlu1 %2067  ;;  %4125 = vlog2.f32 %v1828_v11  ;;  %v383_v7 = vmul.f32 %v4108_v25, %v5214_v29 }
0x3b70   :  { %v381_v58 = vsub.f32 %v5185_v30, %v380_v54  ;;  %4127 = vlog2.f32 %v2068_v60 }
0x3b71   :  { %v4110_v61 = vpop.eup %4109  ;;  %4129 = vrcp.f32 %v1828_v11 }
0x3b72   :  { %v4112_v4 = vpop.eup %4111  ;;  %v862_v8 = vmul.f32 0.6931472, %v4110_v61  ;;  %v2309_v13 = vpop.xlane.xlu0 %2308  ;;  %v391_v9 = vsel %vm390_vm12, %v381_v58, 0.0  ;;  %v384_v36 = vmul.f32 %v383_v7, %v381_v58  ;;  %vm872_vm12 = vcmp.eq.s32.totalorder %v4296_v27, %v4583_v48 }
0x3b73   :  { %v4114_v14 = vpop.eup %4113  ;;  %4131 = vlog2.f32 %v2309_v13  ;;  %v392_v26 = vsel %vm347_vm7, %v391_v9, 0.0  ;;  %v2554_v29 = vpop.xlane.xlu1 %2553  ;;  %v865_v21 = vmul.f32 %v4112_v4, %v5225_v5 }
0x3b74   :  { %v4116_v17 = vpop.eup %4115  ;;  %v863_v30 = vsub.f32 %v5196_v20, %v862_v8  ;;  %v1102_v59 = vmul.f32 0.6931472, %v4114_v14  ;;  %393 = vadd.xlane.f32.xlu0 %v392_v26  ;;  %v385_v37 = vsel %vm342_vm6, %v384_v36, 0.0  ;;  %4133 = vrcp.f32 %v2068_v60 }
0x3b75   :  { %v4118_v53 = vpop.eup %4117  ;;  %v386_v3 = vsel %vm347_vm7, %v385_v37, 0.0  ;;  %4135 = vlog2.f32 %v2554_v29  ;;  %v1105_v20 = vmul.f32 %v4116_v17, %v5220_v23 }
0x3b76   :  { %v4120_v16 = vpop.eup %4119  ;;  %v1103_v24 = vsub.f32 %v5178_v19, %v1102_v59  ;;  %v1342_v32 = vmul.f32 0.6931472, %v4118_v53  ;;  %387 = vadd.xlane.f32.xlu1 %v386_v3  ;;  %v866_v1 = vmul.f32 %v865_v21, %v863_v30  ;;  %v2794_v51 = vpop.xlane.xlu0 %2793  ;;  %v873_v54 = vsel %vm872_vm12, %v863_v30, 0.0 }
0x3b77   :  { %v4122_v45 = vpop.eup %4121  ;;  %v1345_v19 = vmul.f32 %v4120_v16, %v5237_v62  ;;  %4137 = vrcp.f32 %v2309_v13  ;;  %v874_v61 = vsel %vm347_vm7, %v873_v54, 0.0 }
0x3b78   :  { %v4124_v34 = vpop.eup %4123  ;;  %v1343_v5 = vsub.f32 %v5204_v22, %v1342_v32  ;;  %v1586_v0 = vmul.f32 0.6931472, %v4122_v45  ;;  %v867_v42 = vsel %vm824_vm4, %v866_v1, 0.0  ;;  %v1106_v25 = vmul.f32 %v1105_v20, %v1103_v24 }
0x3b79   :  { %v4126_v47 = vpop.eup %4125  ;;  %v868_v41 = vsel %vm347_vm7, %v867_v42, 0.0  ;;  %v1589_v62 = vmul.f32 %v4124_v34, %v5232_v50  ;;  %4139 = vlog2.f32 %v2794_v51  ;;  %v1113_v9 = vsel %vm1112_vm13, %v1103_v24, 0.0 }
0x3b7a   :  { %v1587_v23 = vsub.f32 %v5191_v63, %v1586_v0  ;;  %v1830_v11 = vmul.f32 0.6931472, %v4126_v47  ;;  %869 = vadd.xlane.f32.xlu1 %v868_v41  ;;  %v1346_v48 = vmul.f32 %v1345_v19, %v1343_v5  ;;  %v4128_v60 = vpop.eup %4127  ;;  %v1107_v22 = vsel %vm342_vm6, %v1106_v25, 0.0 }
0x3b7b   :  { %v4130_v58 = vpop.eup %4129  ;;  %v1108_v7 = vsel %vm347_vm7, %v1107_v22, 0.0  ;;  %v2070_v13 = vmul.f32 0.6931472, %v4128_v60  ;;  %4141 = vrcp.f32 %v2554_v29  ;;  %v1114_v17 = vsel %vm347_vm7, %v1113_v9, 0.0 }
0x3b7c   :  { %v1347_v63 = vsel %vm342_vm6, %v1346_v48, 0.0  ;;  %v1831_v8 = vsub.f32 %v5212_v31, %v1830_v11  ;;  %1109 = vadd.xlane.f32.xlu0 %v1108_v7  ;;  %v1590_v36 = vmul.f32 %v1589_v62, %v1587_v23  ;;  %v1833_v14 = vmul.f32 %v4130_v58, %v5246_v46 }
0x3b7d   :  { %v4132_v4 = vpop.eup %4131  ;;  %v1348_v50 = vsel %vm347_vm7, %v1347_v63, 0.0  ;;  %v1353_v30 = vsel %vm1352_vm14, %v1343_v5, 0.0  ;;  %v2071_v31 = vsub.f32 %v5200_v33, %v2070_v13  ;;  %4143 = vrcp.f32 %v2794_v51 }
0x3b7e   :  { %875 = vadd.xlane.f32.xlu1 %v874_v61  ;;  %v4134_v26 = vpop.eup %4133  ;;  %v2311_v37 = vmul.f32 0.6931472, %v4132_v4  ;;  %v1591_v29 = vsel %vm824_vm4, %v1590_v36, 0.0  ;;  %v1834_v21 = vmul.f32 %v1833_v14, %v1831_v8  ;;  %v1354_v16 = vsel %vm347_vm7, %v1353_v30, 0.0 }
0x3b7f   :  { %v4136_v59 = vpop.eup %4135  ;;  %v2073_v46 = vmul.f32 %v4134_v26, %v5244_v15  ;;  %v1592_v3 = vsel %vm347_vm7, %v1591_v29, 0.0  ;;  %v1597_v24 = vsel %vm1596_vm15, %v1587_v23, 0.0  ;;  %vm1840_vm4 = vcmp.eq.s32.totalorder %v4296_v27, %v4879_v38  ;;  %v626_v26 = vpop.xlane.xlu0 %625 }
0x3b80   :  { %1349 = vadd.xlane.f32.xlu0 %v1348_v50  ;;  %v2312_v33 = vsub.f32 %v5223_v40, %v2311_v37  ;;  %v2556_v32 = vmul.f32 0.6931472, %v4136_v59  ;;  %v1835_v1 = vsel %vm342_vm6, %v1834_v21, 0.0  ;;  %v1598_v5 = vsel %vm347_vm7, %v1597_v24, 0.0 }
0x3b81   :  { %v4138_v53 = vpop.eup %4137  ;;  %v2074_v45 = vmul.f32 %v2073_v46, %v2071_v31  ;;  %v1836_v15 = vsel %vm347_vm7, %v1835_v1, 0.0  ;;  %v1841_v47 = vsel %vm1840_vm4, %v1831_v8, 0.0  ;;  %v2081_v23 = vsel %vm2080_vm1, %v2071_v31, 0.0 }
0x3b82   :  { %1115 = vadd.xlane.f32.xlu1 %v1114_v17  ;;  %v2314_v57 = vmul.f32 %v4138_v53, %v5254_v12  ;;  %v2557_v40 = vsub.f32 %v5208_v18, %v2556_v32  ;;  %v1842_v18 = vsel %vm347_vm7, %v1841_v47, 0.0  ;;  %v2082_v48 = vsel %vm347_vm7, %v2081_v23, 0.0 }
0x3b83   :  { %v4140_v20 = vpop.eup %4139  ;;  %v2075_v42 = vsel %vm342_vm6, %v2074_v45, 0.0  ;;  %v2322_v22 = vsel %vm2321_vm5, %v2312_v33, 0.0  ;;  %v2781_v63 = vcvt.f32.s32 %v5273_v39  ;;  %v632_v17 = vpop.xlane.xlu0 %631 }
0x3b84   :  { %1593 = vadd.xlane.f32.xlu0 %v1592_v3  ;;  %v2796_v0 = vmul.f32 0.6931472, %v4140_v20  ;;  %v2315_v19 = vmul.f32 %v2314_v57, %v2312_v33  ;;  %v2076_v41 = vsel %vm347_vm7, %v2075_v42, 0.0  ;;  %v2323_v58 = vsel %vm347_vm7, %v2322_v22, 0.0 }
0x3b85   :  { %v4142_v34 = vpop.eup %4141  ;;  %v2782_v8 = vshll.u32 %v2781_v63, 16 }
0x3b86   :  { %1355 = vadd.xlane.f32.xlu1 %v1354_v16  ;;  %v2559_v12 = vmul.f32 %v4142_v34, %v5252_v35  ;;  %v2797_v38 = vsub.f32 %v5235_v56, %v2796_v0  ;;  %v2316_v25 = vsel %vm2273_vm3, %v2315_v19, 0.0  ;;  %vm2566_vm3 = vcmp.eq.s32.totalorder %v4296_v27, %v5099_v55 }
0x3b87   :  { %v4144_v51 = vpop.eup %4143  ;;  %v2317_v35 = vsel %vm347_vm7, %v2316_v25, 0.0  ;;  %v2567_v7 = vsel %vm2566_vm3, %v2557_v40, 0.0 }
0x3b88   :  { %1837 = vadd.xlane.f32.xlu0 %v1836_v15  ;;  %v2560_v54 = vmul.f32 %v2559_v12, %v2557_v40  ;;  %v2799_v11 = vmul.f32 %v4144_v51, %v5260_v28  ;;  %v2568_v10 = vsel %vm347_vm7, %v2567_v7, 0.0 }
0x3b8a   :  { %1599 = vadd.xlane.f32.xlu1 %v1598_v5  ;;  %v2561_v60 = vsel %vm2518_vm0, %v2560_v54, 0.0  ;;  %v2800_v56 = vmul.f32 %v2799_v11, %v2797_v38  ;;  %vm2833_vm0 = vcmask 80896  }
0x3b8b   :  { %v2562_v62 = vsel %vm347_vm7, %v2561_v60, 0.0 }
0x3b8c   :  { %2077 = vadd.xlane.f32.xlu0 %v2076_v41  ;;  %v2801_v28 = vsel %vm342_vm6, %v2800_v56, 0.0  ;;  %vm2835_vm6 = vcmask 82944  }
0x3b8d   :  { %v2802_v61 = vsel %vm347_vm7, %v2801_v28, 0.0 }
0x3b8e   :  { %1843 = vadd.xlane.f32.xlu1 %v1842_v18 }
0x3b90   :  { %2318 = vadd.xlane.f32.xlu0 %v2317_v35 }
0x3b92   :  { %2083 = vadd.xlane.f32.xlu1 %v2082_v48 }
0x3b94   :  { %2563 = vadd.xlane.f32.xlu0 %v2562_v62 }
0x3b96   :  { %2324 = vadd.xlane.f32.xlu1 %v2323_v58 }
0x3b98   :  { %2803 = vadd.xlane.f32.xlu0 %v2802_v61 }
0x3b9a   :  { %2569 = vadd.xlane.f32.xlu1 %v2568_v10 }
0x3be5   :  { %v2779_v4 = vpop.xlane.xlu1 %2778 }
0x3be6   :  { %v2780_v13 = vcvt.f32.s32 %v2779_v4 }
0x3be8   :  { %v2783_v9 = vadd.s32 %v2782_v8, %v2780_v13 }
0x3bea   :  { %vm2784_vm8 = vcmp.lt.s32.totalorder %v2783_v9, 1 }
0x3beb   :  { %v2785_v36 = vsel %vm2784_vm8, %v2783_v9, 1 }
0x3bec   :  { %vm2806_vm9 = vcmp.eq.s32.totalorder %v4296_v27, %v2785_v36  ;;  %v2834_v55 = vsel %vm2833_vm0, %v5104_v49, %v2785_v36 }
0x3bed   :  { %v2807_v50 = vsel %vm2806_vm9, %v2797_v38, 0.0  ;;  %2836 = vst.msk [vmem:[#allocation2] sm:$0x3] %vm2835_vm6, %v2834_v55 }
0x3bee   :  { %v2808_v14 = vsel %vm347_vm7, %v2807_v50, 0.0 }
0x3bef   :  { %2809 = vadd.xlane.f32.xlu1 %v2808_v14 }
0x3c03   :  { %v388_v39 = vpop.xlane.xlu1 %387 }
0x3c04   :  { %4157 = shalt.err (!%p4154_p4)
}
0x3c05   :  { %s4158_s17 = scalar_lea.hbm %s5394_s9, 32 }
0x3c06   :  { %p4159_p5 = scmp.ne.s32.totalorder %s5394_s9, %s4158_s17  ;;  %p4162_p6 = scmp.lt.u32.totalorder %s4158_s17, %s5394_s9 }
0x3c08   :  { %p4164_p7 = pnand %p4162_p6, %p4159_p5 }
0x3c0a   :  { %4167 = shalt.err (!%p4164_p7)
}
0x3c0b   :  { %2849 = dma.vmem_to_hbm [thread:$0]  %s2847_s8, 32, %s5394_s9, [#allocation3]   ;;  %v394_v27 = vpop.xlane.xlu0 %393  ;;  %v870_v49 = vpop.xlane.xlu1 %869  ;;  %vm633_vm7 = vcmp.ne.s32.totalorder %v4437_v44, 0  ;;  %vm1357_vm2 = vcmp.ne.s32.totalorder %v4655_v52, 0  ;;  %v627_v21 = vsub.f32 0.0, %v626_v26  ;;  %vm1601_vm11 = vcmp.ne.s32.totalorder %v4728_v2, 0 }
0x3c0c   :  { %v2877_v37 = vsel %vm633_vm7, 1.0, %v4172_v6  ;;  %v2905_v29 = vsel %vm1357_vm2, 1.0, %v4172_v6  ;;  %v871_v46 = vsub.f32 0.0, %v870_v49  ;;  %v389_v24 = vsub.f32 0.0, %v388_v39 }
0x3c0d   :  { %v636_v3 = vmul.f32 %v2877_v37, %v632_v17  ;;  %v1360_v33 = vmul.f32 %v2905_v29, %v2877_v37  ;;  %v2915_v44 = vsel %vm1601_vm11, 1.0, %v4172_v6  ;;  %v638_v52 = vmul.f32 %v2877_v37, %v627_v21 }
0x3c0e   :  { %v879_v20 = vmul.f32 %v2877_v37, %v871_v46  ;;  %vm2326_vm10 = vcmp.ne.s32.totalorder %v4952_v43, 0  ;;  %vm2837_vm12 = vcmask 1024  }
0x3c0f   :  { %v1110_v30 = vpop.xlane.xlu0 %1109  ;;  %v876_v59 = vpop.xlane.xlu1 %875  ;;  %v637_v32 = vadd.f32 %v636_v3, %v394_v27  ;;  %v639_v5 = vadd.f32 %v638_v52, %v389_v24  ;;  %v1604_v0 = vmul.f32 %v2915_v44, %v1360_v33  ;;  %v2943_v62 = vsel %vm2326_vm10, 1.0, %v4172_v6 }
0x3c10   :  { %v877_v16 = vmul.f32 %v2877_v37, %v876_v59  ;;  %v1111_v40 = vsub.f32 0.0, %v1110_v30  ;;  %v2329_v63 = vmul.f32 %v2943_v62, %v1360_v33 }
0x3c11   :  { %v880_v2 = vadd.f32 %v879_v20, %v639_v5 }
0x3c12   :  { %v878_v34 = vadd.f32 %v877_v16, %v637_v32  ;;  %v1119_v38 = vmul.f32 %v2877_v37, %v1111_v40 }
0x3c13   :  { %v1350_v31 = vpop.xlane.xlu0 %1349  ;;  %v1116_v53 = vpop.xlane.xlu1 %1115 }
0x3c14   :  { %v1117_v45 = vmul.f32 %v2877_v37, %v1116_v53  ;;  %v1351_v47 = vsub.f32 0.0, %v1350_v31  ;;  %v1120_v23 = vadd.f32 %v1119_v38, %v880_v2 }
0x3c16   :  { %v1118_v42 = vadd.f32 %v1117_v45, %v878_v34  ;;  %v1363_v11 = vmul.f32 %v1360_v33, %v1351_v47 }
0x3c17   :  { %v1594_v1 = vpop.xlane.xlu0 %1593  ;;  %v1356_v57 = vpop.xlane.xlu1 %1355 }
0x3c18   :  { %v1361_v15 = vmul.f32 %v1360_v33, %v1356_v57  ;;  %v1595_v18 = vsub.f32 0.0, %v1594_v1  ;;  %v1364_v7 = vadd.f32 %v1363_v11, %v1120_v23 }
0x3c1a   :  { %v1362_v51 = vadd.f32 %v1361_v15, %v1118_v42  ;;  %v1607_v56 = vmul.f32 %v1604_v0, %v1595_v18 }
0x3c1b   :  { %v1838_v19 = vpop.xlane.xlu0 %1837  ;;  %v1600_v12 = vpop.xlane.xlu1 %1599 }
0x3c1c   :  { %v1605_v41 = vmul.f32 %v1604_v0, %v1600_v12  ;;  %v1839_v35 = vsub.f32 0.0, %v1838_v19  ;;  %v1608_v4 = vadd.f32 %v1607_v56, %v1364_v7 }
0x3c1e   :  { %v1606_v54 = vadd.f32 %v1605_v41, %v1362_v51  ;;  %v1847_v61 = vmul.f32 %v1839_v35, %v1604_v0 }
0x3c1f   :  { %v2078_v25 = vpop.xlane.xlu0 %2077  ;;  %v1844_v48 = vpop.xlane.xlu1 %1843 }
0x3c20   :  { %v1845_v60 = vmul.f32 %v1844_v48, %v1604_v0  ;;  %v2079_v22 = vsub.f32 0.0, %v2078_v25  ;;  %v1848_v9 = vadd.f32 %v1847_v61, %v1608_v4 }
0x3c22   :  { %v1846_v28 = vadd.f32 %v1845_v60, %v1606_v54  ;;  %v2087_v8 = vmul.f32 %v2079_v22, %v1360_v33 }
0x3c23   :  { %v2319_v58 = vpop.xlane.xlu0 %2318  ;;  %v2084_v49 = vpop.xlane.xlu1 %2083 }
0x3c24   :  { %v2320_v10 = vsub.f32 0.0, %v2319_v58  ;;  %v2088_v55 = vadd.f32 %v2087_v8, %v1848_v9  ;;  %v2085_v59 = vmul.f32 %v2084_v49, %v1360_v33 }
0x3c26   :  { %v2332_v43 = vmul.f32 %v2329_v63, %v2320_v10  ;;  %v2086_v29 = vadd.f32 %v2085_v59, %v1846_v28 }
0x3c27   :  { %v2564_v13 = vpop.xlane.xlu0 %2563  ;;  %v2325_v30 = vpop.xlane.xlu1 %2324 }
0x3c28   :  { %v2565_v36 = vsub.f32 0.0, %v2564_v13  ;;  %v2333_v26 = vadd.f32 %v2332_v43, %v2088_v55  ;;  %v2330_v37 = vmul.f32 %v2329_v63, %v2325_v30 }
0x3c2a   :  { %v2573_v50 = vmul.f32 %v2565_v36, %v2329_v63  ;;  %v2331_v46 = vadd.f32 %v2330_v37, %v2086_v29 }
0x3c2b   :  { %v2804_v14 = vpop.xlane.xlu0 %2803  ;;  %v2570_v31 = vpop.xlane.xlu1 %2569 }
0x3c2c   :  { %v2805_v17 = vsub.f32 0.0, %v2804_v14  ;;  %v2574_v39 = vadd.f32 %v2573_v50, %v2333_v26  ;;  %v2571_v21 = vmul.f32 %v2570_v31, %v2329_v63 }
0x3c2e   :  { %v2813_v27 = vmul.f32 %v2805_v17, %v2329_v63  ;;  %v2572_v3 = vadd.f32 %v2571_v21, %v2331_v46 }
0x3c30   :  { %v2814_v6 = vadd.f32 %v2813_v27, %v2574_v39 }
0x3c32   :  { %2839 = vst.msk [vmem:[%s5396_s11] sm:$0x3] %vm2837_vm12, %v2814_v6 }
0x3c7c   :  { %v2810_v53 = vpop.xlane.xlu1 %2809 }
0x3c7d   :  { %v2811_v16 = vmul.f32 %v2810_v53, %v2329_v63 }
0x3c7f   :  { %v2812_v24 = vadd.f32 %v2811_v16, %v2572_v3 }
0x3c81   :  { %2838 = vst.msk [vmem:[%s5395_s10] sm:$0x3] %vm2837_vm12, %v2812_v24 }
0x3c82   :  { %4168 = dma.done.wait [#allocation3], 32  }
0x3c83   :  { %4169 = vsyncadd [#allocation3], 4294967264 }
0x3c84   :  { %2861 = vsyncpa [#allocation3], 1 }

</bundles_post_ra>
